<compile_context>
chip_gen: v7x
topology: tpu7x:2x2x1
jax: 0.10.0
libtpu: 0.0.40
codegen_flags: <defaults>
</compile_context>

<pallas_src>
import jax
import jax.numpy as jnp
from jax.experimental import pallas as pl
from jax.experimental.pallas import tpu as pltpu


def _fused_mul_conv_bn_kernel(x_ref, scale_ref, w_ref, gamma_ref, beta_ref, o_ref):
    # Fold the (1, Cin) scale row into the weight tile (sublane broadcast),
    # then cast to bf16 right before the MXU matmul.  All casts live inside
    # the kernel so the wrapper never re-materializes inputs in HBM.
    w_scaled = (w_ref[...] * scale_ref[...]).astype(jnp.bfloat16)      # (tCout, Cin)
    x_bf16 = x_ref[...].astype(jnp.bfloat16)                           # (Cin, P)

    # 1x1 conv == matmul on MXU: (tCout, Cin) @ (Cin, P) -> (tCout, P), f32 acc.
    y = jnp.dot(w_scaled, x_bf16, preferred_element_type=jnp.float32)

    # BatchNorm2d (training mode): per-output-channel batch statistics over the
    # P = N*H*W axis (biased variance).  Correct because the whole P axis lives
    # in one block (only Cout may be gridded).
    mean = jnp.mean(y, axis=1, keepdims=True)                          # (tCout, 1)
    centered = y - mean
    var = jnp.mean(centered * centered, axis=1, keepdims=True)         # biased var
    inv = jax.lax.rsqrt(var + 1e-5)
    # Single-FMA epilogue:  out = y * a + b  with  a = gamma*inv,  b = beta - mean*a
    a = gamma_ref[...] * inv                                           # (tCout, 1)
    b = beta_ref[...] - mean * a                                       # (tCout, 1)
    o_ref[...] = y * a + b
    # TODO(synk): BatchNorm running_mean / running_var momentum updates are
    # module side-state that does not affect the forward output; not emitted.


def _cout_grid_blocks(cout):
    """2-way Cout split on v7x (2 TensorCores/chip); single block elsewhere."""
    try:
        kind = jax.devices()[0].device_kind.lower()
        two_core = "v7" in kind
    except Exception:  # pragma: no cover - defensive fallback
        two_core = False
    if two_core and cout % 16 == 0:   # each half must stay a multiple of 8 sublanes
        return 2
    return 1


def fused_mul_conv_bn(x_nchw, scale_nc11, w_oihw, gamma, beta):
    """x_nchw: (1, Cin, H, W), scale_nc11: (1, Cin, 1, 1),
    w_oihw: (Cout, Cin, 1, 1), gamma/beta: (Cout,). Returns (1, Cout, H, W) f32."""
    N, Cin, H, W = x_nchw.shape
    Cout = w_oihw.shape[0]
    assert N == 1, "module instance uses N=1 broadcast scale"
    P = N * H * W

    # Pure reshapes of the NCHW / OIHW buffers — no transposes, no dtype casts.
    x2d = x_nchw.reshape(Cin, P)                     # (Cin, P)      f32
    scale_row = scale_nc11.reshape(1, Cin)           # (1, Cin)      f32, one contiguous row
    w2d = w_oihw.reshape(Cout, Cin)                  # (Cout, Cin)   f32
    gamma2d = gamma.reshape(Cout, 1).astype(jnp.float32)
    beta2d = beta.reshape(Cout, 1).astype(jnp.float32)

    nblk = _cout_grid_blocks(Cout)
    t_cout = Cout // nblk

    bytes_accessed = (
        x2d.size * 4 + scale_row.size * 4 + w2d.size * 4
        + gamma2d.size * 4 + beta2d.size * 4 + Cout * P * 4
    )
    cost = pl.CostEstimate(
        flops=2 * Cout * Cin * P,
        transcendentals=Cout,            # one rsqrt per output channel
        bytes_accessed=bytes_accessed,
    )

    out2d = pl.pallas_call(
        _fused_mul_conv_bn_kernel,
        out_shape=jax.ShapeDtypeStruct((Cout, P), jnp.float32),
        grid=(nblk,),
        in_specs=[
            pl.BlockSpec((Cin, P), lambda i: (0, 0)),        # x: shared by all blocks
            pl.BlockSpec((1, Cin), lambda i: (0, 0)),        # scale row: shared
            pl.BlockSpec((t_cout, Cin), lambda i: (i, 0)),   # weight slab per block
            pl.BlockSpec((t_cout, 1), lambda i: (i, 0)),     # gamma
            pl.BlockSpec((t_cout, 1), lambda i: (i, 0)),     # beta
        ],
        out_specs=pl.BlockSpec((t_cout, P), lambda i: (i, 0)),
        compiler_params=pltpu.CompilerParams(
            dimension_semantics=("parallel",),
        ),
        cost_estimate=cost,
        # NOTE: no vmem_limit override — total footprint (double-buffered) is
        # well under 2 MiB, safe on v5e/v6e/v7x defaults.
    )(x2d, scale_row, w2d, gamma2d, beta2d)

    # (Cout, P) -> (1, Cout, H, W): pure reshape (no transpose).
    return out2d.reshape(N, Cout, H, W)


if __name__ == "__main__":
    # Shapes implied by the module's forward.
    N, Cin, H, W = 1, 1248, 7, 7
    Cout = 208

    key = jax.random.PRNGKey(0)
    k_x, k_s, k_w = jax.random.split(key, 3)

    x311 = jax.random.normal(k_x, (N, Cin, H, W), dtype=jnp.float32)
    x316 = jax.random.normal(k_s, (N, Cin, 1, 1), dtype=jnp.float32)

    # Conv2d(1248, 208, 1x1, bias=False) weight — deterministic init.
    conv_w = jax.random.normal(k_w, (Cout, Cin, 1, 1), dtype=jnp.float32) * 0.02
    # BatchNorm2d(208) affine params — PyTorch default init: gamma=1, beta=0.
    bn_gamma = jnp.ones((Cout,), dtype=jnp.float32)
    bn_beta = jnp.zeros((Cout,), dtype=jnp.float32)

    out = fused_mul_conv_bn(x311, x316, conv_w, bn_gamma, bn_beta)
    out = jax.block_until_ready(out)
    assert out.shape == (N, Cout, H, W)
    assert bool(jnp.isfinite(out).all())
    print("KERNEL_OK")
</pallas_src>

<mosaic_0001>
module attributes {stable_mosaic.version = 11 : i64} {
  func.func @_fused_mul_conv_bn_kernel(%arg0: i32, %arg1: memref<1248x49xf32, #tpu.memory_space<vmem>>, %arg2: memref<1x1248xf32, #tpu.memory_space<vmem>>, %arg3: memref<208x1248xf32, #tpu.memory_space<vmem>>, %arg4: memref<208x1xf32, #tpu.memory_space<vmem>>, %arg5: memref<208x1xf32, #tpu.memory_space<vmem>>, %arg6: memref<208x49xf32, #tpu.memory_space<vmem>>) attributes {dimension_semantics = [#tpu.dimension_semantics<parallel>], iteration_bounds = array<i64: 1>, scalar_prefetch = 0 : i64, scratch_operands = 0 : i64, tpu.core_type = #tpu.core_type<tc>, window_params = [{pipeline_mode = #tpu.pipeline_mode<synchronous>, transform_indices = @transform_0, window_bounds = array<i64: 1248, 49>}, {pipeline_mode = #tpu.pipeline_mode<synchronous>, transform_indices = @transform_1, window_bounds = array<i64: 1, 1248>}, {transform_indices = @transform_2, window_bounds = array<i64: 208, 1248>}, {transform_indices = @transform_3, window_bounds = array<i64: 208, 1>}, {transform_indices = @transform_4, window_bounds = array<i64: 208, 1>}, {transform_indices = @transform_5, window_bounds = array<i64: 208, 49>}]} {
    %c0 = arith.constant 0 : index
    %c0_0 = arith.constant 0 : index
    %0 = vector.load %arg3[%c0, %c0_0] : memref<208x1248xf32, #tpu.memory_space<vmem>>, vector<208x1248xf32>
    %c0_1 = arith.constant 0 : index
    %c0_2 = arith.constant 0 : index
    %1 = vector.load %arg2[%c0_1, %c0_2] : memref<1x1248xf32, #tpu.memory_space<vmem>>, vector<1x1248xf32>
    %2 = vector.broadcast %1 : vector<1x1248xf32> to vector<208x1248xf32>
    %3 = arith.mulf %0, %2 : vector<208x1248xf32>
    %4 = arith.truncf %3 : vector<208x1248xf32> to vector<208x1248xbf16>
    %c0_3 = arith.constant 0 : index
    %c0_4 = arith.constant 0 : index
    %5 = vector.load %arg1[%c0_3, %c0_4] : memref<1248x49xf32, #tpu.memory_space<vmem>>, vector<1248x49xf32>
    %6 = arith.truncf %5 : vector<1248x49xf32> to vector<1248x49xbf16>
    %cst = arith.constant dense<0.000000e+00> : vector<208x49xf32>
    %7 = tpu.matmul %4, %6, %cst {dimension_numbers = #tpu.dot_dimension_numbers<[1], [0], [0], [1], [0, 0, 1, 1], [], []>} : vector<208x1248xbf16>, vector<1248x49xbf16>, vector<208x49xf32> -> vector<208x49xf32>
    %cst_5 = arith.constant dense<0.000000e+00> : vector<208xf32>
    %8 = vector.multi_reduction <add>, %7, %cst_5 [1] : vector<208x49xf32> to vector<208xf32>
    %9 = vector.shape_cast %8 : vector<208xf32> to vector<208x1xf32>
    %cst_6 = arith.constant 4.900000e+01 : f32
    %10 = vector.broadcast %cst_6 : f32 to vector<208x1xf32>
    %11 = arith.divf %9, %10 : vector<208x1xf32>
    %12 = vector.broadcast %11 : vector<208x1xf32> to vector<208x49xf32>
    %13 = arith.subf %7, %12 : vector<208x49xf32>
    %14 = arith.mulf %13, %13 : vector<208x49xf32>
    %cst_7 = arith.constant dense<0.000000e+00> : vector<208xf32>
    %15 = vector.multi_reduction <add>, %14, %cst_7 [1] : vector<208x49xf32> to vector<208xf32>
    %16 = vector.shape_cast %15 : vector<208xf32> to vector<208x1xf32>
    %cst_8 = arith.constant 4.900000e+01 : f32
    %17 = vector.broadcast %cst_8 : f32 to vector<208x1xf32>
    %18 = arith.divf %16, %17 : vector<208x1xf32>
    %cst_9 = arith.constant 9.99999974E-6 : f32
    %19 = vector.broadcast %cst_9 : f32 to vector<208x1xf32>
    %20 = arith.addf %18, %19 : vector<208x1xf32>
    %21 = math.rsqrt %20 : vector<208x1xf32>
    %c0_10 = arith.constant 0 : index
    %c0_11 = arith.constant 0 : index
    %22 = vector.load %arg4[%c0_10, %c0_11] : memref<208x1xf32, #tpu.memory_space<vmem>>, vector<208x1xf32>
    %23 = arith.mulf %22, %21 : vector<208x1xf32>
    %c0_12 = arith.constant 0 : index
    %c0_13 = arith.constant 0 : index
    %24 = vector.load %arg5[%c0_12, %c0_13] : memref<208x1xf32, #tpu.memory_space<vmem>>, vector<208x1xf32>
    %25 = arith.mulf %11, %23 : vector<208x1xf32>
    %26 = arith.subf %24, %25 : vector<208x1xf32>
    %27 = vector.broadcast %23 : vector<208x1xf32> to vector<208x49xf32>
    %28 = arith.mulf %7, %27 : vector<208x49xf32>
    %29 = vector.broadcast %26 : vector<208x1xf32> to vector<208x49xf32>
    %30 = arith.addf %28, %29 : vector<208x49xf32>
    %c0_14 = arith.constant 0 : index
    %c0_15 = arith.constant 0 : index
    %31 = vector.load %arg6[%c0_14, %c0_15] : memref<208x49xf32, #tpu.memory_space<vmem>>, vector<208x49xf32>
    tpu.vector_store %arg6[%c0_14, %c0_15], %30 {strides = array<i32>} : memref<208x49xf32, #tpu.memory_space<vmem>>, vector<208x49xf32>,
    return
  }
  func.func @transform_0(%arg0: i32) -> (i32, i32) {
    %c0_i32 = arith.constant 0 : i32
    %c0_i32_0 = arith.constant 0 : i32
    %c0_i32_1 = arith.constant 0 : i32
    return %c0_i32, %c0_i32_0 : i32, i32
  }
  func.func @transform_1(%arg0: i32) -> (i32, i32) {
    %c0_i32 = arith.constant 0 : i32
    %c0_i32_0 = arith.constant 0 : i32
    %c0_i32_1 = arith.constant 0 : i32
    return %c0_i32, %c0_i32_0 : i32, i32
  }
  func.func @transform_2(%arg0: i32) -> (i32, i32) {
    %c0_i32 = arith.constant 0 : i32
    %c0_i32_0 = arith.constant 0 : i32
    return %arg0, %c0_i32 : i32, i32
  }
  func.func @transform_3(%arg0: i32) -> (i32, i32) {
    %c0_i32 = arith.constant 0 : i32
    %c0_i32_0 = arith.constant 0 : i32
    return %arg0, %c0_i32 : i32, i32
  }
  func.func @transform_4(%arg0: i32) -> (i32, i32) {
    %c0_i32 = arith.constant 0 : i32
    %c0_i32_0 = arith.constant 0 : i32
    return %arg0, %c0_i32 : i32, i32
  }
  func.func @transform_5(%arg0: i32) -> (i32, i32) {
    %c0_i32 = arith.constant 0 : i32
    %c0_i32_0 = arith.constant 0 : i32
    return %arg0, %c0_i32 : i32, i32
  }
}

</mosaic_0001>

<bundles_post_ra>
// kernel: tpu_custom_call.1
= control target key start
LH: loop header
LB: loop body
LE: loop exit
PB: predicated region body
PF: predicated region fallthrough
CT: control target
= control target key end

     0   :  { %v285_v3 = vlaneseq  ;;  %v2930_v4 = vmov 0   ;;  %vm959_vm0 = vcmask 785408   ;;  %vm1684_vm1 = vcmask 400384   ;;  %s5255_s0 = inlined_call_operand.vmem [shape: f32[1248,49], index: 0, kind: input, shape index: {}]   ;;  %s5256_s2 = inlined_call_operand.vmem [shape: f32[208,1248], index: 2, kind: input, shape index: {}]   ;;  %s5257_s1 = inlined_call_operand.vmem [shape: f32[1,1248], index: 1, kind: input, shape index: {}]   ;;  %s5258_s3 = inlined_call_operand.vmem [shape: f32[208,1], index: 3, kind: input, shape index: {}]   ;;  %s5259_s4 = inlined_call_operand.vmem [shape: f32[208,1], index: 4, kind: input, shape index: {}]   ;;  %s5260_s5 = inlined_call_operand.vmem [shape: f32[208,49], index: 5, kind: output, shape index: {}]  }
   0x1   :  { %v741_v0 = vld [vmem:[%s5255_s0 + $0x80] sm:$0xff]  ;;  %v742_v1 = vld [vmem:[%s5255_s0 + $0x88] sm:$0xff]  ;;  %2876 = vset.pattern.permute.xlu0 %v2930_v4  ;;  %2877 = vset.pattern.permute.xlu1 %v2930_v4  ;;  %v743_v7 = vld [vmem:[%s5255_s0 + $0x90] sm:$0xff] }
   0x2   :  { %v725_v2 = vld [vmem:[%s5255_s0] sm:$0xff]  ;;  %v889_v5 = vpack.c.bf16 %v742_v1, %v741_v0  ;;  %v726_v6 = vld [vmem:[%s5255_s0 + $0x8] sm:$0xff]  ;;  %v744_v8 = vld [vmem:[%s5255_s0 + $0x98] sm:$0xff]  ;;  %v2993_v16 = vshrl.u32 %v285_v3, 7 }
   0x3   :  { %v881_v9 = vpack.c.bf16 %v726_v6, %v725_v2  ;;  %v890_v10 = vpack.c.bf16 %v744_v8, %v743_v7  ;;  %v727_v11 = vld [vmem:[%s5255_s0 + $0x10] sm:$0xff]  ;;  %v728_v12 = vld [vmem:[%s5255_s0 + $0x18] sm:$0xff]  ;;  %v745_v13 = vld [vmem:[%s5255_s0 + $0xa0] sm:$0xff] }
   0x4   :  { %2483 = vmatprep.subr.bf16.mxu0 %v889_v5  ;;  %2859 = vmatprep.subr.bf16.mxu1 %v889_v5  ;;  %v746_v14 = vld [vmem:[%s5255_s0 + $0xa8] sm:$0xff]  ;;  %v882_v15 = vpack.c.bf16 %v728_v12, %v727_v11  ;;  %v729_v18 = vld [vmem:[%s5255_s0 + $0x20] sm:$0xff]  ;;  %v747_v20 = vld [vmem:[%s5255_s0 + $0xb0] sm:$0xff]  ;;  %v291_v25 = vsub.s32 1, %v2993_v16  ;;  %v295_v27 = vsub.s32 2, %v2993_v16  ;;  %v287_v31 = vsub.s32 0, %v2993_v16 }
   0x5   :  { %2484 = vmatpush3.bf16.msra.mxu0 %v881_v9  ;;  %2867 = vmatpush3.bf16.msra.mxu1 %v881_v9  ;;  %v891_v17 = vpack.c.bf16 %v746_v14, %v745_v13  ;;  %v730_v19 = vld [vmem:[%s5255_s0 + $0x28] sm:$0xff]  ;;  %v748_v21 = vld [vmem:[%s5255_s0 + $0xb8] sm:$0xff]  ;;  %v731_v23 = vld [vmem:[%s5255_s0 + $0x30] sm:$0xff]  ;;  %v307_v59 = vsub.s32 5, %v2993_v16  ;;  %v303_v1 = vsub.s32 4, %v2993_v16 }
   0x6   :  { %2485 = vmatprep.subr.bf16.mxu0 %v890_v10  ;;  %2860 = vmatprep.subr.bf16.mxu1 %v890_v10  ;;  %v883_v22 = vpack.c.bf16 %v730_v19, %v729_v18  ;;  %v732_v24 = vld [vmem:[%s5255_s0 + $0x38] sm:$0xff]  ;;  %v892_v26 = vpack.c.bf16 %v748_v21, %v747_v20  ;;  %v749_v28 = vld [vmem:[%s5255_s0 + $0xc0] sm:$0xff]  ;;  %v750_v29 = vld [vmem:[%s5255_s0 + $0xc8] sm:$0xff] }
   0x7   :  { %v22_v30 = vld [vmem:[%s5256_s2 + $0x8] sm:$0xff]  ;;  %v884_v32 = vpack.c.bf16 %v732_v24, %v731_v23  ;;  %v32_v33 = vld [vmem:[%s5256_s2 + $0x58] sm:$0xff]  ;;  %v3031_v34 = vld [vmem:[%s5257_s1] sm:$0xff]  ;;  %v893_v41 = vpack.c.bf16 %v750_v29, %v749_v28 }
   0x8   :  { %v282_v35 = vld [vmem:[%s5257_s1 + $0x8] sm:$0x3]  ;;  %v3037_v36 = vrot.slane %v3031_v34, %v291_v25  ;;  %v172_v40 = vld [vmem:[%s5256_s2 + $0x4b8] sm:$0xff]  ;;  %v733_v42 = vld [vmem:[%s5255_s0 + $0x40] sm:$0xff]  ;;  %v3056_v44 = vrot.slane %v3031_v34, %v295_v27  ;;  %v3107_v8 = vrot.slane %v3031_v34, %v287_v31  ;;  %v3113_v10 = vrot.slane %v3031_v34, %v307_v59 }
   0x9   :  { %2486 = vmatpush3.bf16.msra.mxu0 %v882_v15  ;;  %2868 = vmatpush3.bf16.msra.mxu1 %v882_v15  ;;  %v3039_v37 = vrot.slane %v282_v35, %v287_v31  ;;  %v3041_v38 = vrot.slane %v282_v35, %v291_v25  ;;  %v162_v39 = vld [vmem:[%s5256_s2 + $0x468] sm:$0xff]  ;;  %v751_v45 = vld [vmem:[%s5255_s0 + $0xd0] sm:$0xff]  ;;  %v752_v46 = vld [vmem:[%s5255_s0 + $0xd8] sm:$0xff]  ;;  %v3134_v20 = vrot.slane %v3031_v34, %v303_v1 }
   0xa   :  { %2487 = vmatprep.subr.bf16.mxu0 %v891_v17  ;;  %2861 = vmatprep.subr.bf16.mxu1 %v891_v17  ;;  %v734_v43 = vld [vmem:[%s5255_s0 + $0x48] sm:$0xff]  ;;  %v336_v47 = vmul.f32 %v3037_v36, %v22_v30  ;;  %v346_v48 = vmul.f32 %v3037_v36, %v32_v33  ;;  %v476_v49 = vmul.f32 %v3037_v36, %v162_v39  ;;  %v735_v55 = vld [vmem:[%s5255_s0 + $0x50] sm:$0xff]  ;;  %v736_v56 = vld [vmem:[%s5255_s0 + $0x58] sm:$0xff] }
   0xb   :  { %v486_v50 = vmul.f32 %v3037_v36, %v172_v40  ;;  %v885_v51 = vpack.c.bf16 %v734_v43, %v733_v42  ;;  %v894_v54 = vpack.c.bf16 %v752_v46, %v751_v45  ;;  %v753_v57 = vld [vmem:[%s5255_s0 + $0xe0] sm:$0xff]  ;;  %v754_v58 = vld [vmem:[%s5255_s0 + $0xe8] sm:$0xff]  ;;  %v886_v60 = vpack.c.bf16 %v736_v56, %v735_v55  ;;  %v755_v0 = vld [vmem:[%s5255_s0 + $0xf0] sm:$0xff] }
   0xc   :  { %v596_v52 = vpack.c.bf16 %v346_v48, %v336_v47  ;;  %v895_v61 = vpack.c.bf16 %v754_v58, %v753_v57  ;;  %v737_v62 = vld [vmem:[%s5255_s0 + $0x60] sm:$0xff]  ;;  %v738_v63 = vld [vmem:[%s5255_s0 + $0x68] sm:$0xff]  ;;  %v756_v2 = vld [vmem:[%s5255_s0 + $0xf8] sm:$0xff] }
   0xd   :  { %2488 = vmatpush3.bf16.msra.mxu0 %v883_v22  ;;  %2869 = vmatpush3.bf16.msra.mxu1 %v883_v22  ;;  %v666_v53 = vpack.c.bf16 %v486_v50, %v476_v49  ;;  %v739_v3 = vld [vmem:[%s5255_s0 + $0x70] sm:$0xff]  ;;  %v740_v5 = vld [vmem:[%s5255_s0 + $0x78] sm:$0xff]  ;;  %v21_v6 = vld [vmem:[%s5256_s2] sm:$0xff]  ;;  %v887_v11 = vpack.c.bf16 %v738_v63, %v737_v62  ;;  %v896_v15 = vpack.c.bf16 %v756_v2, %v755_v0 }
   0xe   :  { %2489 = vmatprep.subr.bf16.mxu0 %v892_v26  ;;  %2862 = vmatprep.subr.bf16.mxu1 %v892_v26  ;;  %v31_v7 = vld [vmem:[%s5256_s2 + $0x50] sm:$0xff]  ;;  %v161_v9 = vld [vmem:[%s5256_s2 + $0x460] sm:$0xff]  ;;  %v806_v14 = vld [vmem:[%s5255_s0 + $0x288] sm:$0xff]  ;;  %v888_v21 = vpack.c.bf16 %v740_v5, %v739_v3  ;;  %v335_v25 = vmul.f32 %v3107_v8, %v21_v6 }
   0xf   :  { %1031 = vmatprep.mubr.bf16.mxu0 %v596_v52  ;;  %1087 = vmatprep.mubr.bf16.mxu1 %v666_v53  ;;  %v171_v12 = vld [vmem:[%s5256_s2 + $0x4b0] sm:$0xff]  ;;  %v805_v13 = vld [vmem:[%s5255_s0 + $0x280] sm:$0xff]  ;;  %v774_v18 = vld [vmem:[%s5255_s0 + $0x188] sm:$0xff]  ;;  %v345_v26 = vmul.f32 %v3107_v8, %v31_v7  ;;  %v475_v27 = vmul.f32 %v3107_v8, %v161_v9 }
  0x10   :  { %v773_v17 = vld [vmem:[%s5255_s0 + $0x180] sm:$0xff]  ;;  %v42_v19 = vld [vmem:[%s5256_s2 + $0xa8] sm:$0xff]  ;;  %v52_v22 = vld [vmem:[%s5256_s2 + $0xf8] sm:$0xff]  ;;  %v485_v28 = vmul.f32 %v3107_v8, %v171_v12 }
  0x11   :  { %2490 = vmatpush3.bf16.msra.mxu0 %v884_v32  ;;  %2870 = vmatpush3.bf16.msra.mxu1 %v884_v32  ;;  %v182_v23 = vld [vmem:[%s5256_s2 + $0x508] sm:$0xff]  ;;  %v192_v24 = vld [vmem:[%s5256_s2 + $0x558] sm:$0xff]  ;;  %v789_v29 = vld [vmem:[%s5255_s0 + $0x200] sm:$0xff]  ;;  %v921_v32 = vpack.c.bf16 %v806_v14, %v805_v13  ;;  %v905_v33 = vpack.c.bf16 %v774_v18, %v773_v17  ;;  %v356_v39 = vmul.f32 %v3037_v36, %v42_v19 }
  0x12   :  { %2491 = vmatprep.subr.bf16.mxu0 %v893_v41  ;;  %2863 = vmatprep.subr.bf16.mxu1 %v893_v41  ;;  %v790_v30 = vld [vmem:[%s5255_s0 + $0x208] sm:$0xff]  ;;  %v757_v31 = vld [vmem:[%s5255_s0 + $0x100] sm:$0xff]  ;;  %v807_v40 = vld [vmem:[%s5255_s0 + $0x290] sm:$0xff]  ;;  %v366_v42 = vmul.f32 %v3037_v36, %v52_v22  ;;  %v496_v43 = vmul.f32 %v3037_v36, %v182_v23  ;;  %v506_v45 = vmul.f32 %v3037_v36, %v192_v24 }
  0x13   :  { %v758_v35 = vld [vmem:[%s5255_s0 + $0x108] sm:$0xff]  ;;  %v808_v41 = vld [vmem:[%s5255_s0 + $0x298] sm:$0xff]  ;;  %v41_v46 = vld [vmem:[%s5256_s2 + $0xa0] sm:$0xff]  ;;  %v595_v52 = vpack.c.bf16 %v345_v26, %v335_v25  ;;  %v665_v53 = vpack.c.bf16 %v485_v28, %v475_v27  ;;  %v913_v57 = vpack.c.bf16 %v790_v30, %v789_v29 }
  0x14   :  { %v51_v47 = vld [vmem:[%s5256_s2 + $0xf0] sm:$0xff]  ;;  %v181_v48 = vld [vmem:[%s5256_s2 + $0x500] sm:$0xff]  ;;  %v776_v55 = vld [vmem:[%s5255_s0 + $0x198] sm:$0xff]  ;;  %v897_v58 = vpack.c.bf16 %v758_v35, %v757_v31  ;;  %v922_v59 = vpack.c.bf16 %v808_v41, %v807_v40  ;;  %v606_v63 = vpack.c.bf16 %v366_v42, %v356_v39  ;;  %v676_v0 = vpack.c.bf16 %v506_v45, %v496_v43 }
  0x15   :  { %2492 = vmatpush3.bf16.msra.mxu0 %v885_v51  ;;  %2871 = vmatpush3.bf16.msra.mxu1 %v885_v51  ;;  %v191_v49 = vld [vmem:[%s5256_s2 + $0x550] sm:$0xff]  ;;  %v792_v51 = vld [vmem:[%s5255_s0 + $0x218] sm:$0xff]  ;;  %v62_v62 = vld [vmem:[%s5256_s2 + $0x148] sm:$0xff]  ;;  %v355_v1 = vmul.f32 %v3107_v8, %v41_v46  ;;  %v365_v6 = vmul.f32 %v3107_v8, %v51_v47  ;;  %v495_v7 = vmul.f32 %v3107_v8, %v181_v48 }
  0x16   :  { %2493 = vmatprep.subr.bf16.mxu0 %v894_v54  ;;  %2864 = vmatprep.subr.bf16.mxu1 %v894_v54  ;;  %v791_v50 = vld [vmem:[%s5255_s0 + $0x210] sm:$0xff]  ;;  %v72_v2 = vld [vmem:[%s5256_s2 + $0x198] sm:$0xff]  ;;  %v202_v3 = vld [vmem:[%s5256_s2 + $0x5a8] sm:$0xff]  ;;  %v505_v9 = vmul.f32 %v3107_v8, %v191_v49  ;;  %v376_v18 = vmul.f32 %v3037_v36, %v62_v62 }
  0x17   :  { %v775_v54 = vld [vmem:[%s5255_s0 + $0x190] sm:$0xff]  ;;  %v212_v5 = vld [vmem:[%s5256_s2 + $0x5f8] sm:$0xff]  ;;  %v810_v12 = vld [vmem:[%s5255_s0 + $0x2a8] sm:$0xff]  ;;  %v386_v19 = vmul.f32 %v3037_v36, %v72_v2  ;;  %v605_v35 = vpack.c.bf16 %v365_v6, %v355_v1 }
  0x18   :  { %v759_v56 = vld [vmem:[%s5255_s0 + $0x110] sm:$0xff]  ;;  %v777_v13 = vld [vmem:[%s5255_s0 + $0x1a0] sm:$0xff]  ;;  %v778_v14 = vld [vmem:[%s5255_s0 + $0x1a8] sm:$0xff]  ;;  %v526_v22 = vmul.f32 %v3037_v36, %v212_v5  ;;  %v675_v39 = vpack.c.bf16 %v505_v9, %v495_v7 }
  0x19   :  { %2494 = vmatpush3.bf16.msra.mxu0 %v886_v60  ;;  %2872 = vmatpush3.bf16.msra.mxu1 %v886_v60  ;;  %v760_v60 = vld [vmem:[%s5255_s0 + $0x118] sm:$0xff]  ;;  %v793_v23 = vld [vmem:[%s5255_s0 + $0x220] sm:$0xff]  ;;  %v907_v25 = vpack.c.bf16 %v778_v14, %v777_v13  ;;  %v794_v26 = vld [vmem:[%s5255_s0 + $0x228] sm:$0xff]  ;;  %v616_v43 = vpack.c.bf16 %v386_v19, %v376_v18 }
  0x1a   :  { %2495 = vmatprep.subr.bf16.mxu0 %v895_v61  ;;  %2865 = vmatprep.subr.bf16.mxu1 %v895_v61  ;;  %v809_v61 = vld [vmem:[%s5255_s0 + $0x2a0] sm:$0xff]  ;;  %v898_v17 = vpack.c.bf16 %v760_v60, %v759_v56  ;;  %v71_v28 = vld [vmem:[%s5256_s2 + $0x190] sm:$0xff]  ;;  %v780_v40 = vld [vmem:[%s5255_s0 + $0x1b8] sm:$0xff]  ;;  %v915_v49 = vpack.c.bf16 %v794_v26, %v793_v23 }
  0x1b   :  { %v923_v24 = vpack.c.bf16 %v810_v12, %v809_v61  ;;  %v61_v27 = vld [vmem:[%s5256_s2 + $0x140] sm:$0xff]  ;;  %v211_v30 = vld [vmem:[%s5256_s2 + $0x5f0] sm:$0xff]  ;;  %v812_v42 = vld [vmem:[%s5255_s0 + $0x2b8] sm:$0xff] }
  0x1c   :  { %v201_v29 = vld [vmem:[%s5256_s2 + $0x5a0] sm:$0xff]  ;;  %v811_v41 = vld [vmem:[%s5255_s0 + $0x2b0] sm:$0xff]  ;;  %v764_v47 = vld [vmem:[%s5255_s0 + $0x138] sm:$0xff]  ;;  %v525_v62 = vmul.f32 %v3107_v8, %v211_v30 }
  0x1d   :  { %2496 = vmatpush3.bf16.msra.mxu0 %v887_v11  ;;  %2873 = vmatpush3.bf16.msra.mxu1 %v887_v11  ;;  %v906_v11 = vpack.c.bf16 %v776_v55, %v775_v54  ;;  %v761_v31 = vld [vmem:[%s5255_s0 + $0x120] sm:$0xff]  ;;  %v763_v46 = vld [vmem:[%s5255_s0 + $0x130] sm:$0xff]  ;;  %v82_v48 = vld [vmem:[%s5256_s2 + $0x1e8] sm:$0xff]  ;;  %v3288_v54 = vmul.f32 %v3107_v8, %v61_v27  ;;  %v385_v55 = vmul.f32 %v3107_v8, %v71_v28 }
  0x1e   :  { %2497 = vmatprep.subr.bf16.mxu0 %v896_v15  ;;  %2866 = vmatprep.subr.bf16.mxu1 %v896_v15  ;;  %v914_v15 = vpack.c.bf16 %v792_v51, %v791_v50  ;;  %v92_v51 = vld [vmem:[%s5256_s2 + $0x238] sm:$0xff]  ;;  %v781_v60 = vld [vmem:[%s5255_s0 + $0x1c0] sm:$0xff]  ;;  %v515_v61 = vmul.f32 %v3107_v8, %v201_v29  ;;  %v814_v2 = vld [vmem:[%s5255_s0 + $0x2c8] sm:$0xff]  ;;  %v900_v9 = vpack.c.bf16 %v764_v47, %v763_v46 }
  0x1f   :  { %v813_v1 = vld [vmem:[%s5255_s0 + $0x2c0] sm:$0xff]  ;;  %v91_v12 = vld [vmem:[%s5256_s2 + $0x230] sm:$0xff]  ;;  %v766_v14 = vld [vmem:[%s5255_s0 + $0x148] sm:$0xff] }
  0x20   :  { %v81_v7 = vld [vmem:[%s5256_s2 + $0x1e0] sm:$0xff]  ;;  %v925_v19 = vpack.c.bf16 %v814_v2, %v813_v1  ;;  %v783_v23 = vld [vmem:[%s5255_s0 + $0x1d0] sm:$0xff]  ;;  %v784_v26 = vld [vmem:[%s5255_s0 + $0x1d8] sm:$0xff] }
  0x21   :  { %2498 = vmatpush3.bf16.msra.mxu0 %v888_v21  ;;  %2874 = vmatpush3.bf16.msra.mxu1 %v888_v21  ;;  %v516_v21 = vmul.f32 %v3037_v36, %v202_v3  ;;  %v406_v3 = vmul.f32 %v3037_v36, %v92_v51  ;;  %v765_v13 = vld [vmem:[%s5255_s0 + $0x140] sm:$0xff]  ;;  %v815_v27 = vld [vmem:[%s5255_s0 + $0x2d0] sm:$0xff]  ;;  %v816_v28 = vld [vmem:[%s5255_s0 + $0x2d8] sm:$0xff]  ;;  %v910_v46 = vpack.c.bf16 %v784_v26, %v783_v23 }
  0x22   :  { %2671 = vmatprep.subr.bf16.mxu0 %v921_v32  ;;  %2577 = vmatprep.subr.bf16.mxu1 %v905_v33  ;;  %v762_v32 = vld [vmem:[%s5255_s0 + $0x128] sm:$0xff]  ;;  %v779_v33 = vld [vmem:[%s5255_s0 + $0x1b0] sm:$0xff]  ;;  %v926_v47 = vpack.c.bf16 %v816_v28, %v815_v27  ;;  %v769_v1 = vld [vmem:[%s5255_s0 + $0x160] sm:$0xff] }
  0x23   :  { %v686_v45 = vpack.c.bf16 %v526_v22, %v516_v21  ;;  %v899_v50 = vpack.c.bf16 %v762_v32, %v761_v31  ;;  %v908_v56 = vpack.c.bf16 %v780_v40, %v779_v33  ;;  %v797_v21 = vld [vmem:[%s5255_s0 + $0x240] sm:$0xff]  ;;  %v798_v22 = vld [vmem:[%s5255_s0 + $0x248] sm:$0xff]  ;;  %v112_v32 = vld [vmem:[%s5256_s2 + $0x2d8] sm:$0xff] }
  0x24   :  { %1032 = vmatmul.mubr.bf16.vlgmr.msra.gmra.mrb[0].mxu0 %v595_v52  ;;  %1088 = vmatmul.mubr.bf16.vlgmr.msra.gmra.mrb[0].mxu1 %v665_v53  ;;  %v222_v52 = vld [vmem:[%s5256_s2 + $0x648] sm:$0xff]  ;;  %v232_v53 = vld [vmem:[%s5256_s2 + $0x698] sm:$0xff]  ;;  %v917_v40 = vpack.c.bf16 %v798_v22, %v797_v21  ;;  %v251_v22 = vld [vmem:[%s5256_s2 + $0x730] sm:$0xff] }
  0x25   :  { %2672 = vmatpush3.bf16.msra.mxu0 %v913_v57  ;;  %2578 = vmatpush3.bf16.msra.mxu1 %v897_v58  ;;  %v924_v57 = vpack.c.bf16 %v812_v42, %v811_v41  ;;  %v795_v58 = vld [vmem:[%s5255_s0 + $0x230] sm:$0xff]  ;;  %v536_v5 = vmul.f32 %v3037_v36, %v222_v52  ;;  %v546_v6 = vmul.f32 %v3037_v36, %v232_v53  ;;  %v102_v31 = vld [vmem:[%s5256_s2 + $0x288] sm:$0xff]  ;;  %v252_v41 = vld [vmem:[%s5256_s2 + $0x738] sm:$0xff] }
  0x26   :  { %1039 = vmatprep.mubr.bf16.mxu0 %v606_v63  ;;  %1095 = vmatprep.mubr.bf16.mxu1 %v676_v0  ;;  %v396_v63 = vmul.f32 %v3037_v36, %v82_v48  ;;  %v782_v0 = vld [vmem:[%s5255_s0 + $0x1c8] sm:$0xff]  ;;  %v767_v42 = vld [vmem:[%s5255_s0 + $0x150] sm:$0xff]  ;;  %v416_v53 = vmul.f32 %v3037_v36, %v102_v31  ;;  %v272_v27 = vld [vmem:[%s5256_s2 + $0x7d8] sm:$0xff] }
  0x27   :  { %2673 = vmatprep.subr.bf16.mxu0 %v922_v59  ;;  %2579 = vmatprep.subr.bf16.mxu1 %v906_v11  ;;  %v796_v59 = vld [vmem:[%s5255_s0 + $0x238] sm:$0xff]  ;;  %v909_v18 = vpack.c.bf16 %v782_v0, %v781_v60  ;;  %v696_v30 = vpack.c.bf16 %v546_v6, %v536_v5  ;;  %v242_v33 = vld [vmem:[%s5256_s2 + $0x6e8] sm:$0xff]  ;;  %v799_v48 = vld [vmem:[%s5255_s0 + $0x250] sm:$0xff]  ;;  %v566_v60 = vmul.f32 %v3037_v36, %v252_v41 }
  0x28   :  { %v916_v11 = vpack.c.bf16 %v796_v59, %v795_v58  ;;  %v626_v29 = vpack.c.bf16 %v406_v3, %v396_v63  ;;  %v426_v58 = vmul.f32 %v3037_v36, %v112_v32  ;;  %v556_v59 = vmul.f32 %v3037_v36, %v242_v33  ;;  %v770_v2 = vld [vmem:[%s5255_s0 + $0x168] sm:$0xff]  ;;  %v241_v3 = vld [vmem:[%s5256_s2 + $0x6e0] sm:$0xff]  ;;  %v772_v33 = vld [vmem:[%s5255_s0 + $0x178] sm:$0xff] }
  0x29   :  { %2674 = vmatpush3.bf16.msra.mxu0 %v914_v15  ;;  %2580 = vmatpush3.bf16.msra.mxu1 %v898_v17  ;;  %v221_v15 = vld [vmem:[%s5256_s2 + $0x640] sm:$0xff]  ;;  %v231_v17 = vld [vmem:[%s5256_s2 + $0x690] sm:$0xff]  ;;  %v122_v23 = vld [vmem:[%s5256_s2 + $0x328] sm:$0xff]  ;;  %v903_v28 = vpack.c.bf16 %v770_v2, %v769_v1  ;;  %v555_v41 = vmul.f32 %v3107_v8, %v241_v3 }
  0x2a   :  { %2675 = vmatprep.subr.bf16.mxu0 %v923_v24  ;;  %2581 = vmatprep.subr.bf16.mxu1 %v907_v25  ;;  %v615_v24 = vpack.c.bf16 %v385_v55, %v3288_v54  ;;  %v685_v25 = vpack.c.bf16 %v525_v62, %v515_v61  ;;  %v535_v51 = vmul.f32 %v3107_v8, %v221_v15  ;;  %v786_v54 = vld [vmem:[%s5255_s0 + $0x1e8] sm:$0xff]  ;;  %v817_v55 = vld [vmem:[%s5255_s0 + $0x2e0] sm:$0xff]  ;;  %v111_v62 = vld [vmem:[%s5256_s2 + $0x2d0] sm:$0xff] }
  0x2b   :  { %v545_v52 = vmul.f32 %v3107_v8, %v231_v17  ;;  %v101_v61 = vld [vmem:[%s5256_s2 + $0x280] sm:$0xff]  ;;  %v819_v15 = vld [vmem:[%s5255_s0 + $0x2f0] sm:$0xff]  ;;  %v820_v17 = vld [vmem:[%s5255_s0 + $0x2f8] sm:$0xff]  ;;  %v706_v21 = vpack.c.bf16 %v566_v60, %v556_v59  ;;  %v425_v31 = vmul.f32 %v3107_v8, %v111_v62 }
  0x2c   :  { %1040 = vmatmul.mubr.bf16.gmra.mrb[4].mxu0 %v605_v35  ;;  %1096 = vmatmul.mubr.bf16.gmra.mrb[4].mxu1 %v675_v39  ;;  %v3362_v35 = vmul.f32 %v3107_v8, %v81_v7  ;;  %v901_v39 = vpack.c.bf16 %v766_v14, %v765_v13  ;;  %v801_v7 = vld [vmem:[%s5255_s0 + $0x260] sm:$0xff]  ;;  %v788_v14 = vld [vmem:[%s5255_s0 + $0x1f8] sm:$0xff]  ;;  %v262_v26 = vld [vmem:[%s5256_s2 + $0x788] sm:$0xff] }
  0x2d   :  { %1047 = vmatprep.mubr.bf16.mxu0 %v616_v43  ;;  %1103 = vmatprep.mubr.bf16.mxu1 %v686_v45  ;;  %v768_v43 = vld [vmem:[%s5255_s0 + $0x158] sm:$0xff]  ;;  %v3374_v45 = vmul.f32 %v3107_v8, %v91_v12  ;;  %v695_v13 = vpack.c.bf16 %v545_v52, %v535_v51  ;;  %v261_v60 = vld [vmem:[%s5256_s2 + $0x780] sm:$0xff]  ;;  %v142_v62 = vld [vmem:[%s5256_s2 + $0x3c8] sm:$0xff] }
  0x2e   :  { %2676 = vmatpush3.bf16.msra.mxu0 %v915_v49  ;;  %2582 = vmatpush3.bf16.msra.mxu1 %v899_v50  ;;  %v800_v49 = vld [vmem:[%s5255_s0 + $0x258] sm:$0xff]  ;;  %v785_v50 = vld [vmem:[%s5255_s0 + $0x1e0] sm:$0xff]  ;;  %v902_v63 = vpack.c.bf16 %v768_v43, %v767_v42  ;;  %v565_v42 = vmul.f32 %v3107_v8, %v251_v22  ;;  %v436_v43 = vmul.f32 %v3037_v36, %v122_v23  ;;  %v34_v2 = vld [vmem:[%s5256_s2 + $0x68] sm:$0xff] }
  0x2f   :  { %2583 = vmatprep.subr.bf16.mxu1 %v908_v56  ;;  %2677 = vmatprep.subr.bf16.mxu0 %v924_v57  ;;  %v818_v56 = vld [vmem:[%s5255_s0 + $0x2e8] sm:$0xff]  ;;  %v315_v57 = vsub.s32 7, %v2993_v16  ;;  %v918_v0 = vpack.c.bf16 %v800_v49, %v799_v48  ;;  %v911_v5 = vpack.c.bf16 %v786_v54, %v785_v50  ;;  %v625_v12 = vpack.c.bf16 %v3374_v45, %v3362_v35  ;;  %v837_v45 = vld [vmem:[%s5255_s0 + $0x380] sm:$0xff]  ;;  %v24_v1 = vld [vmem:[%s5256_s2 + $0x18] sm:$0xff] }
  0x30   :  { %v927_v6 = vpack.c.bf16 %v818_v56, %v817_v55  ;;  %v928_v35 = vpack.c.bf16 %v820_v17, %v819_v15  ;;  %v576_v48 = vmul.f32 %v3037_v36, %v262_v26  ;;  %v586_v49 = vmul.f32 %v3037_v36, %v272_v27  ;;  %v121_v56 = vld [vmem:[%s5256_s2 + $0x320] sm:$0xff]  ;;  %v151_v23 = vld [vmem:[%s5256_s2 + $0x410] sm:$0xff] }
  0x31   :  { %v299_v50 = vsub.s32 3, %v2993_v16  ;;  %v705_v55 = vpack.c.bf16 %v565_v42, %v555_v41  ;;  %v435_v3 = vmul.f32 %v3107_v8, %v121_v56  ;;  %v839_v41 = vld [vmem:[%s5255_s0 + $0x390] sm:$0xff]  ;;  %v840_v42 = vld [vmem:[%s5255_s0 + $0x398] sm:$0xff] }
  0x32   :  { %2584 = vmatpush3.bf16.msra.mxu1 %v900_v9  ;;  %2678 = vmatpush3.bf16.msra.mxu0 %v916_v11  ;;  %v802_v9 = vld [vmem:[%s5255_s0 + $0x268] sm:$0xff]  ;;  %v787_v11 = vld [vmem:[%s5255_s0 + $0x1f0] sm:$0xff]  ;;  %v716_v59 = vpack.c.bf16 %v586_v49, %v576_v48  ;;  %v25_v48 = vld [vmem:[%s5256_s2 + $0x20] sm:$0xff]  ;;  %v938_v56 = vpack.c.bf16 %v840_v42, %v839_v41 }
  0x33   :  { %2585 = vmatprep.subr.bf16.mxu1 %v909_v18  ;;  %2679 = vmatprep.subr.bf16.mxu0 %v925_v19  ;;  %v3437_v18 = vrot.slane %v3031_v34, %v315_v57  ;;  %v636_v19 = vpack.c.bf16 %v426_v58, %v416_v53  ;;  %v912_v32 = vpack.c.bf16 %v788_v14, %v787_v11  ;;  %v131_v57 = vld [vmem:[%s5256_s2 + $0x370] sm:$0xff]  ;;  %v311_v14 = vsub.s32 6, %v2993_v16  ;;  %v33_v16 = vld [vmem:[%s5256_s2 + $0x60] sm:$0xff] }
  0x34   :  { %1048 = vmatmul.mubr.bf16.gmra.mrb[8].mxu0 %v615_v24  ;;  %1104 = vmatmul.mubr.bf16.gmra.mrb[8].mxu1 %v685_v25  ;;  %v132_v24 = vld [vmem:[%s5256_s2 + $0x378] sm:$0xff]  ;;  %v415_v25 = vmul.f32 %v3107_v8, %v101_v61  ;;  %v271_v61 = vld [vmem:[%s5256_s2 + $0x7d0] sm:$0xff] }
  0x35   :  { %1055 = vmatprep.mubr.bf16.mxu0 %v626_v29  ;;  %1111 = vmatprep.mubr.bf16.mxu1 %v696_v30  ;;  %v919_v29 = vpack.c.bf16 %v802_v9, %v801_v7  ;;  %v771_v30 = vld [vmem:[%s5255_s0 + $0x170] sm:$0xff]  ;;  %v585_v7 = vmul.f32 %v3107_v8, %v271_v61  ;;  %v456_v9 = vmul.f32 %v3037_v36, %v142_v62  ;;  %v841_v61 = vld [vmem:[%s5255_s0 + $0x3a0] sm:$0xff]  ;;  %v842_v62 = vld [vmem:[%s5255_s0 + $0x3a8] sm:$0xff] }
  0x36   :  { %2586 = vmatpush3.bf16.msra.mxu1 %v901_v39  ;;  %2680 = vmatpush3.bf16.msra.mxu0 %v917_v40  ;;  %v803_v39 = vld [vmem:[%s5255_s0 + $0x270] sm:$0xff]  ;;  %v804_v40 = vld [vmem:[%s5255_s0 + $0x278] sm:$0xff]  ;;  %v904_v51 = vpack.c.bf16 %v772_v33, %v771_v30  ;;  %v635_v54 = vpack.c.bf16 %v425_v31, %v415_v25  ;;  %v54_v25 = vld [vmem:[%s5256_s2 + $0x108] sm:$0xff]  ;;  %v3537_v26 = vrot.slane %v3031_v34, %v311_v14 }
  0x37   :  { %2587 = vmatprep.subr.bf16.mxu1 %v910_v46  ;;  %2681 = vmatprep.subr.bf16.mxu0 %v926_v47  ;;  %v838_v46 = vld [vmem:[%s5255_s0 + $0x388] sm:$0xff]  ;;  %v446_v47 = vmul.f32 %v3037_v36, %v132_v24  ;;  %v920_v52 = vpack.c.bf16 %v804_v40, %v803_v39  ;;  %v44_v24 = vld [vmem:[%s5256_s2 + $0xb8] sm:$0xff]  ;;  %v465_v30 = vmul.f32 %v3107_v8, %v151_v23  ;;  %v73_v14 = vld [vmem:[%s5256_s2 + $0x1a0] sm:$0xff] }
  0x38   :  { %v937_v53 = vpack.c.bf16 %v838_v46, %v837_v45  ;;  %v822_v39 = vld [vmem:[%s5255_s0 + $0x308] sm:$0xff]  ;;  %v43_v46 = vld [vmem:[%s5256_s2 + $0xb0] sm:$0xff] }
  0x39   :  { %v646_v58 = vpack.c.bf16 %v446_v47, %v436_v43  ;;  %v53_v47 = vld [vmem:[%s5256_s2 + $0x100] sm:$0xff] }
  0x3a   :  { %2588 = vmatpush3.bf16.msra.mxu1 %v902_v63  ;;  %2682 = vmatpush3.bf16.msra.mxu0 %v918_v0  ;;  %v3497_v63 = vrot.slane %v3031_v34, %v299_v50  ;;  %v152_v0 = vld [vmem:[%s5256_s2 + $0x418] sm:$0xff] }
  0x3b   :  { %2589 = vmatprep.subr.bf16.mxu1 %v911_v5  ;;  %2683 = vmatprep.subr.bf16.mxu0 %v927_v6  ;;  %v445_v5 = vmul.f32 %v3107_v8, %v131_v57  ;;  %v575_v6 = vmul.f32 %v3107_v8, %v261_v60  ;;  %v466_v11 = vmul.f32 %v3037_v36, %v152_v0  ;;  %v23_v36 = vld [vmem:[%s5256_s2 + $0x10] sm:$0xff]  ;;  %v56_v60 = vld [vmem:[%s5256_s2 + $0x118] sm:$0xff] }
  0x3c   :  { %1056 = vmatmul.mubr.bf16.gmra.mrb[12].mxu0 %v625_v12  ;;  %1112 = vmatmul.mubr.bf16.gmra.mrb[12].mxu1 %v695_v13  ;;  %v338_v12 = vmul.f32 %v3497_v63, %v24_v1  ;;  %v348_v13 = vmul.f32 %v3497_v63, %v34_v2  ;;  %v337_v31 = vmul.f32 %v3056_v44, %v23_v36  ;;  %v823_v57 = vld [vmem:[%s5255_s0 + $0x310] sm:$0xff]  ;;  %v856_v36 = vld [vmem:[%s5255_s0 + $0x418] sm:$0xff] }
  0x3d   :  { %1063 = vmatprep.mubr.bf16.mxu0 %v636_v19  ;;  %1119 = vmatprep.mubr.bf16.mxu1 %v706_v21  ;;  %v645_v15 = vpack.c.bf16 %v445_v5, %v435_v3  ;;  %v715_v17 = vpack.c.bf16 %v585_v7, %v575_v6  ;;  %v141_v19 = vld [vmem:[%s5256_s2 + $0x3c0] sm:$0xff]  ;;  %v656_v21 = vpack.c.bf16 %v466_v11, %v456_v9  ;;  %v854_v9 = vld [vmem:[%s5255_s0 + $0x408] sm:$0xff] }
  0x3e   :  { %2590 = vmatpush3.bf16.msra.mxu1 %v903_v28  ;;  %2684 = vmatpush3.bf16.msra.mxu0 %v919_v29  ;;  %v598_v22 = vpack.c.bf16 %v348_v13, %v338_v12  ;;  %v455_v27 = vmul.f32 %v3107_v8, %v141_v19  ;;  %v26_v28 = vld [vmem:[%s5256_s2 + $0x28] sm:$0xff]  ;;  %v36_v29 = vld [vmem:[%s5256_s2 + $0x78] sm:$0xff]  ;;  %v358_v34 = vmul.f32 %v3497_v63, %v44_v24  ;;  %v853_v3 = vld [vmem:[%s5255_s0 + $0x400] sm:$0xff] }
  0x3f   :  { %2591 = vmatprep.subr.bf16.mxu1 %v912_v32  ;;  %2685 = vmatprep.subr.bf16.mxu0 %v928_v35  ;;  %v347_v32 = vmul.f32 %v3056_v44, %v33_v16  ;;  %v368_v33 = vmul.f32 %v3497_v63, %v54_v25  ;;  %v821_v35 = vld [vmem:[%s5255_s0 + $0x300] sm:$0xff]  ;;  %v340_v8 = vmul.f32 %v3113_v10, %v26_v28  ;;  %v63_v13 = vld [vmem:[%s5256_s2 + $0x150] sm:$0xff]  ;;  %v826_v24 = vld [vmem:[%s5255_s0 + $0x328] sm:$0xff] }
  0x40   :  { %v350_v40 = vmul.f32 %v3113_v10, %v36_v29  ;;  %v655_v43 = vpack.c.bf16 %v465_v30, %v455_v27  ;;  %v929_v49 = vpack.c.bf16 %v822_v39, %v821_v35  ;;  %v367_v0 = vmul.f32 %v3056_v44, %v53_v47  ;;  %v55_v19 = vld [vmem:[%s5256_s2 + $0x110] sm:$0xff]  ;;  %v825_v16 = vld [vmem:[%s5255_s0 + $0x320] sm:$0xff]  ;;  %v84_v28 = vld [vmem:[%s5256_s2 + $0x1f8] sm:$0xff] }
  0x41   :  { %v597_v45 = vpack.c.bf16 %v347_v32, %v337_v31  ;;  %v608_v50 = vpack.c.bf16 %v368_v33, %v358_v34  ;;  %v339_v1 = vmul.f32 %v3134_v20, %v25_v48  ;;  %v370_v12 = vmul.f32 %v3113_v10, %v56_v60  ;;  %v843_v29 = vld [vmem:[%s5255_s0 + $0x3b0] sm:$0xff]  ;;  %v844_v30 = vld [vmem:[%s5255_s0 + $0x3b8] sm:$0xff]  ;;  %v94_v34 = vld [vmem:[%s5256_s2 + $0x248] sm:$0xff] }
  0x42   :  { %2592 = vmatpush3.bf16.msra.mxu1 %v904_v51  ;;  %2686 = vmatpush3.bf16.msra.mxu0 %v920_v52  ;;  %v35_v51 = vld [vmem:[%s5256_s2 + $0x70] sm:$0xff]  ;;  %v64_v52 = vld [vmem:[%s5256_s2 + $0x158] sm:$0xff]  ;;  %v945_v25 = vpack.c.bf16 %v854_v9, %v853_v3  ;;  %v377_v32 = vmul.f32 %v3056_v44, %v63_v13  ;;  %v66_v33 = vld [vmem:[%s5256_s2 + $0x168] sm:$0xff]  ;;  %v387_v39 = vmul.f32 %v3056_v44, %v73_v14 }
  0x43   :  { %2765 = vmatprep.subr.bf16.mxu1 %v937_v53  ;;  %1547 = vmatprep.subr.bf16.mxu0 %v2930_v4  ;;  %v74_v53 = vld [vmem:[%s5256_s2 + $0x1a8] sm:$0xff]  ;;  %v349_v2 = vmul.f32 %v3134_v20, %v35_v51  ;;  %v378_v5 = vmul.f32 %v3497_v63, %v64_v52  ;;  %v76_v35 = vld [vmem:[%s5256_s2 + $0x1b8] sm:$0xff]  ;;  %v931_v41 = vpack.c.bf16 %v826_v24, %v825_v16  ;;  %v83_v51 = vld [vmem:[%s5256_s2 + $0x1f0] sm:$0xff] }
  0x44   :  { %1064 = vmatmul.mubr.bf16.gmra.mrb[16].mxu0 %v635_v54  ;;  %1120 = vmatmul.mubr.bf16.gmra.mrb[16].mxu1 %v705_v55  ;;  %v600_v54 = vpack.c.bf16 %v350_v40, %v340_v8  ;;  %v46_v55 = vld [vmem:[%s5256_s2 + $0xc8] sm:$0xff]  ;;  %v388_v6 = vmul.f32 %v3497_v63, %v74_v53  ;;  %v369_v40 = vmul.f32 %v3134_v20, %v55_v19  ;;  %v828_v47 = vld [vmem:[%s5255_s0 + $0x338] sm:$0xff]  ;;  %v93_v52 = vld [vmem:[%s5256_s2 + $0x240] sm:$0xff] }
  0x45   :  { %1071 = vmatprep.mubr.bf16.mxu0 %v646_v58  ;;  %1127 = vmatprep.mubr.bf16.mxu1 %v716_v59  ;;  %v824_v58 = vld [vmem:[%s5255_s0 + $0x318] sm:$0xff]  ;;  %v357_v59 = vmul.f32 %v3056_v44, %v43_v46  ;;  %v360_v11 = vmul.f32 %v3113_v10, %v46_v55  ;;  %v599_v23 = vpack.c.bf16 %v349_v2, %v339_v1  ;;  %v827_v46 = vld [vmem:[%s5255_s0 + $0x330] sm:$0xff]  ;;  %v65_v53 = vld [vmem:[%s5256_s2 + $0x160] sm:$0xff] }
  0x46   :  { %v930_v7 = vpack.c.bf16 %v824_v58, %v823_v57  ;;  %v618_v27 = vpack.c.bf16 %v388_v6, %v378_v5  ;;  %v408_v48 = vmul.f32 %v3497_v63, %v94_v34  ;;  %v858_v55 = vld [vmem:[%s5255_s0 + $0x428] sm:$0xff]  ;;  %v845_v57 = vld [vmem:[%s5255_s0 + $0x3c0] sm:$0xff]  ;;  %v104_v3 = vld [vmem:[%s5256_s2 + $0x298] sm:$0xff]  ;;  %v397_v14 = vmul.f32 %v3056_v44, %v83_v51 }
  0x47   :  { %v610_v31 = vpack.c.bf16 %v370_v12, %v360_v11  ;;  %v846_v58 = vld [vmem:[%s5255_s0 + $0x3c8] sm:$0xff]  ;;  %v847_v5 = vld [vmem:[%s5255_s0 + $0x3d0] sm:$0xff]  ;;  %v848_v6 = vld [vmem:[%s5255_s0 + $0x3d8] sm:$0xff] }
  0x48   :  { %v114_v9 = vld [vmem:[%s5256_s2 + $0x2e8] sm:$0xff]  ;;  %v96_v12 = vld [vmem:[%s5256_s2 + $0x258] sm:$0xff]  ;;  %v941_v13 = vpack.c.bf16 %v846_v58, %v845_v57  ;;  %v859_v19 = vld [vmem:[%s5255_s0 + $0x430] sm:$0xff]  ;;  %v942_v16 = vpack.c.bf16 %v848_v6, %v847_v5 }
  0x49   :  { %v86_v11 = vld [vmem:[%s5256_s2 + $0x208] sm:$0xff]  ;;  %v831_v24 = vld [vmem:[%s5255_s0 + $0x350] sm:$0xff]  ;;  %v852_v51 = vld [vmem:[%s5255_s0 + $0x3f8] sm:$0xff] }
  0x4a   :  { %v836_v5 = vld [vmem:[%s5255_s0 + $0x378] sm:$0xff] }
  0x4c   :  { %1072 = vmatmul.mubr.bf16.gmra.mrb[20].mxu0 %v645_v15  ;;  %1128 = vmatmul.mubr.bf16.gmra.mrb[20].mxu1 %v715_v17  ;;  %v939_v15 = vpack.c.bf16 %v842_v62, %v841_v61  ;;  %v45_v17 = vld [vmem:[%s5256_s2 + $0xc0] sm:$0xff]  ;;  %v75_v61 = vld [vmem:[%s5256_s2 + $0x1b0] sm:$0xff] }
  0x4d   :  { %1079 = vmatprep.mubr.bf16.mxu0 %v656_v21  ;;  %1168 = vmatprep.mubr.bf16.mxu1 %v598_v22  ;;  %v855_v21 = vld [vmem:[%s5255_s0 + $0x410] sm:$0xff]  ;;  %v607_v22 = vpack.c.bf16 %v367_v0, %v357_v59  ;;  %v359_v8 = vmul.f32 %v3134_v20, %v45_v17  ;;  %v617_v59 = vpack.c.bf16 %v387_v39, %v377_v32  ;;  %v829_v62 = vld [vmem:[%s5255_s0 + $0x340] sm:$0xff]  ;;  %v830_v0 = vld [vmem:[%s5255_s0 + $0x348] sm:$0xff] }
  0x4e   :  { %v946_v42 = vpack.c.bf16 %v856_v36, %v855_v21  ;;  %v379_v17 = vmul.f32 %v3134_v20, %v65_v53  ;;  %v860_v21 = vld [vmem:[%s5255_s0 + $0x438] sm:$0xff]  ;;  %v418_v36 = vmul.f32 %v3497_v63, %v104_v3  ;;  %v85_v32 = vld [vmem:[%s5256_s2 + $0x200] sm:$0xff]  ;;  %v134_v53 = vld [vmem:[%s5256_s2 + $0x388] sm:$0xff] }
  0x4f   :  { %v609_v60 = vpack.c.bf16 %v369_v40, %v359_v8  ;;  %v948_v34 = vpack.c.bf16 %v860_v21, %v859_v19  ;;  %v849_v8 = vld [vmem:[%s5255_s0 + $0x3e0] sm:$0xff]  ;;  %v850_v40 = vld [vmem:[%s5255_s0 + $0x3e8] sm:$0xff]  ;;  %v835_v3 = vld [vmem:[%s5255_s0 + $0x370] sm:$0xff]  ;;  %v448_v6 = vmul.f32 %v3497_v63, %v134_v53 }
  0x50   :  { %v943_v57 = vpack.c.bf16 %v850_v40, %v849_v8  ;;  %v123_v19 = vld [vmem:[%s5256_s2 + $0x330] sm:$0xff]  ;;  %v133_v21 = vld [vmem:[%s5256_s2 + $0x380] sm:$0xff] }
  0x51   :  { %v135_v53 = vld [vmem:[%s5256_s2 + $0x390] sm:$0xff] }
  0x54   :  { %1080 = vmatmul.mubr.bf16.gmra.mrb[24].mxu0 %v655_v43  ;;  %1169 = vmatmul.mubr.bf16.vlgmr.msra.gmra.mrb[24].mxu1 %v597_v45  ;;  %v398_v43 = vmul.f32 %v3497_v63, %v84_v28  ;;  %v940_v45 = vpack.c.bf16 %v844_v30, %v843_v29  ;;  %v400_v28 = vmul.f32 %v3113_v10, %v86_v11  ;;  %v103_v30 = vld [vmem:[%s5256_s2 + $0x290] sm:$0xff] }
  0x55   :  { %2766 = vmatpush3.bf16.msra.mxu1 %v929_v49  ;;  %1176 = vmatprep.mubr.bf16.mxu1 %v608_v50  ;;  %v380_v49 = vmul.f32 %v3113_v10, %v66_v33  ;;  %v390_v50 = vmul.f32 %v3113_v10, %v76_v35  ;;  %v410_v29 = vmul.f32 %v3113_v10, %v96_v12  ;;  %v861_v33 = vld [vmem:[%s5255_s0 + $0x440] sm:$0xff]  ;;  %v862_v35 = vld [vmem:[%s5255_s0 + $0x448] sm:$0xff] }
  0x56   :  { %1305 = vmatprep.mubr.bf16.mxu0 %v600_v54  ;;  %2767 = vmatprep.subr.bf16.mxu1 %v938_v56  ;;  %v857_v54 = vld [vmem:[%s5255_s0 + $0x420] sm:$0xff]  ;;  %v932_v56 = vpack.c.bf16 %v828_v47, %v827_v46  ;;  %v628_v1 = vpack.c.bf16 %v408_v48, %v398_v43  ;;  %v95_v43 = vld [vmem:[%s5256_s2 + $0x250] sm:$0xff]  ;;  %v834_v46 = vld [vmem:[%s5255_s0 + $0x368] sm:$0xff] }
  0x57   :  { %v620_v2 = vpack.c.bf16 %v390_v50, %v380_v49  ;;  %v630_v48 = vpack.c.bf16 %v410_v29, %v400_v28  ;;  %v124_v49 = vld [vmem:[%s5256_s2 + $0x338] sm:$0xff]  ;;  %v851_v50 = vld [vmem:[%s5255_s0 + $0x3f0] sm:$0xff]  ;;  %v865_v12 = vld [vmem:[%s5255_s0 + $0x460] sm:$0xff] }
  0x58   :  { %v136_v28 = vld [vmem:[%s5256_s2 + $0x398] sm:$0xff] }
  0x59   :  { %2768 = vmatpush3.bf16.msra.mxu1 %v930_v7  ;;  %v947_v7 = vpack.c.bf16 %v858_v55, %v857_v54  ;;  %v106_v54 = vld [vmem:[%s5256_s2 + $0x2a8] sm:$0xff]  ;;  %v116_v55 = vld [vmem:[%s5256_s2 + $0x2f8] sm:$0xff] }
  0x5a   :  { %2769 = vmatprep.subr.bf16.mxu1 %v939_v15  ;;  %v407_v15 = vmul.f32 %v3056_v44, %v93_v52  ;;  %v417_v52 = vmul.f32 %v3056_v44, %v103_v30  ;;  %v437_v30 = vmul.f32 %v3056_v44, %v123_v19 }
  0x5c   :  { %1177 = vmatmul.mubr.bf16.gmra.mrb[28].mxu1 %v607_v22  ;;  %1306 = vmatmul.mubr.bf16.vlgmr.msra.gmra.mrb[28].mxu0 %v599_v23  ;;  %v933_v22 = vpack.c.bf16 %v830_v0, %v829_v62  ;;  %v389_v23 = vmul.f32 %v3134_v20, %v75_v61  ;;  %v864_v61 = vld [vmem:[%s5255_s0 + $0x458] sm:$0xff]  ;;  %v409_v0 = vmul.f32 %v3134_v20, %v95_v43  ;;  %v869_v43 = vld [vmem:[%s5255_s0 + $0x480] sm:$0xff] }
  0x5d   :  { %1548 = vmatpush1.bf16.msra.mxu0 %v945_v25  ;;  %1184 = vmatprep.mubr.bf16.mxu1 %v618_v27  ;;  %v832_v25 = vld [vmem:[%s5255_s0 + $0x358] sm:$0xff]  ;;  %v428_v27 = vmul.f32 %v3497_v63, %v114_v9  ;;  %v430_v9 = vmul.f32 %v3113_v10, %v116_v55  ;;  %v174_v55 = vld [vmem:[%s5256_s2 + $0x4c8] sm:$0xff] }
  0x5e   :  { %1313 = vmatprep.mubr.bf16.mxu0 %v610_v31  ;;  %1549 = vmatprep.subr.bf16.mxu0 %v2930_v4  ;;  %v113_v31 = vld [vmem:[%s5256_s2 + $0x2e0] sm:$0xff]  ;;  %v934_v39 = vpack.c.bf16 %v832_v25, %v831_v24  ;;  %v144_v24 = vld [vmem:[%s5256_s2 + $0x3d8] sm:$0xff]  ;;  %v154_v25 = vld [vmem:[%s5256_s2 + $0x428] sm:$0xff] }
  0x5f   :  { %2770 = vmatpush3.bf16.msra.mxu1 %v931_v41  ;;  %v627_v41 = vpack.c.bf16 %v407_v15, %v397_v14  ;;  %v638_v47 = vpack.c.bf16 %v428_v27, %v418_v36  ;;  %v427_v58 = vmul.f32 %v3056_v44, %v113_v31  ;;  %v936_v14 = vpack.c.bf16 %v836_v5, %v835_v3  ;;  %v105_v36 = vld [vmem:[%s5256_s2 + $0x2a0] sm:$0xff]  ;;  %v126_v27 = vld [vmem:[%s5256_s2 + $0x348] sm:$0xff] }
  0x60   :  { %2771 = vmatprep.subr.bf16.mxu1 %v940_v45  ;;  %v833_v45 = vld [vmem:[%s5255_s0 + $0x360] sm:$0xff]  ;;  %v447_v31 = vmul.f32 %v3056_v44, %v133_v21  ;;  %v468_v8 = vmul.f32 %v3497_v63, %v154_v25  ;;  %v440_v40 = vmul.f32 %v3113_v10, %v126_v27  ;;  %v488_v3 = vmul.f32 %v3497_v63, %v174_v55 }
  0x61   :  { %1550 = vmatpush1.bf16.msra.mxu0 %v946_v42  ;;  %v619_v42 = vpack.c.bf16 %v389_v23, %v379_v17  ;;  %v935_v62 = vpack.c.bf16 %v834_v46, %v833_v45  ;;  %v637_v15 = vpack.c.bf16 %v427_v58, %v417_v52  ;;  %v870_v45 = vld [vmem:[%s5255_s0 + $0x488] sm:$0xff]  ;;  %v125_v52 = vld [vmem:[%s5256_s2 + $0x340] sm:$0xff] }
  0x62   :  { %1551 = vmatprep.subr.bf16.mxu0 %v2930_v4  ;;  %v647_v46 = vpack.c.bf16 %v447_v31, %v437_v30  ;;  %v953_v58 = vpack.c.bf16 %v870_v45, %v869_v43  ;;  %v145_v21 = vld [vmem:[%s5256_s2 + $0x3e0] sm:$0xff]  ;;  %v876_v30 = vld [vmem:[%s5255_s0 + $0x4b8] sm:$0xff]  ;;  %v183_v45 = vld [vmem:[%s5256_s2 + $0x510] sm:$0xff] }
  0x63   :  { %2772 = vmatpush3.bf16.msra.mxu1 %v932_v56  ;;  %v949_v56 = vpack.c.bf16 %v862_v35, %v861_v33  ;;  %v419_v33 = vmul.f32 %v3134_v20, %v105_v36  ;;  %v194_v36 = vld [vmem:[%s5256_s2 + $0x568] sm:$0xff]  ;;  %v459_v31 = vmul.f32 %v3134_v20, %v145_v21 }
  0x64   :  { %1185 = vmatmul.mubr.bf16.gmra.mrb[32].mxu1 %v617_v59  ;;  %1314 = vmatmul.mubr.bf16.gmra.mrb[32].mxu0 %v609_v60  ;;  %v399_v59 = vmul.f32 %v3134_v20, %v85_v32  ;;  %v863_v60 = vld [vmem:[%s5255_s0 + $0x450] sm:$0xff] }
  0x65   :  { %1192 = vmatprep.mubr.bf16.mxu1 %v628_v1  ;;  %1321 = vmatprep.mubr.bf16.mxu0 %v620_v2  ;;  %v438_v1 = vmul.f32 %v3497_v63, %v124_v49  ;;  %v944_v2 = vpack.c.bf16 %v852_v51, %v851_v50  ;;  %v950_v11 = vpack.c.bf16 %v864_v61, %v863_v60  ;;  %v867_v32 = vld [vmem:[%s5255_s0 + $0x470] sm:$0xff]  ;;  %v153_v49 = vld [vmem:[%s5256_s2 + $0x420] sm:$0xff] }
  0x66   :  { %1552 = vmatpush1.bf16.msra.mxu0 %v947_v7  ;;  %2773 = vmatprep.subr.bf16.mxu1 %v941_v13  ;;  %v420_v7 = vmul.f32 %v3113_v10, %v106_v54  ;;  %v866_v13 = vld [vmem:[%s5255_s0 + $0x468] sm:$0xff]  ;;  %v629_v17 = vpack.c.bf16 %v409_v0, %v399_v59  ;;  %v164_v54 = vld [vmem:[%s5256_s2 + $0x478] sm:$0xff]  ;;  %v467_v60 = vmul.f32 %v3056_v44, %v153_v49  ;;  %v871_v61 = vld [vmem:[%s5255_s0 + $0x490] sm:$0xff] }
  0x67   :  { %1553 = vmatprep.subr.bf16.mxu0 %v2930_v4  ;;  %2774 = vmatpush3.bf16.msra.mxu1 %v933_v22  ;;  %v648_v22 = vpack.c.bf16 %v448_v6, %v438_v1  ;;  %v951_v29 = vpack.c.bf16 %v866_v13, %v865_v12  ;;  %v439_v0 = vmul.f32 %v3134_v20, %v125_v52  ;;  %v165_v49 = vld [vmem:[%s5256_s2 + $0x480] sm:$0xff]  ;;  %v214_v52 = vld [vmem:[%s5256_s2 + $0x608] sm:$0xff] }
  0x68   :  { %2775 = vmatprep.subr.bf16.mxu1 %v942_v16  ;;  %v640_v23 = vpack.c.bf16 %v430_v9, %v420_v7  ;;  %v115_v16 = vld [vmem:[%s5256_s2 + $0x2f0] sm:$0xff]  ;;  %v449_v1 = vmul.f32 %v3134_v20, %v135_v53  ;;  %v873_v9 = vld [vmem:[%s5255_s0 + $0x4a0] sm:$0xff]  ;;  %v186_v53 = vld [vmem:[%s5256_s2 + $0x528] sm:$0xff] }
  0x69   :  { %v429_v35 = vmul.f32 %v3134_v20, %v115_v16  ;;  %v166_v16 = vld [vmem:[%s5256_s2 + $0x488] sm:$0xff] }
  0x6a   :  { %1554 = vmatpush1.bf16.msra.mxu0 %v948_v34  ;;  %v868_v34 = vld [vmem:[%s5255_s0 + $0x478] sm:$0xff]  ;;  %v649_v13 = vpack.c.bf16 %v449_v1, %v439_v0  ;;  %v528_v0 = vmul.f32 %v3497_v63, %v214_v52  ;;  %v500_v1 = vmul.f32 %v3113_v10, %v186_v53  ;;  %v243_v53 = vld [vmem:[%s5256_s2 + $0x6f0] sm:$0xff] }
  0x6b   :  { %1555 = vmatprep.subr.bf16.mxu0 %v2930_v4  ;;  %2776 = vmatpush3.bf16.msra.mxu1 %v934_v39  ;;  %v458_v39 = vmul.f32 %v3497_v63, %v144_v24  ;;  %v176_v24 = vld [vmem:[%s5256_s2 + $0x4d8] sm:$0xff] }
  0x6c   :  { %1193 = vmatmul.mubr.bf16.gmra.mrb[36].mxu1 %v627_v41  ;;  %1322 = vmatmul.mubr.bf16.gmra.mrb[36].mxu0 %v619_v42  ;;  %v450_v41 = vmul.f32 %v3113_v10, %v136_v28  ;;  %v952_v42 = vpack.c.bf16 %v868_v34, %v867_v32 }
  0x6d   :  { %1200 = vmatprep.mubr.bf16.mxu1 %v638_v47  ;;  %1329 = vmatprep.mubr.bf16.mxu0 %v630_v48  ;;  %v639_v47 = vpack.c.bf16 %v429_v35, %v419_v33  ;;  %v143_v48 = vld [vmem:[%s5256_s2 + $0x3d0] sm:$0xff]  ;;  %v658_v50 = vpack.c.bf16 %v468_v8, %v458_v39  ;;  %v508_v33 = vmul.f32 %v3497_v63, %v194_v36 }
  0x6e   :  { %1556 = vmatpush1.bf16.msra.mxu0 %v949_v56  ;;  %2777 = vmatprep.subr.bf16.mxu1 %v943_v57  ;;  %v650_v51 = vpack.c.bf16 %v450_v41, %v440_v40  ;;  %v146_v56 = vld [vmem:[%s5256_s2 + $0x3e8] sm:$0xff]  ;;  %v156_v57 = vld [vmem:[%s5256_s2 + $0x438] sm:$0xff]  ;;  %v457_v59 = vmul.f32 %v3056_v44, %v143_v48  ;;  %v480_v35 = vmul.f32 %v3113_v10, %v166_v16  ;;  %v877_v40 = vld [vmem:[%s5255_s0 + $0x4c0] sm:$0xff] }
  0x6f   :  { %1557 = vmatprep.subr.bf16.mxu0 %v2930_v4  ;;  %2778 = vmatpush3.bf16.msra.mxu1 %v935_v62  ;;  %v872_v62 = vld [vmem:[%s5255_s0 + $0x498] sm:$0xff]  ;;  %v460_v5 = vmul.f32 %v3113_v10, %v146_v56  ;;  %v470_v6 = vmul.f32 %v3113_v10, %v156_v57  ;;  %v490_v39 = vmul.f32 %v3113_v10, %v176_v24  ;;  %v878_v41 = vld [vmem:[%s5255_s0 + $0x4c8] sm:$0xff] }
  0x70   :  { %2779 = vmatprep.subr.bf16.mxu1 %v944_v2  ;;  %v478_v2 = vmul.f32 %v3497_v63, %v164_v54  ;;  %v954_v7 = vpack.c.bf16 %v872_v62, %v871_v61  ;;  %v657_v12 = vpack.c.bf16 %v467_v60, %v457_v59  ;;  %v196_v54 = vld [vmem:[%s5256_s2 + $0x578] sm:$0xff]  ;;  %v957_v55 = vpack.c.bf16 %v878_v41, %v877_v40  ;;  %v226_v40 = vld [vmem:[%s5256_s2 + $0x668] sm:$0xff] }
  0x71   :  { %v660_v19 = vpack.c.bf16 %v470_v6, %v460_v5  ;;  %v670_v48 = vpack.c.bf16 %v490_v39, %v480_v35  ;;  %v497_v56 = vmul.f32 %v3056_v44, %v183_v45  ;;  %v880_v59 = vld [vmem:[%s5255_s0 + $0x4d8] sm:$0xff]  ;;  %v479_v60 = vmul.f32 %v3134_v20, %v165_v49  ;;  %v215_v35 = vld [vmem:[%s5256_s2 + $0x610] sm:$0xff] }
  0x72   :  { %1558 = vmatpush1.bf16.msra.mxu0 %v950_v11  ;;  %v874_v11 = vld [vmem:[%s5255_s0 + $0x4a8] sm:$0xff]  ;;  %v244_v39 = vld [vmem:[%s5256_s2 + $0x6f8] sm:$0xff]  ;;  %v540_v49 = vmul.f32 %v3113_v10, %v226_v40 }
  0x73   :  { %1559 = vmatprep.subr.bf16.mxu0 %v2930_v4  ;;  %2780 = vmatpush3.bf16.msra.mxu1 %v936_v14  ;;  %v163_v14 = vld [vmem:[%s5256_s2 + $0x470] sm:$0xff]  ;;  %v955_v25 = vpack.c.bf16 %v874_v11, %v873_v9  ;;  %v213_v9 = vld [vmem:[%s5256_s2 + $0x600] sm:$0xff]  ;;  %v236_v41 = vld [vmem:[%s5256_s2 + $0x6b8] sm:$0xff] }
  0x74   :  { %1201 = vmatmul.mubr.bf16.gmra.mrb[40].mxu1 %v637_v15  ;;  %1330 = vmatmul.mubr.bf16.gmra.mrb[40].mxu0 %v629_v17  ;;  %v173_v15 = vld [vmem:[%s5256_s2 + $0x4c0] sm:$0xff]  ;;  %v668_v17 = vpack.c.bf16 %v488_v3, %v478_v2  ;;  %v477_v27 = vmul.f32 %v3056_v44, %v163_v14  ;;  %v510_v2 = vmul.f32 %v3113_v10, %v196_v54  ;;  %v224_v14 = vld [vmem:[%s5256_s2 + $0x658] sm:$0xff]  ;;  %v58_v40 = vld [vmem:[%s5256_s2 + $0x128] sm:$0xff] }
  0x75   :  { %1208 = vmatprep.mubr.bf16.mxu1 %v648_v22  ;;  %1337 = vmatprep.mubr.bf16.mxu0 %v640_v23  ;;  %v155_v22 = vld [vmem:[%s5256_s2 + $0x430] sm:$0xff]  ;;  %v184_v23 = vld [vmem:[%s5256_s2 + $0x518] sm:$0xff]  ;;  %v487_v28 = vmul.f32 %v3056_v44, %v173_v15  ;;  %v234_v15 = vld [vmem:[%s5256_s2 + $0x6a8] sm:$0xff]  ;;  %v538_v16 = vmul.f32 %v3497_v63, %v224_v14 }
  0x76   :  { %1560 = vmatpush1.bf16.msra.mxu0 %v951_v29  ;;  %v875_v29 = vld [vmem:[%s5255_s0 + $0x4b0] sm:$0xff]  ;;  %v469_v32 = vmul.f32 %v3134_v20, %v155_v22  ;;  %v498_v34 = vmul.f32 %v3497_v63, %v184_v23  ;;  %v527_v22 = vmul.f32 %v3056_v44, %v213_v9  ;;  %v548_v24 = vmul.f32 %v3497_v63, %v234_v15  ;;  %v253_v54 = vld [vmem:[%s5256_s2 + $0x740] sm:$0xff] }
  0x77   :  { %1561 = vmatprep.subr.bf16.mxu0 %v2930_v4  ;;  %v956_v8 = vpack.c.bf16 %v876_v30, %v875_v29  ;;  %v223_v30 = vld [vmem:[%s5256_s2 + $0x650] sm:$0xff] }
  0x78   :  { %v659_v43 = vpack.c.bf16 %v469_v32, %v459_v31  ;;  %v233_v31 = vld [vmem:[%s5256_s2 + $0x6a0] sm:$0xff]  ;;  %v698_v32 = vpack.c.bf16 %v548_v24, %v538_v16 }
  0x7a   :  { %1562 = vmatpush1.bf16.msra.mxu0 %v952_v42  ;;  %v667_v42 = vpack.c.bf16 %v487_v28, %v477_v27 }
  0x7b   :  { %1563 = vmatprep.subr.bf16.mxu0 %v2930_v4 }
  0x7c   :  { %1209 = vmatmul.mubr.bf16.gmra.mrb[44].mxu1 %v647_v46  ;;  %1338 = vmatmul.mubr.bf16.gmra.mrb[44].mxu0 %v639_v47  ;;  %v193_v46 = vld [vmem:[%s5256_s2 + $0x560] sm:$0xff]  ;;  %v678_v47 = vpack.c.bf16 %v508_v33, %v498_v34 }
  0x7d   :  { %1216 = vmatprep.mubr.bf16.mxu1 %v658_v50  ;;  %1345 = vmatprep.mubr.bf16.mxu0 %v650_v51  ;;  %v175_v50 = vld [vmem:[%s5256_s2 + $0x4d0] sm:$0xff]  ;;  %v204_v51 = vld [vmem:[%s5256_s2 + $0x5b8] sm:$0xff]  ;;  %v507_v57 = vmul.f32 %v3056_v44, %v193_v46  ;;  %v205_v33 = vld [vmem:[%s5256_s2 + $0x5c0] sm:$0xff]  ;;  %v529_v46 = vmul.f32 %v3134_v20, %v215_v35 }
  0x7e   :  { %1564 = vmatpush1.bf16.msra.mxu0 %v953_v58  ;;  %v879_v58 = vld [vmem:[%s5255_s0 + $0x4d0] sm:$0xff]  ;;  %v489_v61 = vmul.f32 %v3134_v20, %v175_v50  ;;  %v518_v62 = vmul.f32 %v3497_v63, %v204_v51  ;;  %v519_v45 = vmul.f32 %v3134_v20, %v205_v33  ;;  %v550_v50 = vmul.f32 %v3113_v10, %v236_v41  ;;  %v30_v41 = vld [vmem:[%s5256_s2 + $0x48] sm:$0xff] }
  0x7f   :  { %1565 = vmatprep.subr.bf16.mxu0 %v2930_v4  ;;  %v958_v3 = vpack.c.bf16 %v880_v59, %v879_v58  ;;  %v677_v5 = vpack.c.bf16 %v507_v57, %v497_v56  ;;  %v225_v57 = vld [vmem:[%s5256_s2 + $0x660] sm:$0xff]  ;;  %v235_v58 = vld [vmem:[%s5256_s2 + $0x6b0] sm:$0xff]  ;;  %v264_v59 = vld [vmem:[%s5256_s2 + $0x798] sm:$0xff] }
  0x80   :  { %v669_v6 = vpack.c.bf16 %v489_v61, %v479_v60  ;;  %v688_v11 = vpack.c.bf16 %v528_v0, %v518_v62  ;;  %v689_v52 = vpack.c.bf16 %v529_v46, %v519_v45  ;;  %v700_v56 = vpack.c.bf16 %v550_v50, %v540_v49  ;;  %v274_v60 = vld [vmem:[%s5256_s2 + $0x7e8] sm:$0xff]  ;;  %v256_v62 = vld [vmem:[%s5256_s2 + $0x758] sm:$0xff] }
  0x81   :  { %v246_v61 = vld [vmem:[%s5256_s2 + $0x708] sm:$0xff]  ;;  %v557_v0 = vmul.f32 %v3056_v44, %v243_v53  ;;  %v570_v9 = vmul.f32 %v3113_v10, %v256_v62  ;;  %v372_v49 = vmul.f32 %v3437_v18, %v58_v40  ;;  %v344_v50 = vmul.f32 %v3041_v38, %v30_v41  ;;  %v60_v62 = vld [vmem:[%s5256_s2 + $0x138] sm:$0xff] }
  0x82   :  { %1566 = vmatpush1.bf16.msra.mxu0 %v954_v7  ;;  %v203_v7 = vld [vmem:[%s5256_s2 + $0x5b0] sm:$0xff]  ;;  %v118_v40 = vld [vmem:[%s5256_s2 + $0x308] sm:$0xff] }
  0x83   :  { %1567 = vmatprep.subr.bf16.mxu0 %v2930_v4  ;;  %v517_v21 = vmul.f32 %v3056_v44, %v203_v7  ;;  %v560_v7 = vmul.f32 %v3113_v10, %v246_v61  ;;  %v50_v61 = vld [vmem:[%s5256_s2 + $0xe8] sm:$0xff] }
  0x84   :  { %1217 = vmatmul.mubr.bf16.gmra.mrb[48].mxu1 %v657_v12  ;;  %1346 = vmatmul.mubr.bf16.gmra.mrb[48].mxu0 %v649_v13  ;;  %v680_v12 = vpack.c.bf16 %v510_v2, %v500_v1  ;;  %v185_v13 = vld [vmem:[%s5256_s2 + $0x520] sm:$0xff]  ;;  %v567_v1 = vmul.f32 %v3056_v44, %v253_v54  ;;  %v539_v2 = vmul.f32 %v3134_v20, %v225_v57  ;;  %v90_v41 = vld [vmem:[%s5256_s2 + $0x228] sm:$0xff] }
  0x85   :  { %1224 = vmatprep.mubr.bf16.mxu1 %v668_v17  ;;  %1353 = vmatprep.mubr.bf16.mxu0 %v660_v19  ;;  %v206_v17 = vld [vmem:[%s5256_s2 + $0x5c8] sm:$0xff]  ;;  %v216_v19 = vld [vmem:[%s5256_s2 + $0x618] sm:$0xff]  ;;  %v499_v23 = vmul.f32 %v3134_v20, %v185_v13  ;;  %v687_v28 = vpack.c.bf16 %v527_v22, %v517_v21  ;;  %v263_v13 = vld [vmem:[%s5256_s2 + $0x790] sm:$0xff]  ;;  %v710_v15 = vpack.c.bf16 %v570_v9, %v560_v7 }
  0x86   :  { %1568 = vmatpush1.bf16.msra.mxu0 %v955_v25  ;;  %v520_v25 = vmul.f32 %v3113_v10, %v206_v17  ;;  %v530_v27 = vmul.f32 %v3113_v10, %v216_v19  ;;  %v255_v17 = vld [vmem:[%s5256_s2 + $0x750] sm:$0xff]  ;;  %v266_v19 = vld [vmem:[%s5256_s2 + $0x7a8] sm:$0xff]  ;;  %v276_v21 = vld [vmem:[%s5256_s2 + $0x7f8] sm:$0xff]  ;;  %v364_v7 = vmul.f32 %v3041_v38, %v50_v61  ;;  %v374_v9 = vmul.f32 %v3041_v38, %v60_v62 }
  0x87   :  { %1569 = vmatprep.subr.bf16.mxu0 %v2930_v4  ;;  %v28_v22 = vld [vmem:[%s5256_s2 + $0x38] sm:$0xff]  ;;  %v57_v54 = vld [vmem:[%s5256_s2 + $0x120] sm:$0xff]  ;;  %v110_v61 = vld [vmem:[%s5256_s2 + $0x2c8] sm:$0xff] }
  0x88   :  { %v690_v34 = vpack.c.bf16 %v530_v27, %v520_v25  ;;  %v569_v25 = vmul.f32 %v3134_v20, %v255_v17  ;;  %v580_v27 = vmul.f32 %v3113_v10, %v266_v19  ;;  %v29_v57 = vld [vmem:[%s5256_s2 + $0x40] sm:$0xff]  ;;  %v59_v17 = vld [vmem:[%s5256_s2 + $0x130] sm:$0xff]  ;;  %v88_v19 = vld [vmem:[%s5256_s2 + $0x218] sm:$0xff] }
  0x89   :  { %v120_v62 = vld [vmem:[%s5256_s2 + $0x318] sm:$0xff] }
  0x8a   :  { %1570 = vmatpush1.bf16.msra.mxu0 %v956_v8  ;;  %v254_v8 = vld [vmem:[%s5256_s2 + $0x748] sm:$0xff] }
  0x8b   :  { %1571 = vmatprep.subr.bf16.mxu0 %v2930_v4 }
  0x8c   :  { %1225 = vmatmul.mubr.bf16.gmra.mrb[52].mxu1 %v667_v42  ;;  %1354 = vmatmul.mubr.bf16.gmra.mrb[52].mxu0 %v659_v43  ;;  %v537_v42 = vmul.f32 %v3056_v44, %v223_v30  ;;  %v547_v43 = vmul.f32 %v3056_v44, %v233_v31 }
  0x8d   :  { %1232 = vmatprep.mubr.bf16.mxu1 %v678_v47  ;;  %1361 = vmatprep.mubr.bf16.mxu0 %v670_v48  ;;  %v558_v47 = vmul.f32 %v3497_v63, %v244_v39  ;;  %v568_v48 = vmul.f32 %v3497_v63, %v254_v8  ;;  %v37_v39 = vld [vmem:[%s5256_s2 + $0x80] sm:$0xff]  ;;  %v48_v8 = vld [vmem:[%s5256_s2 + $0xd8] sm:$0xff] }
  0x8e   :  { %1572 = vmatpush1.bf16.msra.mxu0 %v957_v55  ;;  %v697_v51 = vpack.c.bf16 %v547_v43, %v537_v42  ;;  %v40_v42 = vld [vmem:[%s5256_s2 + $0x98] sm:$0xff] }
  0x8f   :  { %1573 = vmatprep.subr.bf16.mxu0 %v2930_v4  ;;  %v195_v4 = vld [vmem:[%s5256_s2 + $0x570] sm:$0xff]  ;;  %v708_v55 = vpack.c.bf16 %v568_v48, %v558_v47  ;;  %v351_v47 = vmul.f32 %v3537_v26, %v37_v39  ;;  %v362_v48 = vmul.f32 %v3437_v18, %v48_v8  ;;  %v108_v8 = vld [vmem:[%s5256_s2 + $0x2b8] sm:$0xff] }
  0x90   :  { %v509_v36 = vmul.f32 %v3134_v20, %v195_v4  ;;  %v273_v4 = vld [vmem:[%s5256_s2 + $0x7e0] sm:$0xff]  ;;  %v79_v39 = vld [vmem:[%s5256_s2 + $0x1d0] sm:$0xff] }
  0x91   :  { %v587_v16 = vmul.f32 %v3056_v44, %v273_v4  ;;  %v77_v4 = vld [vmem:[%s5256_s2 + $0x1c0] sm:$0xff] }
  0x92   :  { %1574 = vmatpush1.bf16.msra.mxu0 %v958_v3  ;;  %v679_v29 = vpack.c.bf16 %v509_v36, %v499_v23  ;;  %v549_v3 = vmul.f32 %v3134_v20, %v235_v58  ;;  %v38_v23 = vld [vmem:[%s5256_s2 + $0x88] sm:$0xff]  ;;  %v577_v36 = vmul.f32 %v3056_v44, %v263_v13  ;;  %v265_v44 = vld [vmem:[%s5256_s2 + $0x7a0] sm:$0xff]  ;;  %v39_v58 = vld [vmem:[%s5256_s2 + $0x90] sm:$0xff] }
  0x93   :  { %v352_v30 = vmul.f32 %v3437_v18, %v38_v23  ;;  %v579_v43 = vmul.f32 %v3134_v20, %v265_v44  ;;  %v67_v13 = vld [vmem:[%s5256_s2 + $0x170] sm:$0xff]  ;;  %v80_v23 = vld [vmem:[%s5256_s2 + $0x1d8] sm:$0xff] }
  0x94   :  { %1233 = vmatmul.mubr.bf16.gmra.mrb[56].mxu1 %v677_v5  ;;  %1362 = vmatmul.mubr.bf16.gmra.mrb[56].mxu0 %v669_v6  ;;  %v578_v5 = vmul.f32 %v3497_v63, %v264_v59  ;;  %v588_v6 = vmul.f32 %v3497_v63, %v274_v60  ;;  %v245_v63 = vld [vmem:[%s5256_s2 + $0x700] sm:$0xff]  ;;  %v717_v31 = vpack.c.bf16 %v587_v16, %v577_v36  ;;  %v68_v59 = vld [vmem:[%s5256_s2 + $0x178] sm:$0xff]  ;;  %v78_v60 = vld [vmem:[%s5256_s2 + $0x1c8] sm:$0xff] }
  0x95   :  { %1240 = vmatprep.mubr.bf16.mxu1 %v688_v11  ;;  %1369 = vmatprep.mubr.bf16.mxu0 %v680_v12  ;;  %v707_v11 = vpack.c.bf16 %v567_v1, %v557_v0  ;;  %v699_v12 = vpack.c.bf16 %v549_v3, %v539_v2  ;;  %v559_v24 = vmul.f32 %v3134_v20, %v245_v63  ;;  %v49_v63 = vld [vmem:[%s5256_s2 + $0xe0] sm:$0xff]  ;;  %v87_v44 = vld [vmem:[%s5256_s2 + $0x210] sm:$0xff] }
  0x96   :  { %v718_v14 = vpack.c.bf16 %v588_v6, %v578_v5  ;;  %v371_v1 = vmul.f32 %v3537_v26, %v57_v54  ;;  %v343_v2 = vmul.f32 %v3039_v37, %v29_v57  ;;  %v353_v3 = vmul.f32 %v3039_v37, %v39_v58  ;;  %v117_v54 = vld [vmem:[%s5256_s2 + $0x300] sm:$0xff]  ;;  %v99_v58 = vld [vmem:[%s5256_s2 + $0x270] sm:$0xff] }
  0x97   :  { %v382_v5 = vmul.f32 %v3437_v18, %v68_v59  ;;  %v392_v6 = vmul.f32 %v3437_v18, %v78_v60  ;;  %v381_v36 = vmul.f32 %v3537_v26, %v67_v13  ;;  %v391_v16 = vmul.f32 %v3537_v26, %v77_v4  ;;  %v89_v57 = vld [vmem:[%s5256_s2 + $0x220] sm:$0xff]  ;;  %v128_v59 = vld [vmem:[%s5256_s2 + $0x358] sm:$0xff]  ;;  %v138_v60 = vld [vmem:[%s5256_s2 + $0x3a8] sm:$0xff] }
  0x98   :  { %v127_v13 = vld [vmem:[%s5256_s2 + $0x350] sm:$0xff]  ;;  %v137_v4 = vld [vmem:[%s5256_s2 + $0x3a0] sm:$0xff] }
  0x9c   :  { %1241 = vmatmul.mubr.bf16.gmra.mrb[60].mxu1 %v687_v28  ;;  %1370 = vmatmul.mubr.bf16.gmra.mrb[60].mxu0 %v679_v29  ;;  %v590_v28 = vmul.f32 %v3113_v10, %v276_v21  ;;  %v342_v29 = vmul.f32 %v3437_v18, %v28_v22  ;;  %v27_v10 = vld [vmem:[%s5256_s2 + $0x30] sm:$0xff]  ;;  %v98_v21 = vld [vmem:[%s5256_s2 + $0x268] sm:$0xff] }
  0x9d   :  { %1248 = vmatprep.mubr.bf16.mxu1 %v698_v32  ;;  %1377 = vmatprep.mubr.bf16.mxu0 %v690_v34  ;;  %v709_v32 = vpack.c.bf16 %v569_v25, %v559_v24  ;;  %v275_v34 = vld [vmem:[%s5256_s2 + $0x7f0] sm:$0xff]  ;;  %v341_v46 = vmul.f32 %v3537_v26, %v27_v10  ;;  %v70_v22 = vld [vmem:[%s5256_s2 + $0x188] sm:$0xff]  ;;  %v363_v24 = vmul.f32 %v3039_v37, %v49_v63  ;;  %v69_v10 = vld [vmem:[%s5256_s2 + $0x180] sm:$0xff] }
  0x9e   :  { %v720_v33 = vpack.c.bf16 %v590_v28, %v580_v27  ;;  %v602_v35 = vpack.c.bf16 %v352_v30, %v342_v29  ;;  %v589_v45 = vmul.f32 %v3134_v20, %v275_v34  ;;  %v47_v20 = vld [vmem:[%s5256_s2 + $0xd0] sm:$0xff]  ;;  %v373_v25 = vmul.f32 %v3039_v37, %v59_v17  ;;  %v97_v34 = vld [vmem:[%s5256_s2 + $0x260] sm:$0xff] }
  0x9f   :  { %v601_v53 = vpack.c.bf16 %v351_v47, %v341_v46  ;;  %v361_v0 = vmul.f32 %v3537_v26, %v47_v20  ;;  %v402_v27 = vmul.f32 %v3437_v18, %v88_v19  ;;  %v412_v28 = vmul.f32 %v3437_v18, %v98_v21  ;;  %v107_v20 = vld [vmem:[%s5256_s2 + $0x2b0] sm:$0xff]  ;;  %v109_v63 = vld [vmem:[%s5256_s2 + $0x2c0] sm:$0xff]  ;;  %v148_v19 = vld [vmem:[%s5256_s2 + $0x3f8] sm:$0xff] }
  0xa0   :  { %v384_v29 = vmul.f32 %v3041_v38, %v70_v22  ;;  %v394_v30 = vmul.f32 %v3041_v38, %v80_v23  ;;  %v383_v46 = vmul.f32 %v3039_v37, %v69_v10  ;;  %v393_v47 = vmul.f32 %v3039_v37, %v79_v39  ;;  %v119_v17 = vld [vmem:[%s5256_s2 + $0x310] sm:$0xff]  ;;  %v158_v21 = vld [vmem:[%s5256_s2 + $0x448] sm:$0xff]  ;;  %v140_v23 = vld [vmem:[%s5256_s2 + $0x3b8] sm:$0xff] }
  0xa1   :  { %v130_v22 = vld [vmem:[%s5256_s2 + $0x368] sm:$0xff]  ;;  %v129_v10 = vld [vmem:[%s5256_s2 + $0x360] sm:$0xff]  ;;  %v139_v39 = vld [vmem:[%s5256_s2 + $0x3b0] sm:$0xff] }
  0xa4   :  { %1249 = vmatmul.mubr.bf16.gmra.mrb[64].mxu1 %v697_v51  ;;  %1378 = vmatmul.mubr.bf16.gmra.mrb[64].mxu0 %v689_v52  ;;  %v354_v51 = vmul.f32 %v3041_v38, %v40_v42  ;;  %v719_v52 = vpack.c.bf16 %v589_v45, %v579_v43  ;;  %v100_v42 = vld [vmem:[%s5256_s2 + $0x278] sm:$0xff]  ;;  %v401_v43 = vmul.f32 %v3537_v26, %v87_v44  ;;  %v147_v44 = vld [vmem:[%s5256_s2 + $0x3f0] sm:$0xff] }
  0xa5   :  { %1256 = vmatprep.mubr.bf16.mxu1 %v708_v55  ;;  %1385 = vmatprep.mubr.bf16.mxu0 %v700_v56  ;;  %v612_v55 = vpack.c.bf16 %v372_v49, %v362_v48  ;;  %v411_v45 = vmul.f32 %v3537_v26, %v97_v34  ;;  %v422_v48 = vmul.f32 %v3437_v18, %v108_v8  ;;  %v157_v34 = vld [vmem:[%s5256_s2 + $0x440] sm:$0xff]  ;;  %v168_v8 = vld [vmem:[%s5256_s2 + $0x498] sm:$0xff] }
  0xa6   :  { %v604_v56 = vpack.c.bf16 %v354_v51, %v344_v50  ;;  %v432_v49 = vmul.f32 %v3437_v18, %v118_v40  ;;  %v404_v50 = vmul.f32 %v3041_v38, %v90_v41  ;;  %v414_v51 = vmul.f32 %v3041_v38, %v100_v42  ;;  %v178_v40 = vld [vmem:[%s5256_s2 + $0x4e8] sm:$0xff]  ;;  %v160_v42 = vld [vmem:[%s5256_s2 + $0x458] sm:$0xff] }
  0xa7   :  { %v150_v41 = vld [vmem:[%s5256_s2 + $0x408] sm:$0xff] }
  0xac   :  { %1257 = vmatmul.mubr.bf16.gmra.mrb[68].mxu1 %v707_v11  ;;  %1386 = vmatmul.mubr.bf16.gmra.mrb[68].mxu0 %v699_v12  ;;  %v611_v11 = vpack.c.bf16 %v371_v1, %v361_v0  ;;  %v603_v12 = vpack.c.bf16 %v353_v3, %v343_v2  ;;  %v421_v0 = vmul.f32 %v3537_v26, %v107_v20  ;;  %v167_v20 = vld [vmem:[%s5256_s2 + $0x490] sm:$0xff] }
  0xad   :  { %1264 = vmatprep.mubr.bf16.mxu1 %v718_v14  ;;  %1393 = vmatprep.mubr.bf16.mxu0 %v710_v15  ;;  %v622_v14 = vpack.c.bf16 %v392_v6, %v382_v5  ;;  %v614_v15 = vpack.c.bf16 %v374_v9, %v364_v7  ;;  %v431_v1 = vmul.f32 %v3537_v26, %v117_v54  ;;  %v177_v54 = vld [vmem:[%s5256_s2 + $0x4e0] sm:$0xff] }
  0xae   :  { %v403_v2 = vmul.f32 %v3039_v37, %v89_v57  ;;  %v413_v3 = vmul.f32 %v3039_v37, %v99_v58  ;;  %v442_v5 = vmul.f32 %v3437_v18, %v128_v59  ;;  %v452_v6 = vmul.f32 %v3437_v18, %v138_v60  ;;  %v149_v57 = vld [vmem:[%s5256_s2 + $0x400] sm:$0xff]  ;;  %v159_v58 = vld [vmem:[%s5256_s2 + $0x450] sm:$0xff]  ;;  %v188_v59 = vld [vmem:[%s5256_s2 + $0x538] sm:$0xff] }
  0xaf   :  { %v424_v7 = vmul.f32 %v3041_v38, %v110_v61  ;;  %v434_v9 = vmul.f32 %v3041_v38, %v120_v62  ;;  %v198_v60 = vld [vmem:[%s5256_s2 + $0x588] sm:$0xff]  ;;  %v180_v62 = vld [vmem:[%s5256_s2 + $0x4f8] sm:$0xff] }
  0xb0   :  { %v170_v61 = vld [vmem:[%s5256_s2 + $0x4a8] sm:$0xff] }
  0xb4   :  { %1265 = vmatmul.mubr.bf16.gmra.mrb[72].mxu1 %v717_v31  ;;  %1394 = vmatmul.mubr.bf16.gmra.mrb[72].mxu0 %v709_v32  ;;  %v621_v31 = vpack.c.bf16 %v391_v16, %v381_v36  ;;  %v613_v32 = vpack.c.bf16 %v373_v25, %v363_v24  ;;  %v441_v36 = vmul.f32 %v3537_v26, %v127_v13  ;;  %v187_v13 = vld [vmem:[%s5256_s2 + $0x530] sm:$0xff] }
  0xb5   :  { %1401 = vmatprep.mubr.bf16.mxu0 %v720_v33  ;;  %1442 = vmatprep.mubr.bf16.mxu1 %v602_v35  ;;  %v632_v33 = vpack.c.bf16 %v412_v28, %v402_v27  ;;  %v624_v35 = vpack.c.bf16 %v394_v30, %v384_v29  ;;  %v451_v16 = vmul.f32 %v3537_v26, %v137_v4  ;;  %v197_v4 = vld [vmem:[%s5256_s2 + $0x580] sm:$0xff] }
  0xb6   :  { %v423_v24 = vmul.f32 %v3039_v37, %v109_v63  ;;  %v433_v25 = vmul.f32 %v3039_v37, %v119_v17  ;;  %v462_v27 = vmul.f32 %v3437_v18, %v148_v19  ;;  %v472_v28 = vmul.f32 %v3437_v18, %v158_v21  ;;  %v169_v63 = vld [vmem:[%s5256_s2 + $0x4a0] sm:$0xff]  ;;  %v179_v17 = vld [vmem:[%s5256_s2 + $0x4f0] sm:$0xff]  ;;  %v208_v19 = vld [vmem:[%s5256_s2 + $0x5d8] sm:$0xff] }
  0xb7   :  { %v444_v29 = vmul.f32 %v3041_v38, %v130_v22  ;;  %v454_v30 = vmul.f32 %v3041_v38, %v140_v23  ;;  %v218_v21 = vld [vmem:[%s5256_s2 + $0x628] sm:$0xff]  ;;  %v200_v23 = vld [vmem:[%s5256_s2 + $0x598] sm:$0xff] }
  0xb8   :  { %v190_v22 = vld [vmem:[%s5256_s2 + $0x548] sm:$0xff] }
  0xbc   :  { %1402 = vmatmul.mubr.bf16.gmra.mrb[76].mxu0 %v719_v52  ;;  %1443 = vmatmul.mubr.bf16.vlgmr.msra.gmra.mrb[76].mxu1 %v601_v53  ;;  %v631_v52 = vpack.c.bf16 %v411_v45, %v401_v43  ;;  %v623_v53 = vpack.c.bf16 %v393_v47, %v383_v46  ;;  %v461_v43 = vmul.f32 %v3537_v26, %v147_v44 }
  0xbd   :  { %1450 = vmatprep.mubr.bf16.mxu1 %v612_v55  ;;  %2470 = vmatprep.mubr.msk.bf16.mxu0 %vm959_vm0, %v604_v56  ;;  %v642_v55 = vpack.c.bf16 %v432_v49, %v422_v48  ;;  %v634_v56 = vpack.c.bf16 %v414_v51, %v404_v50  ;;  %v471_v45 = vmul.f32 %v3537_v26, %v157_v34 }
  0xbe   :  { %v443_v46 = vmul.f32 %v3039_v37, %v129_v10  ;;  %v453_v47 = vmul.f32 %v3039_v37, %v139_v39  ;;  %v482_v48 = vmul.f32 %v3437_v18, %v168_v8  ;;  %v492_v49 = vmul.f32 %v3437_v18, %v178_v40  ;;  %v207_v10 = vld [vmem:[%s5256_s2 + $0x5d0] sm:$0xff]  ;;  %v217_v39 = vld [vmem:[%s5256_s2 + $0x620] sm:$0xff] }
  0xbf   :  { %v464_v50 = vmul.f32 %v3041_v38, %v150_v41  ;;  %v474_v51 = vmul.f32 %v3041_v38, %v160_v42 }
  0xc4   :  { %1451 = vmatmul.mubr.bf16.gmra.mrb[80].mxu1 %v611_v11  ;;  %1580 = vmatmul.mubr.bf16.vlgmr.msra.gmra.mrb[80].mxu0 %v603_v12  ;;  %v641_v11 = vpack.c.bf16 %v431_v1, %v421_v0  ;;  %v633_v12 = vpack.c.bf16 %v413_v3, %v403_v2  ;;  %v481_v0 = vmul.f32 %v3537_v26, %v167_v20 }
  0xc5   :  { %1458 = vmatprep.mubr.bf16.mxu1 %v622_v14  ;;  %2471 = vmatprep.mubr.msk.bf16.mxu0 %vm959_vm0, %v614_v15  ;;  %v652_v14 = vpack.c.bf16 %v452_v6, %v442_v5  ;;  %v644_v15 = vpack.c.bf16 %v434_v9, %v424_v7  ;;  %v491_v1 = vmul.f32 %v3537_v26, %v177_v54 }
  0xc6   :  { %v463_v2 = vmul.f32 %v3039_v37, %v149_v57  ;;  %v473_v3 = vmul.f32 %v3039_v37, %v159_v58  ;;  %v502_v5 = vmul.f32 %v3437_v18, %v188_v59  ;;  %v512_v6 = vmul.f32 %v3437_v18, %v198_v60 }
  0xc7   :  { %v484_v7 = vmul.f32 %v3041_v38, %v170_v61  ;;  %v494_v9 = vmul.f32 %v3041_v38, %v180_v62 }
  0xcc   :  { %1459 = vmatmul.mubr.bf16.gmra.mrb[84].mxu1 %v621_v31  ;;  %1588 = vmatmul.mubr.bf16.gmra.mrb[84].mxu0 %v613_v32  ;;  %v651_v31 = vpack.c.bf16 %v451_v16, %v441_v36  ;;  %v643_v32 = vpack.c.bf16 %v433_v25, %v423_v24  ;;  %v501_v36 = vmul.f32 %v3537_v26, %v187_v13 }
  0xcd   :  { %1466 = vmatprep.mubr.bf16.mxu1 %v632_v33  ;;  %2472 = vmatprep.mubr.msk.bf16.mxu0 %vm959_vm0, %v624_v35  ;;  %v662_v33 = vpack.c.bf16 %v472_v28, %v462_v27  ;;  %v654_v35 = vpack.c.bf16 %v454_v30, %v444_v29  ;;  %v511_v16 = vmul.f32 %v3537_v26, %v197_v4 }
  0xce   :  { %v483_v24 = vmul.f32 %v3039_v37, %v169_v63  ;;  %v493_v25 = vmul.f32 %v3039_v37, %v179_v17  ;;  %v522_v27 = vmul.f32 %v3437_v18, %v208_v19  ;;  %v532_v28 = vmul.f32 %v3437_v18, %v218_v21  ;;  %v209_v63 = vld [vmem:[%s5256_s2 + $0x5e0] sm:$0xff]  ;;  %v219_v17 = vld [vmem:[%s5256_s2 + $0x630] sm:$0xff]  ;;  %v248_v19 = vld [vmem:[%s5256_s2 + $0x718] sm:$0xff] }
  0xcf   :  { %v504_v29 = vmul.f32 %v3041_v38, %v190_v22  ;;  %v514_v30 = vmul.f32 %v3041_v38, %v200_v23  ;;  %v258_v23 = vld [vmem:[%s5256_s2 + $0x768] sm:$0xff] }
  0xd4   :  { %1467 = vmatmul.mubr.bf16.gmra.mrb[88].mxu1 %v631_v52  ;;  %1596 = vmatmul.mubr.bf16.gmra.mrb[88].mxu0 %v623_v53  ;;  %v661_v52 = vpack.c.bf16 %v471_v45, %v461_v43  ;;  %v653_v53 = vpack.c.bf16 %v453_v47, %v443_v46  ;;  %v692_v43 = vpack.c.bf16 %v532_v28, %v522_v27  ;;  %v189_v46 = vld [vmem:[%s5256_s2 + $0x540] sm:$0xff]  ;;  %v199_v47 = vld [vmem:[%s5256_s2 + $0x590] sm:$0xff] }
  0xd5   :  { %1474 = vmatprep.mubr.bf16.mxu1 %v642_v55  ;;  %2473 = vmatprep.mubr.msk.bf16.mxu0 %vm959_vm0, %v634_v56  ;;  %v672_v55 = vpack.c.bf16 %v492_v49, %v482_v48  ;;  %v664_v56 = vpack.c.bf16 %v474_v51, %v464_v50  ;;  %v684_v45 = vpack.c.bf16 %v514_v30, %v504_v29  ;;  %v228_v48 = vld [vmem:[%s5256_s2 + $0x678] sm:$0xff]  ;;  %v238_v51 = vld [vmem:[%s5256_s2 + $0x6c8] sm:$0xff] }
  0xd6   :  { %v503_v57 = vmul.f32 %v3039_v37, %v189_v46  ;;  %v513_v58 = vmul.f32 %v3039_v37, %v199_v47  ;;  %v542_v59 = vmul.f32 %v3437_v18, %v228_v48  ;;  %v552_v60 = vmul.f32 %v3437_v18, %v238_v51 }
  0xd7   :  { %v523_v29 = vmul.f32 %v3039_v37, %v209_v63  ;;  %v533_v30 = vmul.f32 %v3039_v37, %v219_v17 }
  0xdc   :  { %1475 = vmatmul.mubr.bf16.gmra.mrb[92].mxu1 %v641_v11  ;;  %1604 = vmatmul.mubr.bf16.gmra.mrb[92].mxu0 %v633_v12  ;;  %v671_v11 = vpack.c.bf16 %v491_v1, %v481_v0  ;;  %v663_v12 = vpack.c.bf16 %v473_v3, %v463_v2 }
  0xdd   :  { %1482 = vmatprep.mubr.bf16.mxu1 %v652_v14  ;;  %2474 = vmatprep.mubr.msk.bf16.mxu0 %vm959_vm0, %v644_v15  ;;  %v682_v14 = vpack.c.bf16 %v512_v6, %v502_v5  ;;  %v674_v15 = vpack.c.bf16 %v494_v9, %v484_v7  ;;  %v683_v6 = vpack.c.bf16 %v513_v58, %v503_v57  ;;  %v227_v7 = vld [vmem:[%s5256_s2 + $0x670] sm:$0xff]  ;;  %v237_v9 = vld [vmem:[%s5256_s2 + $0x6c0] sm:$0xff]  ;;  %v278_v58 = vld [vmem:[%s5256_s2 + $0x808] sm:$0xff] }
  0xde   :  { %v541_v27 = vmul.f32 %v3537_v26, %v227_v7  ;;  %v551_v28 = vmul.f32 %v3537_v26, %v237_v9 }
  0xe4   :  { %1483 = vmatmul.mubr.bf16.gmra.mrb[96].mxu1 %v651_v31  ;;  %1612 = vmatmul.mubr.bf16.gmra.mrb[96].mxu0 %v643_v32 }
  0xe5   :  { %1490 = vmatprep.mubr.bf16.mxu1 %v662_v33  ;;  %2475 = vmatprep.mubr.msk.bf16.mxu0 %vm959_vm0, %v654_v35  ;;  %v681_v33 = vpack.c.bf16 %v511_v16, %v501_v36  ;;  %v673_v35 = vpack.c.bf16 %v493_v25, %v483_v24  ;;  %v230_v36 = vld [vmem:[%s5256_s2 + $0x688] sm:$0xff]  ;;  %v240_v16 = vld [vmem:[%s5256_s2 + $0x6d8] sm:$0xff] }
  0xec   :  { %1491 = vmatmul.mubr.bf16.gmra.mrb[100].mxu1 %v661_v52  ;;  %1620 = vmatmul.mubr.bf16.gmra.mrb[100].mxu0 %v653_v53  ;;  %v210_v52 = vld [vmem:[%s5256_s2 + $0x5e8] sm:$0xff]  ;;  %v220_v53 = vld [vmem:[%s5256_s2 + $0x638] sm:$0xff] }
  0xed   :  { %1498 = vmatprep.mubr.bf16.mxu1 %v672_v55  ;;  %2476 = vmatprep.mubr.msk.bf16.mxu0 %vm959_vm0, %v664_v56  ;;  %v521_v55 = vmul.f32 %v3537_v26, %v207_v10  ;;  %v531_v56 = vmul.f32 %v3537_v26, %v217_v39  ;;  %v524_v61 = vmul.f32 %v3041_v38, %v210_v52  ;;  %v229_v52 = vld [vmem:[%s5256_s2 + $0x680] sm:$0xff] }
  0xee   :  { %v534_v62 = vmul.f32 %v3041_v38, %v220_v53  ;;  %v239_v53 = vld [vmem:[%s5256_s2 + $0x6d0] sm:$0xff] }
  0xef   :  { %v691_v5 = vpack.c.bf16 %v531_v56, %v521_v55  ;;  %v268_v55 = vld [vmem:[%s5256_s2 + $0x7b8] sm:$0xff] }
  0xf4   :  { %1499 = vmatmul.mubr.bf16.gmra.mrb[104].mxu1 %v671_v11  ;;  %1628 = vmatmul.mubr.bf16.gmra.mrb[104].mxu0 %v663_v12 }
  0xf5   :  { %1506 = vmatprep.mubr.bf16.mxu1 %v682_v14  ;;  %2477 = vmatprep.mubr.msk.bf16.mxu0 %vm959_vm0, %v674_v15  ;;  %v702_v14 = vpack.c.bf16 %v552_v60, %v542_v59  ;;  %v694_v15 = vpack.c.bf16 %v534_v62, %v524_v61  ;;  %v250_v59 = vld [vmem:[%s5256_s2 + $0x728] sm:$0xff]  ;;  %v260_v60 = vld [vmem:[%s5256_s2 + $0x778] sm:$0xff] }
  0xf6   :  { %v564_v7 = vmul.f32 %v3041_v38, %v250_v59  ;;  %v574_v9 = vmul.f32 %v3041_v38, %v260_v60 }
  0xf7   :  { %v2499_v31 = vpop.f32.mrb[0].mxu0  ;;  %v2541_v32 = vpop.f32.mrb[0].mxu1 }
  0xf8   :  { %v2500_v44 = vpop.f32.mrb[1].mxu0  ;;  %v2542_v34 = vpop.f32.mrb[1].mxu1 }
  0xf9   :  { %v4426_v8 = vadd.f32 %v2500_v44, %v2499_v31  ;;  %v2502_v40 = vpop.f32.mrb[2].mxu0  ;;  %v4428_v41 = vadd.f32 %v2542_v34, %v2541_v32  ;;  %v2544_v42 = vpop.f32.mrb[2].mxu1  ;;  %v562_v31 = vmul.f32 %v3437_v18, %v248_v19  ;;  %v572_v32 = vmul.f32 %v3437_v18, %v258_v23  ;;  %v267_v19 = vld [vmem:[%s5256_s2 + $0x7b0] sm:$0xff] }
  0xfa   :  { %v2503_v49 = vpop.f32.mrb[3].mxu0  ;;  %v2545_v50 = vpop.f32.mrb[3].mxu1  ;;  %v544_v44 = vmul.f32 %v3041_v38, %v230_v36  ;;  %v554_v34 = vmul.f32 %v3041_v38, %v240_v16  ;;  %v714_v16 = vpack.c.bf16 %v574_v9, %v564_v7 }
  0xfb   :  { %v4448_v20 = vadd.f32 %v2503_v49, %v2502_v40  ;;  %v4450_v54 = vadd.f32 %v2545_v50, %v2544_v42  ;;  %v701_v40 = vpack.c.bf16 %v551_v28, %v541_v27  ;;  %v693_v42 = vpack.c.bf16 %v533_v30, %v523_v29  ;;  %v277_v27 = vld [vmem:[%s5256_s2 + $0x800] sm:$0xff]  ;;  %v259_v29 = vld [vmem:[%s5256_s2 + $0x770] sm:$0xff] }
  0xfc   :  { %1507 = vmatmul.mubr.bf16.gmra.mrb[108].mxu1 %v681_v33  ;;  %1636 = vmatmul.mubr.bf16.gmra.mrb[108].mxu0 %v673_v35  ;;  %v712_v50 = vpack.c.bf16 %v572_v32, %v562_v31  ;;  %v704_v51 = vpack.c.bf16 %v554_v34, %v544_v44  ;;  %v249_v28 = vld [vmem:[%s5256_s2 + $0x720] sm:$0xff]  ;;  %v270_v32 = vld [vmem:[%s5256_s2 + $0x7c8] sm:$0xff]  ;;  %v280_v44 = vld [vmem:[%s5256_s2 + $0x818] sm:$0xff] }
  0xfd   :  { %1514 = vmatprep.mubr.bf16.mxu1 %v692_v43  ;;  %2478 = vmatprep.mubr.msk.bf16.mxu0 %vm959_vm0, %v684_v45  ;;  %v247_v43 = vld [vmem:[%s5256_s2 + $0x710] sm:$0xff]  ;;  %v257_v45 = vld [vmem:[%s5256_s2 + $0x760] sm:$0xff] }
  0xff   :  { %v2505_v0 = vpop.f32.mrb[4].mxu0  ;;  %v2547_v1 = vpop.f32.mrb[4].mxu1 }
 0x100   :  { %v2506_v2 = vpop.f32.mrb[5].mxu0  ;;  %v2548_v3 = vpop.f32.mrb[5].mxu1 }
 0x101   :  { %v4467_v11 = vadd.f32 %v2506_v2, %v2505_v0  ;;  %v2508_v12 = vpop.f32.mrb[6].mxu0  ;;  %v4469_v13 = vadd.f32 %v2548_v3, %v2547_v1  ;;  %v2550_v4 = vpop.f32.mrb[6].mxu1  ;;  %v561_v0 = vmul.f32 %v3537_v26, %v247_v43  ;;  %v571_v1 = vmul.f32 %v3537_v26, %v257_v45 }
 0x102   :  { %v2509_v21 = vpop.f32.mrb[7].mxu0  ;;  %v2551_v22 = vpop.f32.mrb[7].mxu1  ;;  %v543_v2 = vmul.f32 %v3039_v37, %v229_v52  ;;  %v553_v3 = vmul.f32 %v3039_v37, %v239_v53  ;;  %v594_v43 = vmul.f32 %v3041_v38, %v280_v44 }
 0x103   :  { %v4489_v24 = vadd.f32 %v2509_v21, %v2508_v12  ;;  %v4491_v25 = vadd.f32 %v2551_v22, %v2550_v4  ;;  %v711_v63 = vpack.c.bf16 %v571_v1, %v561_v0 }
 0x104   :  { %1515 = vmatmul.mubr.bf16.gmra.mrb[112].mxu1 %v691_v5  ;;  %1644 = vmatmul.mubr.bf16.gmra.mrb[112].mxu0 %v683_v6  ;;  %v582_v5 = vmul.f32 %v3437_v18, %v268_v55  ;;  %v592_v6 = vmul.f32 %v3437_v18, %v278_v58  ;;  %v703_v17 = vpack.c.bf16 %v553_v3, %v543_v2  ;;  %v269_v58 = vld [vmem:[%s5256_s2 + $0x7c0] sm:$0xff] }
 0x105   :  { %1522 = vmatprep.mubr.bf16.mxu1 %v702_v14  ;;  %2479 = vmatprep.mubr.msk.bf16.mxu0 %vm959_vm0, %v694_v15  ;;  %v583_v2 = vmul.f32 %v3039_v37, %v269_v58 }
 0x106   :  { %v722_v36 = vpack.c.bf16 %v592_v6, %v582_v5 }
 0x107   :  { %v2511_v33 = vpop.f32.mrb[8].mxu0  ;;  %v2553_v35 = vpop.f32.mrb[8].mxu1 }
 0x108   :  { %v2512_v10 = vpop.f32.mrb[9].mxu0  ;;  %v2554_v39 = vpop.f32.mrb[9].mxu1 }
 0x109   :  { %v4508_v46 = vadd.f32 %v2512_v10, %v2511_v33  ;;  %v2514_v47 = vpop.f32.mrb[10].mxu0  ;;  %v4510_v48 = vadd.f32 %v2554_v39, %v2553_v35  ;;  %v2556_v49 = vpop.f32.mrb[10].mxu1  ;;  %v581_v35 = vmul.f32 %v3537_v26, %v267_v19  ;;  %v591_v10 = vmul.f32 %v3537_v26, %v277_v27 }
 0x10a   :  { %v2515_v56 = vpop.f32.mrb[11].mxu0  ;;  %v2557_v57 = vpop.f32.mrb[11].mxu1  ;;  %v563_v39 = vmul.f32 %v3039_v37, %v249_v28 }
 0x10b   :  { %v4530_v61 = vadd.f32 %v2515_v56, %v2514_v47  ;;  %v4532_v62 = vadd.f32 %v2557_v57, %v2556_v49 }
 0x10c   :  { %1523 = vmatmul.mubr.bf16.gmra.mrb[116].mxu1 %v701_v40  ;;  %1652 = vmatmul.mubr.bf16.gmra.mrb[116].mxu0 %v693_v42  ;;  %v573_v40 = vmul.f32 %v3039_v37, %v259_v29  ;;  %v584_v42 = vmul.f32 %v3041_v38, %v270_v32  ;;  %v279_v38 = vld [vmem:[%s5256_s2 + $0x810] sm:$0xff] }
 0x10d   :  { %1530 = vmatprep.mubr.bf16.mxu1 %v712_v50  ;;  %2480 = vmatprep.mubr.msk.bf16.mxu0 %vm959_vm0, %v704_v51  ;;  %v721_v51 = vpack.c.bf16 %v591_v10, %v581_v35  ;;  %v593_v3 = vmul.f32 %v3039_v37, %v279_v38 }
 0x10e   :  { %v713_v52 = vpack.c.bf16 %v573_v40, %v563_v39  ;;  %v724_v57 = vpack.c.bf16 %v594_v43, %v584_v42 }
 0x10f   :  { %v2517_v12 = vpop.f32.mrb[12].mxu0  ;;  %v2559_v4 = vpop.f32.mrb[12].mxu1 }
 0x110   :  { %v2518_v14 = vpop.f32.mrb[13].mxu0  ;;  %v2560_v15 = vpop.f32.mrb[13].mxu1 }
 0x111   :  { %v4546_v21 = vadd.f32 %v2518_v14, %v2517_v12  ;;  %v2520_v22 = vpop.f32.mrb[14].mxu0  ;;  %v4548_v23 = vadd.f32 %v2560_v15, %v2559_v4  ;;  %v2562_v18 = vpop.f32.mrb[14].mxu1  ;;  %v723_v12 = vpack.c.bf16 %v593_v3, %v583_v2 }
 0x112   :  { %v2521_v30 = vpop.f32.mrb[15].mxu0  ;;  %v2563_v31 = vpop.f32.mrb[15].mxu1 }
 0x113   :  { %v4565_v34 = vadd.f32 %v2521_v30, %v2520_v22  ;;  %v4567_v33 = vadd.f32 %v2563_v31, %v2562_v18 }
 0x114   :  { %1531 = vmatmul.mubr.bf16.gmra.mrb[120].mxu1 %v711_v63  ;;  %1660 = vmatmul.mubr.bf16.gmra.mrb[120].mxu0 %v703_v17 }
 0x115   :  { %1538 = vmatprep.mubr.bf16.mxu1 %v722_v36  ;;  %2481 = vmatprep.mubr.msk.bf16.mxu0 %vm959_vm0, %v714_v16 }
 0x117   :  { %v2523_v45 = vpop.f32.mrb[16].mxu0  ;;  %v2565_v47 = vpop.f32.mrb[16].mxu1 }
 0x118   :  { %v2524_v49 = vpop.f32.mrb[17].mxu0  ;;  %v2566_v50 = vpop.f32.mrb[17].mxu1 }
 0x119   :  { %v4576_v53 = vadd.f32 %v2524_v49, %v2523_v45  ;;  %v2526_v26 = vpop.f32.mrb[18].mxu0  ;;  %v4578_v55 = vadd.f32 %v2566_v50, %v2565_v47  ;;  %v2568_v56 = vpop.f32.mrb[18].mxu1 }
 0x11a   :  { %v2527_v59 = vpop.f32.mrb[19].mxu0  ;;  %v2569_v60 = vpop.f32.mrb[19].mxu1 }
 0x11b   :  { %v4586_v0 = vadd.f32 %v2527_v59, %v2526_v26  ;;  %v4588_v1 = vadd.f32 %v2569_v60, %v2568_v56 }
 0x11c   :  { %1539 = vmatmul.mubr.bf16.gmra.mrb[124].mxu1 %v721_v51  ;;  %1668 = vmatmul.mubr.bf16.gmra.mrb[124].mxu0 %v713_v52 }
 0x11d   :  { %2482 = vmatprep.mubr.msk.bf16.mxu0 %vm959_vm0, %v724_v57 }
 0x11f   :  { %v2529_v5 = vpop.f32.mrb[20].mxu0  ;;  %v2571_v6 = vpop.f32.mrb[20].mxu1 }
 0x120   :  { %v2530_v7 = vpop.f32.mrb[21].mxu0  ;;  %v2572_v9 = vpop.f32.mrb[21].mxu1 }
 0x121   :  { %v4593_v4 = vadd.f32 %v2530_v7, %v2529_v5  ;;  %v2532_v14 = vpop.f32.mrb[22].mxu0  ;;  %v4595_v15 = vadd.f32 %v2572_v9, %v2571_v6  ;;  %v2574_v63 = vpop.f32.mrb[22].mxu1 }
 0x122   :  { %v2533_v17 = vpop.f32.mrb[23].mxu0  ;;  %v2575_v19 = vpop.f32.mrb[23].mxu1 }
 0x123   :  { %v4597_v22 = vadd.f32 %v2533_v17, %v2532_v14  ;;  %v4599_v18 = vadd.f32 %v2575_v19, %v2574_v63 }
 0x124   :  { %1676 = vmatmul.mubr.bf16.gmra.mrb[128].mxu0 %v723_v12 }
 0x127   :  { %v2535_v37 = vpop.f32.mrb[24].mxu0  ;;  %v2593_v36 = vpop.f32.mrb[24].mxu1 }
 0x128   :  { %v2536_v16 = vpop.f32.mrb[25].mxu0  ;;  %v2594_v27 = vpop.f32.mrb[25].mxu1 }
 0x129   :  { %v4601_v28 = vadd.f32 %v2536_v16, %v2535_v37  ;;  %v2595_v29 = vadd.f32 %v2594_v27, %v2593_v36  ;;  %v2538_v30 = vpop.f32.mrb[26].mxu0  ;;  %v2596_v31 = vpop.f32.mrb[26].mxu1 }
 0x12a   :  { %v2539_v32 = vpop.f32.mrb[27].mxu0  ;;  %v2597_v44 = vpop.f32.mrb[27].mxu1 }
 0x12b   :  { %v1171_v35 = vadd.f32 %v2595_v29, %v4426_v8  ;;  %v4604_v10 = vadd.f32 %v2539_v32, %v2538_v30  ;;  %v2598_v39 = vadd.f32 %v2597_v44, %v2596_v31 }
 0x12d   :  { %v1174_v40 = vadd.f32 %v2598_v39, %v4448_v20 }
 0x12f   :  { %v2599_v42 = vpop.f32.mrb[28].mxu1  ;;  %v2687_v43 = vpop.f32.mrb[28].mxu0 }
 0x130   :  { %v2600_v45 = vpop.f32.mrb[29].mxu1  ;;  %v2688_v47 = vpop.f32.mrb[29].mxu0 }
 0x131   :  { %v2601_v49 = vadd.f32 %v2600_v45, %v2599_v42  ;;  %v2689_v50 = vadd.f32 %v2688_v47, %v2687_v43  ;;  %v2602_v51 = vpop.f32.mrb[30].mxu1  ;;  %v2690_v52 = vpop.f32.mrb[30].mxu0 }
 0x132   :  { %v2603_v26 = vpop.f32.mrb[31].mxu1  ;;  %v2691_v56 = vpop.f32.mrb[31].mxu0 }
 0x133   :  { %v1179_v57 = vadd.f32 %v2601_v49, %v4467_v11  ;;  %v4608_v58 = vadd.f32 %v2689_v50, %v1171_v35  ;;  %v2604_v8 = vadd.f32 %v2603_v26, %v2602_v51  ;;  %v2692_v38 = vadd.f32 %v2691_v56, %v2690_v52 }
 0x135   :  { %v1182_v59 = vadd.f32 %v2604_v8, %v4489_v24  ;;  %v4611_v60 = vadd.f32 %v2692_v38, %v1174_v40 }
 0x137   :  { %v2605_v20 = vpop.f32.mrb[32].mxu1  ;;  %v2693_v2 = vpop.f32.mrb[32].mxu0 }
 0x138   :  { %v2606_v3 = vpop.f32.mrb[33].mxu1  ;;  %v2694_v5 = vpop.f32.mrb[33].mxu0 }
 0x139   :  { %v2607_v6 = vadd.f32 %v2606_v3, %v2605_v20  ;;  %v2695_v7 = vadd.f32 %v2694_v5, %v2693_v2  ;;  %v2608_v9 = vpop.f32.mrb[34].mxu1  ;;  %v2696_v12 = vpop.f32.mrb[34].mxu0 }
 0x13a   :  { %v2609_v14 = vpop.f32.mrb[35].mxu1  ;;  %v2697_v63 = vpop.f32.mrb[35].mxu0 }
 0x13b   :  { %v1187_v11 = vadd.f32 %v2607_v6, %v4508_v46  ;;  %v4614_v17 = vadd.f32 %v2695_v7, %v1179_v57  ;;  %v2610_v19 = vadd.f32 %v2609_v14, %v2608_v9  ;;  %v2698_v37 = vadd.f32 %v2697_v63, %v2696_v12 }
 0x13d   :  { %v1190_v24 = vadd.f32 %v2610_v19, %v4530_v61  ;;  %v4617_v36 = vadd.f32 %v2698_v37, %v1182_v59 }
 0x13f   :  { %v2611_v16 = vpop.f32.mrb[36].mxu1  ;;  %v2699_v27 = vpop.f32.mrb[36].mxu0 }
 0x140   :  { %v2612_v29 = vpop.f32.mrb[37].mxu1  ;;  %v2700_v30 = vpop.f32.mrb[37].mxu0 }
 0x141   :  { %v2613_v31 = vadd.f32 %v2612_v29, %v2611_v16  ;;  %v2701_v32 = vadd.f32 %v2700_v30, %v2699_v27  ;;  %v2614_v44 = vpop.f32.mrb[38].mxu1  ;;  %v2702_v35 = vpop.f32.mrb[38].mxu0 }
 0x142   :  { %v2615_v39 = vpop.f32.mrb[39].mxu1  ;;  %v2703_v40 = vpop.f32.mrb[39].mxu0 }
 0x143   :  { %v1195_v46 = vadd.f32 %v2613_v31, %v4546_v21  ;;  %v4620_v42 = vadd.f32 %v2701_v32, %v1187_v11  ;;  %v2616_v43 = vadd.f32 %v2615_v39, %v2614_v44  ;;  %v2704_v45 = vadd.f32 %v2703_v40, %v2702_v35 }
 0x145   :  { %v1198_v61 = vadd.f32 %v2616_v43, %v4565_v34  ;;  %v4623_v47 = vadd.f32 %v2704_v45, %v1190_v24 }
 0x147   :  { %v2617_v49 = vpop.f32.mrb[40].mxu1  ;;  %v2705_v50 = vpop.f32.mrb[40].mxu0 }
 0x148   :  { %v2618_v51 = vpop.f32.mrb[41].mxu1  ;;  %v2706_v52 = vpop.f32.mrb[41].mxu0 }
 0x149   :  { %v2619_v26 = vadd.f32 %v2618_v51, %v2617_v49  ;;  %v2707_v56 = vadd.f32 %v2706_v52, %v2705_v50  ;;  %v2620_v57 = vpop.f32.mrb[42].mxu1  ;;  %v2708_v8 = vpop.f32.mrb[42].mxu0 }
 0x14a   :  { %v2621_v38 = vpop.f32.mrb[43].mxu1  ;;  %v2709_v59 = vpop.f32.mrb[43].mxu0 }
 0x14b   :  { %v1203_v21 = vadd.f32 %v2619_v26, %v4576_v53  ;;  %v4626_v20 = vadd.f32 %v2707_v56, %v1195_v46  ;;  %v2622_v2 = vadd.f32 %v2621_v38, %v2620_v57  ;;  %v2710_v3 = vadd.f32 %v2709_v59, %v2708_v8 }
 0x14d   :  { %v1206_v34 = vadd.f32 %v2622_v2, %v4586_v0  ;;  %v4629_v5 = vadd.f32 %v2710_v3, %v1198_v61 }
 0x14f   :  { %v2623_v6 = vpop.f32.mrb[44].mxu1  ;;  %v2711_v7 = vpop.f32.mrb[44].mxu0 }
 0x150   :  { %v2624_v9 = vpop.f32.mrb[45].mxu1  ;;  %v2712_v12 = vpop.f32.mrb[45].mxu0 }
 0x151   :  { %v2625_v14 = vadd.f32 %v2624_v9, %v2623_v6  ;;  %v2713_v63 = vadd.f32 %v2712_v12, %v2711_v7  ;;  %v2626_v11 = vpop.f32.mrb[46].mxu1  ;;  %v2714_v19 = vpop.f32.mrb[46].mxu0 }
 0x152   :  { %v2627_v37 = vpop.f32.mrb[47].mxu1  ;;  %v2715_v24 = vpop.f32.mrb[47].mxu0 }
 0x153   :  { %v1211_v53 = vadd.f32 %v2625_v14, %v4593_v4  ;;  %v4632_v16 = vadd.f32 %v2713_v63, %v1203_v21  ;;  %v2628_v27 = vadd.f32 %v2627_v37, %v2626_v11  ;;  %v2716_v29 = vadd.f32 %v2715_v24, %v2714_v19 }
 0x155   :  { %v1214_v0 = vadd.f32 %v2628_v27, %v4597_v22  ;;  %v4635_v30 = vadd.f32 %v2716_v29, %v1206_v34 }
 0x157   :  { %v2629_v31 = vpop.f32.mrb[48].mxu1  ;;  %v2717_v32 = vpop.f32.mrb[48].mxu0 }
 0x158   :  { %v2630_v44 = vpop.f32.mrb[49].mxu1  ;;  %v2718_v35 = vpop.f32.mrb[49].mxu0 }
 0x159   :  { %v2631_v39 = vadd.f32 %v2630_v44, %v2629_v31  ;;  %v2719_v40 = vadd.f32 %v2718_v35, %v2717_v32  ;;  %v2632_v46 = vpop.f32.mrb[50].mxu1  ;;  %v2720_v43 = vpop.f32.mrb[50].mxu0 }
 0x15a   :  { %v2633_v45 = vpop.f32.mrb[51].mxu1  ;;  %v2721_v61 = vpop.f32.mrb[51].mxu0 }
 0x15b   :  { %v1219_v4 = vadd.f32 %v2631_v39, %v4601_v28  ;;  %v4638_v49 = vadd.f32 %v2719_v40, %v1211_v53  ;;  %v2634_v50 = vadd.f32 %v2633_v45, %v2632_v46  ;;  %v2722_v51 = vadd.f32 %v2721_v61, %v2720_v43 }
 0x15d   :  { %v1222_v22 = vadd.f32 %v2634_v50, %v4604_v10  ;;  %v4641_v52 = vadd.f32 %v2722_v51, %v1214_v0 }
 0x15f   :  { %v2635_v26 = vpop.f32.mrb[52].mxu1  ;;  %v2723_v56 = vpop.f32.mrb[52].mxu0 }
 0x160   :  { %v2636_v57 = vpop.f32.mrb[53].mxu1  ;;  %v2724_v8 = vpop.f32.mrb[53].mxu0 }
 0x161   :  { %v2637_v38 = vadd.f32 %v2636_v57, %v2635_v26  ;;  %v2725_v59 = vadd.f32 %v2724_v8, %v2723_v56  ;;  %v2638_v21 = vpop.f32.mrb[54].mxu1  ;;  %v2726_v2 = vpop.f32.mrb[54].mxu0 }
 0x162   :  { %v2639_v3 = vpop.f32.mrb[55].mxu1  ;;  %v2727_v34 = vpop.f32.mrb[55].mxu0 }
 0x163   :  { %v1227_v28 = vadd.f32 %v2637_v38, %v4428_v41  ;;  %v4644_v6 = vadd.f32 %v2725_v59, %v1219_v4  ;;  %v2640_v7 = vadd.f32 %v2639_v3, %v2638_v21  ;;  %v2728_v9 = vadd.f32 %v2727_v34, %v2726_v2 }
 0x165   :  { %v1230_v10 = vadd.f32 %v2640_v7, %v4450_v54  ;;  %v4647_v12 = vadd.f32 %v2728_v9, %v1222_v22 }
 0x167   :  { %v2641_v14 = vpop.f32.mrb[56].mxu1  ;;  %v2729_v63 = vpop.f32.mrb[56].mxu0 }
 0x168   :  { %v2642_v11 = vpop.f32.mrb[57].mxu1  ;;  %v2730_v19 = vpop.f32.mrb[57].mxu0 }
 0x169   :  { %v2643_v37 = vadd.f32 %v2642_v11, %v2641_v14  ;;  %v2731_v24 = vadd.f32 %v2730_v19, %v2729_v63  ;;  %v2644_v53 = vpop.f32.mrb[58].mxu1  ;;  %v2732_v27 = vpop.f32.mrb[58].mxu0 }
 0x16a   :  { %v2645_v29 = vpop.f32.mrb[59].mxu1  ;;  %v2733_v0 = vpop.f32.mrb[59].mxu0 }
 0x16b   :  { %v1235_v41 = vadd.f32 %v2643_v37, %v4469_v13  ;;  %v4650_v31 = vadd.f32 %v2731_v24, %v1227_v28  ;;  %v2646_v32 = vadd.f32 %v2645_v29, %v2644_v53  ;;  %v2734_v44 = vadd.f32 %v2733_v0, %v2732_v27 }
 0x16d   :  { %v1238_v54 = vadd.f32 %v2646_v32, %v4491_v25  ;;  %v4653_v35 = vadd.f32 %v2734_v44, %v1230_v10 }
 0x16f   :  { %v2647_v39 = vpop.f32.mrb[60].mxu1  ;;  %v2735_v40 = vpop.f32.mrb[60].mxu0 }
 0x170   :  { %v2648_v46 = vpop.f32.mrb[61].mxu1  ;;  %v2736_v43 = vpop.f32.mrb[61].mxu0 }
 0x171   :  { %v2649_v45 = vadd.f32 %v2648_v46, %v2647_v39  ;;  %v2737_v61 = vadd.f32 %v2736_v43, %v2735_v40  ;;  %v2650_v4 = vpop.f32.mrb[62].mxu1  ;;  %v2738_v50 = vpop.f32.mrb[62].mxu0 }
 0x172   :  { %v2651_v51 = vpop.f32.mrb[63].mxu1  ;;  %v2739_v22 = vpop.f32.mrb[63].mxu0 }
 0x173   :  { %v1243_v13 = vadd.f32 %v2649_v45, %v4510_v48  ;;  %v4656_v26 = vadd.f32 %v2737_v61, %v1235_v41  ;;  %v2652_v56 = vadd.f32 %v2651_v51, %v2650_v4  ;;  %v2740_v57 = vadd.f32 %v2739_v22, %v2738_v50 }
 0x175   :  { %v1246_v25 = vadd.f32 %v2652_v56, %v4532_v62  ;;  %v4659_v8 = vadd.f32 %v2740_v57, %v1238_v54 }
 0x177   :  { %v2653_v38 = vpop.f32.mrb[64].mxu1  ;;  %v2741_v59 = vpop.f32.mrb[64].mxu0 }
 0x178   :  { %v2654_v21 = vpop.f32.mrb[65].mxu1  ;;  %v2742_v2 = vpop.f32.mrb[65].mxu0 }
 0x179   :  { %v2655_v3 = vadd.f32 %v2654_v21, %v2653_v38  ;;  %v2743_v34 = vadd.f32 %v2742_v2, %v2741_v59  ;;  %v2656_v28 = vpop.f32.mrb[66].mxu1  ;;  %v2744_v7 = vpop.f32.mrb[66].mxu0 }
 0x17a   :  { %v2657_v9 = vpop.f32.mrb[67].mxu1  ;;  %v2745_v10 = vpop.f32.mrb[67].mxu0 }
 0x17b   :  { %v1251_v48 = vadd.f32 %v2655_v3, %v4548_v23  ;;  %v4662_v14 = vadd.f32 %v2743_v34, %v1243_v13  ;;  %v2658_v63 = vadd.f32 %v2657_v9, %v2656_v28  ;;  %v2746_v11 = vadd.f32 %v2745_v10, %v2744_v7 }
 0x17d   :  { %v1254_v62 = vadd.f32 %v2658_v63, %v4567_v33  ;;  %v4665_v19 = vadd.f32 %v2746_v11, %v1246_v25 }
 0x17f   :  { %v2659_v37 = vpop.f32.mrb[68].mxu1  ;;  %v2747_v24 = vpop.f32.mrb[68].mxu0 }
 0x180   :  { %v2660_v53 = vpop.f32.mrb[69].mxu1  ;;  %v2748_v27 = vpop.f32.mrb[69].mxu0 }
 0x181   :  { %v2661_v29 = vadd.f32 %v2660_v53, %v2659_v37  ;;  %v2749_v0 = vadd.f32 %v2748_v27, %v2747_v24  ;;  %v2662_v41 = vpop.f32.mrb[70].mxu1  ;;  %v2750_v32 = vpop.f32.mrb[70].mxu0 }
 0x182   :  { %v2663_v44 = vpop.f32.mrb[71].mxu1  ;;  %v2751_v54 = vpop.f32.mrb[71].mxu0 }
 0x183   :  { %v1259_v23 = vadd.f32 %v2661_v29, %v4578_v55  ;;  %v4668_v39 = vadd.f32 %v2749_v0, %v1251_v48  ;;  %v2664_v40 = vadd.f32 %v2663_v44, %v2662_v41  ;;  %v2752_v46 = vadd.f32 %v2751_v54, %v2750_v32 }
 0x185   :  { %v1262_v33 = vadd.f32 %v2664_v40, %v4588_v1  ;;  %v4671_v43 = vadd.f32 %v2752_v46, %v1254_v62 }
 0x187   :  { %v2665_v45 = vpop.f32.mrb[72].mxu1  ;;  %v2753_v61 = vpop.f32.mrb[72].mxu0 }
 0x188   :  { %v2666_v4 = vpop.f32.mrb[73].mxu1  ;;  %v2754_v50 = vpop.f32.mrb[73].mxu0 }
 0x189   :  { %v2667_v51 = vadd.f32 %v2666_v4, %v2665_v45  ;;  %v2755_v22 = vadd.f32 %v2754_v50, %v2753_v61  ;;  %v2668_v13 = vpop.f32.mrb[74].mxu1  ;;  %v2756_v56 = vpop.f32.mrb[74].mxu0 }
 0x18a   :  { %v2669_v57 = vpop.f32.mrb[75].mxu1  ;;  %v2757_v25 = vpop.f32.mrb[75].mxu0 }
 0x18b   :  { %v1267_v55 = vadd.f32 %v2667_v51, %v4595_v15  ;;  %v4674_v38 = vadd.f32 %v2755_v22, %v1259_v23  ;;  %v2670_v59 = vadd.f32 %v2669_v57, %v2668_v13  ;;  %v2758_v21 = vadd.f32 %v2757_v25, %v2756_v56 }
 0x18d   :  { %v1270_v1 = vadd.f32 %v2670_v59, %v4599_v18  ;;  %v4677_v2 = vadd.f32 %v2758_v21, %v1262_v33 }
 0x18f   :  { %v2759_v3 = vpop.f32.mrb[76].mxu0  ;;  %v2781_v34 = vpop.f32.mrb[76].mxu1 }
 0x190   :  { %v2760_v28 = vpop.f32.mrb[77].mxu0  ;;  %v2782_v7 = vpop.f32.mrb[77].mxu1 }
 0x191   :  { %v2761_v9 = vadd.f32 %v2760_v28, %v2759_v3  ;;  %v2783_v10 = vadd.f32 %v2782_v7, %v2781_v34  ;;  %v2762_v48 = vpop.f32.mrb[78].mxu0  ;;  %v2784_v63 = vpop.f32.mrb[78].mxu1 }
 0x192   :  { %v2763_v11 = vpop.f32.mrb[79].mxu0  ;;  %v2785_v62 = vpop.f32.mrb[79].mxu1 }
 0x193   :  { %v4679_v37 = vadd.f32 %v2761_v9, %v1267_v55  ;;  %v2764_v15 = vadd.f32 %v2763_v11, %v2762_v48  ;;  %v2786_v24 = vadd.f32 %v2785_v62, %v2784_v63  ;;  %v1445_v53 = vadd.f32 %v2783_v10, %v4608_v58 }
 0x195   :  { %v4682_v27 = vadd.f32 %v2764_v15, %v1270_v1  ;;  %v1448_v18 = vadd.f32 %v2786_v24, %v4611_v60 }
 0x197   :  { %v2787_v29 = vpop.f32.mrb[80].mxu1  ;;  %v1581_v0 = vpop.f32.mrb[80].mxu0 }
 0x198   :  { %v4685_v41 = vadd.f32 %v1581_v0, %v1445_v53  ;;  %v2788_v32 = vpop.f32.mrb[81].mxu1  ;;  %v1583_v44 = vpop.f32.mrb[81].mxu0 }
 0x199   :  { %v2789_v54 = vadd.f32 %v2788_v32, %v2787_v29  ;;  %v2790_v23 = vpop.f32.mrb[82].mxu1  ;;  %v1584_v40 = vpop.f32.mrb[82].mxu0 }
 0x19a   :  { %v4687_v46 = vadd.f32 %v1584_v40, %v1448_v18  ;;  %v2791_v33 = vpop.f32.mrb[83].mxu1  ;;  %v1586_v45 = vpop.f32.mrb[83].mxu0  ;;  %v1685_v58 = vsel %vm1684_vm1, %v4685_v41, 0.0 }
 0x19b   :  { %v2792_v61 = vadd.f32 %v2791_v33, %v2790_v23  ;;  %1686 = vadd.xlane.f32.xlu0 %v1685_v58  ;;  %v1453_v60 = vadd.f32 %v2789_v54, %v4614_v17 }
 0x19c   :  { %v1688_v50 = vsel %vm1684_vm1, %v4687_v46, 0.0 }
 0x19d   :  { %v1456_v4 = vadd.f32 %v2792_v61, %v4617_v36 }
 0x19f   :  { %v2793_v51 = vpop.f32.mrb[84].mxu1  ;;  %v1589_v22 = vpop.f32.mrb[84].mxu0  ;;  %1689 = vadd.xlane.f32.xlu0 %v1688_v50 }
 0x1a0   :  { %v4695_v13 = vadd.f32 %v1589_v22, %v1453_v60  ;;  %v2794_v56 = vpop.f32.mrb[85].mxu1  ;;  %v1591_v57 = vpop.f32.mrb[85].mxu0 }
 0x1a1   :  { %v2795_v25 = vadd.f32 %v2794_v56, %v2793_v51  ;;  %v2796_v55 = vpop.f32.mrb[86].mxu1  ;;  %v1592_v59 = vpop.f32.mrb[86].mxu0 }
 0x1a2   :  { %v4697_v21 = vadd.f32 %v1592_v59, %v1456_v4  ;;  %v2797_v1 = vpop.f32.mrb[87].mxu1  ;;  %v1691_v17 = vsel %vm1684_vm1, %v4695_v13, 0.0  ;;  %v1594_v36 = vpop.f32.mrb[87].mxu0 }
 0x1a3   :  { %v2798_v3 = vadd.f32 %v2797_v1, %v2796_v55  ;;  %1692 = vadd.xlane.f32.xlu1 %v1691_v17  ;;  %v1461_v34 = vadd.f32 %v2795_v25, %v4620_v42 }
 0x1a4   :  { %v1694_v7 = vsel %vm1684_vm1, %v4697_v21, 0.0 }
 0x1a5   :  { %v1464_v28 = vadd.f32 %v2798_v3, %v4623_v47 }
 0x1a7   :  { %v2799_v9 = vpop.f32.mrb[88].mxu1  ;;  %v1597_v10 = vpop.f32.mrb[88].mxu0  ;;  %1695 = vadd.xlane.f32.xlu1 %v1694_v7 }
 0x1a8   :  { %v4705_v48 = vadd.f32 %v1597_v10, %v1461_v34  ;;  %v2800_v63 = vpop.f32.mrb[89].mxu1  ;;  %v1599_v11 = vpop.f32.mrb[89].mxu0 }
 0x1a9   :  { %v2801_v62 = vadd.f32 %v2800_v63, %v2799_v9  ;;  %v2802_v15 = vpop.f32.mrb[90].mxu1  ;;  %v1600_v24 = vpop.f32.mrb[90].mxu0 }
 0x1aa   :  { %v4707_v53 = vadd.f32 %v1600_v24, %v1464_v28  ;;  %v2803_v18 = vpop.f32.mrb[91].mxu1  ;;  %v1697_v42 = vsel %vm1684_vm1, %v4705_v48, 0.0  ;;  %v1602_v47 = vpop.f32.mrb[91].mxu0 }
 0x1ab   :  { %v2804_v29 = vadd.f32 %v2803_v18, %v2802_v15  ;;  %1698 = vadd.xlane.f32.xlu0 %v1697_v42  ;;  %v1469_v0 = vadd.f32 %v2801_v62, %v4626_v20 }
 0x1ac   :  { %v1700_v32 = vsel %vm1684_vm1, %v4707_v53, 0.0 }
 0x1ad   :  { %1701 = vadd.xlane.f32.xlu1 %v1700_v32  ;;  %v1472_v44 = vadd.f32 %v2804_v29, %v4629_v5 }
 0x1af   :  { %v2805_v54 = vpop.f32.mrb[92].mxu1  ;;  %v1605_v23 = vpop.f32.mrb[92].mxu0 }
 0x1b0   :  { %v4715_v40 = vadd.f32 %v1605_v23, %v1469_v0  ;;  %v2806_v33 = vpop.f32.mrb[93].mxu1  ;;  %v1607_v45 = vpop.f32.mrb[93].mxu0 }
 0x1b1   :  { %v2807_v58 = vadd.f32 %v2806_v33, %v2805_v54  ;;  %v2808_v61 = vpop.f32.mrb[94].mxu1  ;;  %v1608_v60 = vpop.f32.mrb[94].mxu0 }
 0x1b2   :  { %v4717_v4 = vadd.f32 %v1608_v60, %v1472_v44  ;;  %v2809_v50 = vpop.f32.mrb[95].mxu1  ;;  %v1703_v20 = vsel %vm1684_vm1, %v4715_v40, 0.0  ;;  %v1610_v51 = vpop.f32.mrb[95].mxu0 }
 0x1b3   :  { %v2810_v22 = vadd.f32 %v2809_v50, %v2808_v61  ;;  %1704 = vadd.xlane.f32.xlu0 %v1703_v20  ;;  %v1477_v5 = vadd.f32 %v2807_v58, %v4632_v16 }
 0x1b4   :  { %v1706_v56 = vsel %vm1684_vm1, %v4717_v4, 0.0 }
 0x1b5   :  { %1707 = vadd.xlane.f32.xlu1 %v1706_v56  ;;  %v1480_v57 = vadd.f32 %v2810_v22, %v4635_v30 }
 0x1b7   :  { %v2811_v25 = vpop.f32.mrb[96].mxu1  ;;  %v1613_v55 = vpop.f32.mrb[96].mxu0 }
 0x1b8   :  { %v4725_v59 = vadd.f32 %v1613_v55, %v1477_v5  ;;  %v2812_v1 = vpop.f32.mrb[97].mxu1  ;;  %v1615_v17 = vpop.f32.mrb[97].mxu0 }
 0x1b9   :  { %v2813_v36 = vadd.f32 %v2812_v1, %v2811_v25  ;;  %v2814_v3 = vpop.f32.mrb[98].mxu1  ;;  %v1616_v34 = vpop.f32.mrb[98].mxu0 }
 0x1ba   :  { %v4727_v28 = vadd.f32 %v1616_v34, %v1480_v57  ;;  %v2815_v7 = vpop.f32.mrb[99].mxu1  ;;  %v1709_v16 = vsel %vm1684_vm1, %v4725_v59, 0.0  ;;  %v1618_v9 = vpop.f32.mrb[99].mxu0 }
 0x1bb   :  { %v2816_v10 = vadd.f32 %v2815_v7, %v2814_v3  ;;  %1710 = vadd.xlane.f32.xlu0 %v1709_v16  ;;  %v1485_v30 = vadd.f32 %v2813_v36, %v4638_v49 }
 0x1bc   :  { %v1712_v63 = vsel %vm1684_vm1, %v4727_v28, 0.0 }
 0x1bd   :  { %1713 = vadd.xlane.f32.xlu1 %v1712_v63  ;;  %v1488_v11 = vadd.f32 %v2816_v10, %v4641_v52 }
 0x1bf   :  { %v2817_v62 = vpop.f32.mrb[100].mxu1  ;;  %v1621_v15 = vpop.f32.mrb[100].mxu0 }
 0x1c0   :  { %v4735_v24 = vadd.f32 %v1621_v15, %v1485_v30  ;;  %v2818_v18 = vpop.f32.mrb[101].mxu1  ;;  %v1623_v42 = vpop.f32.mrb[101].mxu0 }
 0x1c1   :  { %v2819_v47 = vadd.f32 %v2818_v18, %v2817_v62  ;;  %v2820_v29 = vpop.f32.mrb[102].mxu1  ;;  %v1624_v0 = vpop.f32.mrb[102].mxu0 }
 0x1c2   :  { %v4737_v32 = vadd.f32 %v1624_v0, %v1488_v11  ;;  %v2821_v44 = vpop.f32.mrb[103].mxu1  ;;  %v1715_v49 = vsel %vm1684_vm1, %v4735_v24, 0.0  ;;  %v1626_v54 = vpop.f32.mrb[103].mxu0 }
 0x1c3   :  { %v2822_v23 = vadd.f32 %v2821_v44, %v2820_v29  ;;  %1716 = vadd.xlane.f32.xlu0 %v1715_v49  ;;  %v1493_v52 = vadd.f32 %v2819_v47, %v4644_v6 }
 0x1c4   :  { %v1718_v33 = vsel %vm1684_vm1, %v4737_v32, 0.0 }
 0x1c5   :  { %1719 = vadd.xlane.f32.xlu1 %v1718_v33  ;;  %v1496_v45 = vadd.f32 %v2822_v23, %v4647_v12 }
 0x1c7   :  { %v2823_v58 = vpop.f32.mrb[104].mxu1  ;;  %v1629_v61 = vpop.f32.mrb[104].mxu0 }
 0x1c8   :  { %v4745_v60 = vadd.f32 %v1629_v61, %v1493_v52  ;;  %v2824_v50 = vpop.f32.mrb[105].mxu1  ;;  %v1631_v20 = vpop.f32.mrb[105].mxu0 }
 0x1c9   :  { %v2825_v51 = vadd.f32 %v2824_v50, %v2823_v58  ;;  %v2826_v22 = vpop.f32.mrb[106].mxu1  ;;  %v1632_v5 = vpop.f32.mrb[106].mxu0 }
 0x1ca   :  { %v4747_v56 = vadd.f32 %v1632_v5, %v1496_v45  ;;  %v2827_v57 = vpop.f32.mrb[107].mxu1  ;;  %v1721_v6 = vsel %vm1684_vm1, %v4745_v60, 0.0  ;;  %v1634_v25 = vpop.f32.mrb[107].mxu0 }
 0x1cb   :  { %v2828_v55 = vadd.f32 %v2827_v57, %v2826_v22  ;;  %1722 = vadd.xlane.f32.xlu0 %v1721_v6  ;;  %v1501_v12 = vadd.f32 %v2825_v51, %v4650_v31 }
 0x1cc   :  { %v1724_v1 = vsel %vm1684_vm1, %v4747_v56, 0.0 }
 0x1cd   :  { %1725 = vadd.xlane.f32.xlu1 %v1724_v1  ;;  %v1504_v17 = vadd.f32 %v2828_v55, %v4653_v35 }
 0x1cf   :  { %v2829_v36 = vpop.f32.mrb[108].mxu1  ;;  %v1637_v3 = vpop.f32.mrb[108].mxu0 }
 0x1d0   :  { %v4755_v34 = vadd.f32 %v1637_v3, %v1501_v12  ;;  %v2830_v7 = vpop.f32.mrb[109].mxu1  ;;  %v1639_v16 = vpop.f32.mrb[109].mxu0 }
 0x1d1   :  { %v2831_v9 = vadd.f32 %v2830_v7, %v2829_v36  ;;  %v2832_v10 = vpop.f32.mrb[110].mxu1  ;;  %v1640_v30 = vpop.f32.mrb[110].mxu0 }
 0x1d2   :  { %v4757_v63 = vadd.f32 %v1640_v30, %v1504_v17  ;;  %v2833_v11 = vpop.f32.mrb[111].mxu1  ;;  %v1727_v31 = vsel %vm1684_vm1, %v4755_v34, 0.0  ;;  %v1642_v62 = vpop.f32.mrb[111].mxu0 }
 0x1d3   :  { %v2834_v15 = vadd.f32 %v2833_v11, %v2832_v10  ;;  %1728 = vadd.xlane.f32.xlu0 %v1727_v31  ;;  %v1509_v35 = vadd.f32 %v2831_v9, %v4656_v26 }
 0x1d4   :  { %v1730_v18 = vsel %vm1684_vm1, %v4757_v63, 0.0 }
 0x1d5   :  { %1731 = vadd.xlane.f32.xlu1 %v1730_v18  ;;  %v1512_v42 = vadd.f32 %v2834_v15, %v4659_v8 }
 0x1d7   :  { %v2835_v47 = vpop.f32.mrb[112].mxu1  ;;  %v1645_v29 = vpop.f32.mrb[112].mxu0 }
 0x1d8   :  { %v4765_v0 = vadd.f32 %v1645_v29, %v1509_v35  ;;  %v2836_v44 = vpop.f32.mrb[113].mxu1  ;;  %v1647_v49 = vpop.f32.mrb[113].mxu0 }
 0x1d9   :  { %v2837_v54 = vadd.f32 %v2836_v44, %v2835_v47  ;;  %v2838_v23 = vpop.f32.mrb[114].mxu1  ;;  %v1648_v52 = vpop.f32.mrb[114].mxu0 }
 0x1da   :  { %v4767_v33 = vadd.f32 %v1648_v52, %v1512_v42  ;;  %v2839_v45 = vpop.f32.mrb[115].mxu1  ;;  %v1733_v26 = vsel %vm1684_vm1, %v4765_v0, 0.0  ;;  %v1650_v58 = vpop.f32.mrb[115].mxu0 }
 0x1db   :  { %v2840_v61 = vadd.f32 %v2839_v45, %v2838_v23  ;;  %1734 = vadd.xlane.f32.xlu0 %v1733_v26  ;;  %v1517_v8 = vadd.f32 %v2837_v54, %v4662_v14 }
 0x1dc   :  { %v1736_v50 = vsel %vm1684_vm1, %v4767_v33, 0.0 }
 0x1dd   :  { %1737 = vadd.xlane.f32.xlu1 %v1736_v50  ;;  %v1520_v20 = vadd.f32 %v2840_v61, %v4665_v19 }
 0x1df   :  { %v2841_v51 = vpop.f32.mrb[116].mxu1  ;;  %v1653_v22 = vpop.f32.mrb[116].mxu0 }
 0x1e0   :  { %v4775_v5 = vadd.f32 %v1653_v22, %v1517_v8  ;;  %v2842_v57 = vpop.f32.mrb[117].mxu1  ;;  %v1655_v6 = vpop.f32.mrb[117].mxu0 }
 0x1e1   :  { %v2843_v25 = vadd.f32 %v2842_v57, %v2841_v51  ;;  %v2844_v55 = vpop.f32.mrb[118].mxu1  ;;  %v1656_v12 = vpop.f32.mrb[118].mxu0 }
 0x1e2   :  { %v4777_v1 = vadd.f32 %v1656_v12, %v1520_v20  ;;  %v2845_v17 = vpop.f32.mrb[119].mxu1  ;;  %v1739_v14 = vsel %vm1684_vm1, %v4775_v5, 0.0  ;;  %v1658_v36 = vpop.f32.mrb[119].mxu0 }
 0x1e3   :  { %v2846_v3 = vadd.f32 %v2845_v17, %v2844_v55  ;;  %1740 = vadd.xlane.f32.xlu0 %v1739_v14  ;;  %v1525_v19 = vadd.f32 %v2843_v25, %v4668_v39 }
 0x1e4   :  { %v1742_v7 = vsel %vm1684_vm1, %v4777_v1, 0.0 }
 0x1e5   :  { %1743 = vadd.xlane.f32.xlu1 %v1742_v7  ;;  %v1528_v16 = vadd.f32 %v2846_v3, %v4671_v43 }
 0x1e7   :  { %v2847_v9 = vpop.f32.mrb[120].mxu1  ;;  %v1661_v10 = vpop.f32.mrb[120].mxu0 }
 0x1e8   :  { %v4785_v30 = vadd.f32 %v1661_v10, %v1525_v19  ;;  %v2848_v11 = vpop.f32.mrb[121].mxu1  ;;  %v1663_v31 = vpop.f32.mrb[121].mxu0 }
 0x1e9   :  { %v2849_v62 = vadd.f32 %v2848_v11, %v2847_v9  ;;  %v2850_v15 = vpop.f32.mrb[122].mxu1  ;;  %v1664_v35 = vpop.f32.mrb[122].mxu0 }
 0x1ea   :  { %5265 = vst [vmem:[#allocation2_spill] sm:$0xff] %v4785_v30  ;;  %v4787_v18 = vadd.f32 %v1664_v35, %v1528_v16  ;;  %v2851_v42 = vpop.f32.mrb[123].mxu1  ;;  %v1745_v39 = vsel %vm1684_vm1, %v4785_v30, 0.0  ;;  %v1666_v47 = vpop.f32.mrb[123].mxu0 }
 0x1eb   :  { %v2852_v29 = vadd.f32 %v2851_v42, %v2850_v15  ;;  %1746 = vadd.xlane.f32.xlu0 %v1745_v39  ;;  %v1533_v43 = vadd.f32 %v2849_v62, %v4674_v38 }
 0x1ec   :  { %v1748_v44 = vsel %vm1684_vm1, %v4787_v18, 0.0 }
 0x1ed   :  { %1749 = vadd.xlane.f32.xlu1 %v1748_v44  ;;  %v1536_v49 = vadd.f32 %v2852_v29, %v4677_v2 }
 0x1ef   :  { %v2853_v54 = vpop.f32.mrb[124].mxu1  ;;  %v1669_v23 = vpop.f32.mrb[124].mxu0 }
 0x1f0   :  { %v4795_v52 = vadd.f32 %v1669_v23, %v1533_v43  ;;  %v2854_v45 = vpop.f32.mrb[125].mxu1  ;;  %v1671_v26 = vpop.f32.mrb[125].mxu0 }
 0x1f1   :  { %v2855_v58 = vadd.f32 %v2854_v45, %v2853_v54  ;;  %v2856_v61 = vpop.f32.mrb[126].mxu1  ;;  %v1672_v8 = vpop.f32.mrb[126].mxu0 }
 0x1f2   :  { %5266 = vst [vmem:[#allocation3_spill] sm:$0xff] %v4795_v52  ;;  %v4797_v50 = vadd.f32 %v1672_v8, %v1536_v49  ;;  %v2857_v20 = vpop.f32.mrb[127].mxu1  ;;  %v1751_v38 = vsel %vm1684_vm1, %v4795_v52, 0.0  ;;  %v1674_v51 = vpop.f32.mrb[127].mxu0 }
 0x1f3   :  { %v2858_v22 = vadd.f32 %v2857_v20, %v2856_v61  ;;  %1752 = vadd.xlane.f32.xlu0 %v1751_v38  ;;  %v1541_v2 = vadd.f32 %v2855_v58, %v4679_v37 }
 0x1f4   :  { %v1754_v57 = vsel %vm1684_vm1, %v4797_v50, 0.0 }
 0x1f5   :  { %1755 = vadd.xlane.f32.xlu1 %v1754_v57  ;;  %v1544_v6 = vadd.f32 %v2858_v22, %v4682_v27 }
 0x1f7   :  { %v1677_v25 = vpop.f32.mrb[128].mxu0 }
 0x1f8   :  { %v4805_v55 = vadd.f32 %v1677_v25, %v1541_v2  ;;  %v1679_v12 = vpop.f32.mrb[129].mxu0 }
 0x1f9   :  { %v1680_v17 = vpop.f32.mrb[130].mxu0 }
 0x1fa   :  { %5267 = vst [vmem:[#allocation4_spill] sm:$0xff] %v4805_v55  ;;  %v4807_v14 = vadd.f32 %v1680_v17, %v1544_v6  ;;  %v1757_v36 = vsel %vm1684_vm1, %v4805_v55, 0.0  ;;  %v1682_v3 = vpop.f32.mrb[131].mxu0 }
 0x1fb   :  { %1758 = vadd.xlane.f32.xlu0 %v1757_v36 }
 0x1fc   :  { %5268 = vst [vmem:[#allocation5_spill] sm:$0xff] %v4807_v14  ;;  %v1760_v37 = vsel %vm1684_vm1, %v4807_v14, 0.0 }
 0x1fd   :  { %1761 = vadd.xlane.f32.xlu1 %v1760_v37 }
 0x228   :  { %v1687_v19 = vpop.xlane.xlu0 %1686 }
 0x229   :  { %v4813_v7 = vmul.f32 0.020408163, %v1687_v19 }
 0x22b   :  { %v1790_v27 = vsub.f32 %v4685_v41, %v4813_v7 }
 0x22c   :  { %v1690_v16 = vpop.xlane.xlu0 %1689 }
 0x22d   :  { %v4817_v9 = vmul.f32 0.020408163, %v1690_v16  ;;  %v1816_v10 = vmul.f32 %v1790_v27, %v1790_v27 }
 0x22f   :  { %v1791_v11 = vsub.f32 %v4687_v46, %v4817_v9  ;;  %v1842_v31 = vsel %vm1684_vm1, %v1816_v10, 0.0 }
 0x230   :  { %v1693_v62 = vpop.xlane.xlu1 %1692  ;;  %1843 = vadd.xlane.f32.xlu0 %v1842_v31 }
 0x231   :  { %v4822_v15 = vmul.f32 0.020408163, %v1693_v62  ;;  %v1817_v35 = vmul.f32 %v1791_v11, %v1791_v11 }
 0x233   :  { %v1845_v42 = vsel %vm1684_vm1, %v1817_v35, 0.0  ;;  %v1792_v39 = vsub.f32 %v4695_v13, %v4822_v15 }
 0x234   :  { %v1696_v47 = vpop.xlane.xlu1 %1695  ;;  %1846 = vadd.xlane.f32.xlu1 %v1845_v42 }
 0x235   :  { %v4827_v29 = vmul.f32 0.020408163, %v1696_v47  ;;  %v1818_v43 = vmul.f32 %v1792_v39, %v1792_v39 }
 0x237   :  { %v1848_v44 = vsel %vm1684_vm1, %v1818_v43, 0.0  ;;  %v1793_v49 = vsub.f32 %v4697_v21, %v4827_v29 }
 0x238   :  { %1849 = vadd.xlane.f32.xlu0 %v1848_v44  ;;  %v1699_v54 = vpop.xlane.xlu0 %1698 }
 0x239   :  { %v4832_v23 = vmul.f32 0.020408163, %v1699_v54  ;;  %v1819_v45 = vmul.f32 %v1793_v49, %v1793_v49 }
 0x23a   :  { %v1702_v26 = vpop.xlane.xlu1 %1701 }
 0x23b   :  { %v1794_v58 = vsub.f32 %v4705_v48, %v4832_v23  ;;  %v4836_v61 = vmul.f32 0.020408163, %v1702_v26  ;;  %v1851_v8 = vsel %vm1684_vm1, %v1819_v45, 0.0 }
 0x23c   :  { %1852 = vadd.xlane.f32.xlu1 %v1851_v8 }
 0x23d   :  { %v1820_v20 = vmul.f32 %v1794_v58, %v1794_v58  ;;  %v1795_v38 = vsub.f32 %v4707_v53, %v4836_v61 }
 0x23f   :  { %v1854_v51 = vsel %vm1684_vm1, %v1820_v20, 0.0  ;;  %v1821_v22 = vmul.f32 %v1795_v38, %v1795_v38 }
 0x240   :  { %1855 = vadd.xlane.f32.xlu0 %v1854_v51  ;;  %v1705_v2 = vpop.xlane.xlu0 %1704 }
 0x241   :  { %v4842_v57 = vmul.f32 0.020408163, %v1705_v2  ;;  %v1857_v6 = vsel %vm1684_vm1, %v1821_v22, 0.0 }
 0x242   :  { %v1708_v25 = vpop.xlane.xlu1 %1707  ;;  %1858 = vadd.xlane.f32.xlu1 %v1857_v6 }
 0x243   :  { %v1796_v12 = vsub.f32 %v4715_v40, %v4842_v57  ;;  %v4847_v17 = vmul.f32 0.020408163, %v1708_v25 }
 0x245   :  { %v1822_v36 = vmul.f32 %v1796_v12, %v1796_v12  ;;  %v1797_v3 = vsub.f32 %v4717_v4, %v4847_v17 }
 0x247   :  { %v1860_v37 = vsel %vm1684_vm1, %v1822_v36, 0.0  ;;  %v1823_v19 = vmul.f32 %v1797_v3, %v1797_v3 }
 0x248   :  { %1861 = vadd.xlane.f32.xlu0 %v1860_v37  ;;  %v1711_v27 = vpop.xlane.xlu0 %1710 }
 0x249   :  { %v4852_v16 = vmul.f32 0.020408163, %v1711_v27  ;;  %v1863_v10 = vsel %vm1684_vm1, %v1823_v19, 0.0 }
 0x24a   :  { %v1714_v11 = vpop.xlane.xlu1 %1713  ;;  %1864 = vadd.xlane.f32.xlu1 %v1863_v10 }
 0x24b   :  { %v1798_v31 = vsub.f32 %v4725_v59, %v4852_v16  ;;  %v4857_v62 = vmul.f32 0.020408163, %v1714_v11 }
 0x24d   :  { %v1824_v35 = vmul.f32 %v1798_v31, %v1798_v31  ;;  %v1799_v42 = vsub.f32 %v4727_v28, %v4857_v62 }
 0x24f   :  { %v1866_v39 = vsel %vm1684_vm1, %v1824_v35, 0.0  ;;  %v1825_v47 = vmul.f32 %v1799_v42, %v1799_v42 }
 0x250   :  { %1867 = vadd.xlane.f32.xlu0 %v1866_v39  ;;  %v1717_v43 = vpop.xlane.xlu0 %1716 }
 0x251   :  { %v4862_v44 = vmul.f32 0.020408163, %v1717_v43  ;;  %v1869_v49 = vsel %vm1684_vm1, %v1825_v47, 0.0 }
 0x252   :  { %v1720_v54 = vpop.xlane.xlu1 %1719  ;;  %1870 = vadd.xlane.f32.xlu1 %v1869_v49 }
 0x253   :  { %v1800_v45 = vsub.f32 %v4735_v24, %v4862_v44  ;;  %v4867_v26 = vmul.f32 0.020408163, %v1720_v54 }
 0x255   :  { %v1826_v58 = vmul.f32 %v1800_v45, %v1800_v45  ;;  %v1801_v8 = vsub.f32 %v4737_v32, %v4867_v26 }
 0x257   :  { %v1872_v20 = vsel %vm1684_vm1, %v1826_v58, 0.0  ;;  %v1827_v38 = vmul.f32 %v1801_v8, %v1801_v8 }
 0x258   :  { %1873 = vadd.xlane.f32.xlu0 %v1872_v20  ;;  %v1723_v51 = vpop.xlane.xlu0 %1722 }
 0x259   :  { %v4872_v22 = vmul.f32 0.020408163, %v1723_v51  ;;  %v1875_v2 = vsel %vm1684_vm1, %v1827_v38, 0.0 }
 0x25a   :  { %v1726_v6 = vpop.xlane.xlu1 %1725  ;;  %1876 = vadd.xlane.f32.xlu1 %v1875_v2 }
 0x25b   :  { %v1802_v25 = vsub.f32 %v4745_v60, %v4872_v22  ;;  %v4877_v12 = vmul.f32 0.020408163, %v1726_v6 }
 0x25d   :  { %v1803_v36 = vsub.f32 %v4747_v56, %v4877_v12  ;;  %v1828_v3 = vmul.f32 %v1802_v25, %v1802_v25 }
 0x25f   :  { %v1878_v37 = vsel %vm1684_vm1, %v1828_v3, 0.0  ;;  %v1829_v19 = vmul.f32 %v1803_v36, %v1803_v36 }
 0x260   :  { %1879 = vadd.xlane.f32.xlu0 %v1878_v37  ;;  %v1729_v27 = vpop.xlane.xlu0 %1728 }
 0x261   :  { %v4882_v10 = vmul.f32 0.020408163, %v1729_v27  ;;  %v1881_v11 = vsel %vm1684_vm1, %v1829_v19, 0.0 }
 0x262   :  { %v1732_v31 = vpop.xlane.xlu1 %1731  ;;  %1882 = vadd.xlane.f32.xlu1 %v1881_v11 }
 0x263   :  { %v1804_v35 = vsub.f32 %v4755_v34, %v4882_v10  ;;  %v4887_v42 = vmul.f32 0.020408163, %v1732_v31 }
 0x265   :  { %v1805_v39 = vsub.f32 %v4757_v63, %v4887_v42  ;;  %v1830_v47 = vmul.f32 %v1804_v35, %v1804_v35 }
 0x267   :  { %v1884_v43 = vsel %vm1684_vm1, %v1830_v47, 0.0  ;;  %v1831_v49 = vmul.f32 %v1805_v39, %v1805_v39 }
 0x268   :  { %1885 = vadd.xlane.f32.xlu0 %v1884_v43  ;;  %v1735_v54 = vpop.xlane.xlu0 %1734 }
 0x269   :  { %v4892_v45 = vmul.f32 0.020408163, %v1735_v54  ;;  %v1887_v58 = vsel %vm1684_vm1, %v1831_v49, 0.0 }
 0x26a   :  { %v1738_v8 = vpop.xlane.xlu1 %1737  ;;  %1888 = vadd.xlane.f32.xlu1 %v1887_v58 }
 0x26b   :  { %v1806_v20 = vsub.f32 %v4765_v0, %v4892_v45  ;;  %v4897_v38 = vmul.f32 0.020408163, %v1738_v8 }
 0x26d   :  { %v1807_v51 = vsub.f32 %v4767_v33, %v4897_v38  ;;  %v1832_v2 = vmul.f32 %v1806_v20, %v1806_v20 }
 0x26f   :  { %v1890_v6 = vsel %vm1684_vm1, %v1832_v2, 0.0  ;;  %v1833_v25 = vmul.f32 %v1807_v51, %v1807_v51 }
 0x270   :  { %1891 = vadd.xlane.f32.xlu0 %v1890_v6  ;;  %v1741_v36 = vpop.xlane.xlu0 %1740 }
 0x271   :  { %v4902_v3 = vmul.f32 0.020408163, %v1741_v36  ;;  %v1893_v37 = vsel %vm1684_vm1, %v1833_v25, 0.0 }
 0x272   :  { %v1744_v19 = vpop.xlane.xlu1 %1743  ;;  %1894 = vadd.xlane.f32.xlu1 %v1893_v37 }
 0x273   :  { %v1808_v27 = vsub.f32 %v4775_v5, %v4902_v3  ;;  %v4907_v11 = vmul.f32 0.020408163, %v1744_v19 }
 0x275   :  { %v1809_v31 = vsub.f32 %v4777_v1, %v4907_v11  ;;  %v1834_v35 = vmul.f32 %v1808_v27, %v1808_v27 }
 0x277   :  { %v1896_v39 = vsel %vm1684_vm1, %v1834_v35, 0.0  ;;  %v1835_v47 = vmul.f32 %v1809_v31, %v1809_v31 }
 0x278   :  { %1897 = vadd.xlane.f32.xlu0 %v1896_v39  ;;  %v1747_v43 = vpop.xlane.xlu0 %1746 }
 0x279   :  { %v4912_v49 = vmul.f32 0.020408163, %v1747_v43  ;;  %v1899_v54 = vsel %vm1684_vm1, %v1835_v47, 0.0 }
 0x27a   :  { %v1750_v58 = vpop.xlane.xlu1 %1749  ;;  %1900 = vadd.xlane.f32.xlu1 %v1899_v54 }
 0x27b   :  { %v1810_v8 = vsub.f32 %v4785_v30, %v4912_v49  ;;  %v4917_v20 = vmul.f32 0.020408163, %v1750_v58 }
 0x27d   :  { %v1811_v51 = vsub.f32 %v4787_v18, %v4917_v20  ;;  %v1836_v2 = vmul.f32 %v1810_v8, %v1810_v8 }
 0x27f   :  { %v1902_v6 = vsel %vm1684_vm1, %v1836_v2, 0.0  ;;  %v1837_v25 = vmul.f32 %v1811_v51, %v1811_v51 }
 0x280   :  { %1903 = vadd.xlane.f32.xlu0 %v1902_v6  ;;  %v1753_v36 = vpop.xlane.xlu0 %1752 }
 0x281   :  { %v4922_v37 = vmul.f32 0.020408163, %v1753_v36  ;;  %v1905_v19 = vsel %vm1684_vm1, %v1837_v25, 0.0 }
 0x282   :  { %v1756_v27 = vpop.xlane.xlu1 %1755  ;;  %1906 = vadd.xlane.f32.xlu1 %v1905_v19 }
 0x283   :  { %v1812_v31 = vsub.f32 %v4795_v52, %v4922_v37  ;;  %v4927_v35 = vmul.f32 0.020408163, %v1756_v27 }
 0x285   :  { %v1813_v39 = vsub.f32 %v4797_v50, %v4927_v35  ;;  %v1838_v47 = vmul.f32 %v1812_v31, %v1812_v31 }
 0x287   :  { %v1908_v43 = vsel %vm1684_vm1, %v1838_v47, 0.0  ;;  %v1839_v54 = vmul.f32 %v1813_v39, %v1813_v39 }
 0x288   :  { %1909 = vadd.xlane.f32.xlu0 %v1908_v43  ;;  %v1759_v58 = vpop.xlane.xlu0 %1758 }
 0x289   :  { %v4932_v8 = vmul.f32 0.020408163, %v1759_v58  ;;  %v1911_v51 = vsel %vm1684_vm1, %v1839_v54, 0.0 }
 0x28a   :  { %v1762_v2 = vpop.xlane.xlu1 %1761  ;;  %1912 = vadd.xlane.f32.xlu1 %v1911_v51 }
 0x28b   :  { %v1814_v6 = vsub.f32 %v4805_v55, %v4932_v8  ;;  %v4937_v25 = vmul.f32 0.020408163, %v1762_v2 }
 0x28d   :  { %v1815_v36 = vsub.f32 %v4807_v14, %v4937_v25  ;;  %v1840_v19 = vmul.f32 %v1814_v6, %v1814_v6 }
 0x28f   :  { %v1914_v27 = vsel %vm1684_vm1, %v1840_v19, 0.0  ;;  %v1841_v31 = vmul.f32 %v1815_v36, %v1815_v36  ;;  %v1998_v36 = vld [vmem:[%s5258_s3] sm:$0xff] }
 0x290   :  { %1915 = vadd.xlane.f32.xlu0 %v1914_v27 }
 0x291   :  { %v1917_v39 = vsel %vm1684_vm1, %v1841_v31, 0.0 }
 0x292   :  { %1918 = vadd.xlane.f32.xlu1 %v1917_v39 }
 0x2bd   :  { %v1844_v47 = vpop.xlane.xlu0 %1843 }
 0x2be   :  { %v1920_v43 = vmul.f32 0.020408163, %v1844_v47  ;;  %v1999_v47 = vld [vmem:[%s5258_s3 + $0x8] sm:$0xff] }
 0x2c0   :  { %v1946_v54 = vadd.f32 1e-05, %v1920_v43 }
 0x2c1   :  { %v1847_v58 = vpop.xlane.xlu1 %1846 }
 0x2c2   :  { %2878 = vrsqrt.f32 %v1946_v54  ;;  %v1921_v51 = vmul.f32 0.020408163, %v1847_v58 }
 0x2c4   :  { %v1947_v55 = vadd.f32 1e-05, %v1921_v51 }
 0x2c5   :  { %v1850_v2 = vpop.xlane.xlu0 %1849 }
 0x2c6   :  { %2880 = vrsqrt.f32 %v1947_v55  ;;  %v1922_v52 = vmul.f32 0.020408163, %v1850_v2  ;;  %v2050_v2 = vld [vmem:[%s5259_s4] sm:$0xff] }
 0x2c8   :  { %v1948_v30 = vadd.f32 1e-05, %v1922_v52 }
 0x2c9   :  { %v1853_v14 = vpop.xlane.xlu1 %1852 }
 0x2ca   :  { %v1923_v6 = vmul.f32 0.020408163, %v1853_v14  ;;  %2882 = vrsqrt.f32 %v1948_v30  ;;  %v2051_v30 = vld [vmem:[%s5259_s4 + $0x8] sm:$0xff] }
 0x2cc   :  { %v2879_v19 = vpop.eup %2878  ;;  %v1949_v27 = vadd.f32 1e-05, %v1923_v6 }
 0x2cd   :  { %v1856_v31 = vpop.xlane.xlu0 %1855  ;;  %v2024_v39 = vmul.f32 %v2879_v19, %v1998_v36 }
 0x2ce   :  { %2884 = vrsqrt.f32 %v1949_v27  ;;  %v1924_v52 = vmul.f32 0.020408163, %v1856_v31 }
 0x2cf   :  { %v1859_v43 = vpop.xlane.xlu1 %1858  ;;  %2130 = vperm.xlu0 %2876, %v2024_v39   ;;  %v2076_v58 = vmul.f32 %v2024_v39, %v4813_v7  ;;  %v2000_v7 = vld [vmem:[%s5258_s3 + $0x10] sm:$0xff]  ;;  %v2001_v39 = vld [vmem:[%s5258_s3 + $0x18] sm:$0xff] }
 0x2d0   :  { %v2881_v55 = vpop.eup %2880  ;;  %v1925_v54 = vmul.f32 0.020408163, %v1859_v43  ;;  %v1950_v36 = vadd.f32 1e-05, %v1924_v52 }
 0x2d1   :  { %v2025_v14 = vmul.f32 %v2881_v55, %v1999_v47  ;;  %v2102_v27 = vsub.f32 %v2050_v2, %v2076_v58  ;;  %v2053_v58 = vld [vmem:[%s5259_s4 + $0x18] sm:$0xff]  ;;  %v2003_v2 = vld [vmem:[%s5258_s3 + $0x28] sm:$0xff] }
 0x2d2   :  { %v1951_v51 = vadd.f32 1e-05, %v1925_v54 }
 0x2d3   :  { %2135 = vperm.xlu1 %2877, %v2025_v14   ;;  %v2077_v6 = vmul.f32 %v2025_v14, %v4817_v9 }
 0x2d4   :  { %2886 = vrsqrt.f32 %v1951_v51  ;;  %v2883_v31 = vpop.eup %2882 }
 0x2d5   :  { %v2103_v19 = vsub.f32 %v2051_v30, %v2077_v6  ;;  %2888 = vrsqrt.f32 %v1950_v36  ;;  %v1862_v55 = vpop.xlane.xlu0 %1861  ;;  %v2026_v52 = vmul.f32 %v2883_v31, %v2000_v7 }
 0x2d6   :  { %v1926_v51 = vmul.f32 0.020408163, %v1862_v55 }
 0x2d7   :  { %v1865_v47 = vpop.xlane.xlu1 %1864  ;;  %2291 = vperm.xlu0 %2876, %v2103_v19   ;;  %2286 = vperm.xlu1 %2877, %v2102_v27   ;;  %v2078_v36 = vmul.f32 %v2026_v52, %v4822_v15  ;;  %v2052_v27 = vld [vmem:[%s5259_s4 + $0x10] sm:$0xff] }
 0x2d8   :  { %v2885_v43 = vpop.eup %2884  ;;  %v1927_v9 = vmul.f32 0.020408163, %v1865_v47  ;;  %v1952_v31 = vadd.f32 1e-05, %v1926_v51  ;;  %v2005_v51 = vld [vmem:[%s5258_s3 + $0x38] sm:$0xff] }
 0x2d9   :  { %v2027_v54 = vmul.f32 %v2885_v43, %v2001_v39  ;;  %v2055_v43 = vld [vmem:[%s5259_s4 + $0x28] sm:$0xff]  ;;  %v2104_v55 = vsub.f32 %v2052_v27, %v2078_v36 }
 0x2da   :  { %v1953_v14 = vadd.f32 1e-05, %v1927_v9 }
 0x2db   :  { %2140 = vperm.xlu1 %2877, %v2026_v52   ;;  %v2079_v30 = vmul.f32 %v2027_v54, %v4827_v29 }
 0x2dc   :  { %2890 = vrsqrt.f32 %v1953_v14  ;;  %v2002_v14 = vld [vmem:[%s5258_s3 + $0x20] sm:$0xff] }
 0x2dd   :  { %v2105_v6 = vsub.f32 %v2053_v58, %v2079_v30  ;;  %v1868_v47 = vpop.xlane.xlu0 %1867  ;;  %2892 = vrsqrt.f32 %v1952_v31  ;;  %v2057_v31 = vld [vmem:[%s5259_s4 + $0x38] sm:$0xff] }
 0x2de   :  { %v2887_v19 = vpop.eup %2886  ;;  %v1928_v58 = vmul.f32 0.020408163, %v1868_v47 }
 0x2df   :  { %v1871_v7 = vpop.xlane.xlu1 %1870  ;;  %2301 = vperm.xlu0 %2876, %v2105_v6   ;;  %2145 = vperm.xlu1 %2877, %v2027_v54   ;;  %v2029_v39 = vmul.f32 %v2887_v19, %v2003_v2  ;;  %v2889_v15 = vpop.eup %2888 }
 0x2e0   :  { %v1929_v29 = vmul.f32 0.020408163, %v1871_v7  ;;  %v2028_v30 = vmul.f32 %v2889_v15, %v2002_v14  ;;  %v1954_v6 = vadd.f32 1e-05, %v1928_v58  ;;  %v2007_v15 = vld [vmem:[%s5258_s3 + $0x48] sm:$0xff] }
 0x2e1   :  { %v2081_v9 = vmul.f32 %v2029_v39, %v4836_v61 }
 0x2e2   :  { %v1955_v52 = vadd.f32 1e-05, %v1929_v29  ;;  %v2080_v47 = vmul.f32 %v2028_v30, %v4832_v23  ;;  %v2004_v23 = vld [vmem:[%s5258_s3 + $0x30] sm:$0xff] }
 0x2e3   :  { %2296 = vperm.xlu1 %2877, %v2104_v55   ;;  %v2107_v54 = vsub.f32 %v2055_v43, %v2081_v9  ;;  %v2054_v43 = vld [vmem:[%s5259_s4 + $0x20] sm:$0xff] }
 0x2e4   :  { %2894 = vrsqrt.f32 %v1955_v52  ;;  %v2106_v14 = vsub.f32 %v2054_v43, %v2080_v47 }
 0x2e5   :  { %2311 = vperm.xlu0 %2876, %v2107_v54   ;;  %v1874_v19 = vpop.xlane.xlu0 %1873  ;;  %2896 = vrsqrt.f32 %v1954_v6 }
 0x2e6   :  { %v2891_v2 = vpop.eup %2890  ;;  %v1930_v55 = vmul.f32 0.020408163, %v1874_v19 }
 0x2e7   :  { %v1877_v61 = vpop.xlane.xlu1 %1876  ;;  %2150 = vperm.xlu1 %2877, %v2028_v30   ;;  %v2031_v36 = vmul.f32 %v2891_v2, %v2005_v51  ;;  %v2893_v52 = vpop.eup %2892  ;;  %v2059_v2 = vld [vmem:[%s5259_s4 + $0x48] sm:$0xff] }
 0x2e8   :  { %v1931_v27 = vmul.f32 0.020408163, %v1877_v61  ;;  %v1956_v58 = vadd.f32 1e-05, %v1930_v55  ;;  %v2030_v6 = vmul.f32 %v2893_v52, %v2004_v23  ;;  %v2056_v55 = vld [vmem:[%s5259_s4 + $0x30] sm:$0xff]  ;;  %v2061_v23 = vld [vmem:[%s5259_s4 + $0x58] sm:$0xff] }
 0x2e9   :  { %v2083_v7 = vmul.f32 %v2031_v36, %v4847_v17 }
 0x2ea   :  { %v1957_v29 = vadd.f32 1e-05, %v1931_v27 }
 0x2eb   :  { %2155 = vperm.xlu1 %2877, %v2029_v39   ;;  %v2109_v9 = vsub.f32 %v2057_v31, %v2083_v7  ;;  %v2009_v7 = vld [vmem:[%s5258_s3 + $0x58] sm:$0xff] }
 0x2ec   :  { %2898 = vrsqrt.f32 %v1957_v29  ;;  %v2082_v29 = vmul.f32 %v2030_v6, %v4842_v57 }
 0x2ed   :  { %2321 = vperm.xlu0 %2876, %v2109_v9   ;;  %v1880_v30 = vpop.xlane.xlu0 %1879  ;;  %2900 = vrsqrt.f32 %v1956_v58 }
 0x2ee   :  { %v2895_v17 = vpop.eup %2894  ;;  %v1932_v27 = vmul.f32 0.020408163, %v1880_v30  ;;  %v2108_v57 = vsub.f32 %v2056_v55, %v2082_v29 }
 0x2ef   :  { %v1883_v54 = vpop.xlane.xlu1 %1882  ;;  %2306 = vperm.xlu1 %2877, %v2106_v14   ;;  %v2033_v51 = vmul.f32 %v2895_v17, %v2007_v15  ;;  %v2897_v47 = vpop.eup %2896 }
 0x2f0   :  { %v1933_v39 = vmul.f32 0.020408163, %v1883_v54  ;;  %v1958_v9 = vadd.f32 1e-05, %v1932_v27 }
 0x2f1   :  { %2175 = vperm.xlu0 %2876, %v2033_v51   ;;  %v2085_v61 = vmul.f32 %v2033_v51, %v4857_v62  ;;  %v2006_v62 = vld [vmem:[%s5258_s3 + $0x40] sm:$0xff] }
 0x2f2   :  { %v1959_v19 = vadd.f32 1e-05, %v1933_v39  ;;  %v2032_v54 = vmul.f32 %v2897_v47, %v2006_v62 }
 0x2f3   :  { %2160 = vperm.xlu1 %2877, %v2030_v6   ;;  %v2111_v31 = vsub.f32 %v2059_v2, %v2085_v61 }
 0x2f4   :  { %2902 = vrsqrt.f32 %v1959_v19  ;;  %v2084_v6 = vmul.f32 %v2032_v54, %v4852_v16  ;;  %v2008_v19 = vld [vmem:[%s5258_s3 + $0x50] sm:$0xff] }
 0x2f5   :  { %2331 = vperm.xlu0 %2876, %v2111_v31   ;;  %v1886_v14 = vpop.xlane.xlu0 %1885  ;;  %2904 = vrsqrt.f32 %v1958_v9 }
 0x2f6   :  { %v2899_v43 = vpop.eup %2898  ;;  %v1934_v30 = vmul.f32 0.020408163, %v1886_v14  ;;  %v2013_v14 = vld [vmem:[%s5258_s3 + $0x78] sm:$0xff] }
 0x2f7   :  { %v1889_v15 = vpop.xlane.xlu1 %1888  ;;  %2165 = vperm.xlu1 %2877, %v2031_v36   ;;  %v2035_v52 = vmul.f32 %v2899_v43, %v2009_v7  ;;  %v2011_v36 = vld [vmem:[%s5258_s3 + $0x68] sm:$0xff]  ;;  %v2901_v2 = vpop.eup %2900 }
 0x2f8   :  { %v1935_v17 = vmul.f32 0.020408163, %v1889_v15  ;;  %v1960_v27 = vadd.f32 1e-05, %v1934_v30  ;;  %v2063_v43 = vld [vmem:[%s5259_s4 + $0x68] sm:$0xff]  ;;  %v2034_v62 = vmul.f32 %v2901_v2, %v2008_v19  ;;  %v2065_v2 = vld [vmem:[%s5259_s4 + $0x78] sm:$0xff] }
 0x2f9   :  { %2185 = vperm.xlu0 %2876, %v2035_v52   ;;  %v2087_v58 = vmul.f32 %v2035_v52, %v4867_v26  ;;  %v2058_v26 = vld [vmem:[%s5259_s4 + $0x40] sm:$0xff] }
 0x2fa   :  { %v1961_v51 = vadd.f32 1e-05, %v1935_v17  ;;  %v2110_v16 = vsub.f32 %v2058_v26, %v2084_v6 }
 0x2fb   :  { %2316 = vperm.xlu1 %2877, %v2108_v57   ;;  %v2113_v39 = vsub.f32 %v2061_v23, %v2087_v58  ;;  %v2086_v23 = vmul.f32 %v2034_v62, %v4862_v44  ;;  %v2010_v58 = vld [vmem:[%s5258_s3 + $0x60] sm:$0xff] }
 0x2fc   :  { %2906 = vrsqrt.f32 %v1961_v51 }
 0x2fd   :  { %2341 = vperm.xlu0 %2876, %v2113_v39   ;;  %v1892_v47 = vpop.xlane.xlu0 %1891  ;;  %2908 = vrsqrt.f32 %v1960_v27 }
 0x2fe   :  { %v2903_v61 = vpop.eup %2902  ;;  %v1936_v15 = vmul.f32 0.020408163, %v1892_v47 }
 0x2ff   :  { %v1895_v31 = vpop.xlane.xlu1 %1894  ;;  %2170 = vperm.xlu1 %2877, %v2032_v54   ;;  %v2037_v7 = vmul.f32 %v2903_v61, %v2011_v36  ;;  %v2905_v17 = vpop.eup %2904 }
 0x300   :  { %v1937_v29 = vmul.f32 0.020408163, %v1895_v31  ;;  %v1962_v54 = vadd.f32 1e-05, %v1936_v15  ;;  %v2036_v61 = vmul.f32 %v2905_v17, %v2010_v58  ;;  %v2015_v31 = vld [vmem:[%s5258_s3 + $0x88] sm:$0xff]  ;;  %v2017_v58 = vld [vmem:[%s5258_s3 + $0x98] sm:$0xff] }
 0x301   :  { %2195 = vperm.xlu0 %2876, %v2037_v7   ;;  %v2089_v55 = vmul.f32 %v2037_v7, %v4877_v12  ;;  %v2060_v12 = vld [vmem:[%s5259_s4 + $0x50] sm:$0xff] }
 0x302   :  { %v1963_v9 = vadd.f32 1e-05, %v1937_v29  ;;  %v2112_v44 = vsub.f32 %v2060_v12, %v2086_v23  ;;  %v2088_v47 = vmul.f32 %v2036_v61, %v4872_v22 }
 0x303   :  { %2326 = vperm.xlu1 %2877, %v2110_v16   ;;  %v2115_v52 = vsub.f32 %v2063_v43, %v2089_v55  ;;  %v2012_v43 = vld [vmem:[%s5258_s3 + $0x70] sm:$0xff] }
 0x304   :  { %2910 = vrsqrt.f32 %v1963_v9 }
 0x305   :  { %2351 = vperm.xlu0 %2876, %v2115_v52   ;;  %v1898_v39 = vpop.xlane.xlu0 %1897  ;;  %2912 = vrsqrt.f32 %v1962_v54  ;;  %v2067_v52 = vld [vmem:[%s5259_s4 + $0x88] sm:$0xff] }
 0x306   :  { %v2907_v57 = vpop.eup %2906  ;;  %v1938_v19 = vmul.f32 0.020408163, %v1898_v39  ;;  %v2014_v39 = vld [vmem:[%s5258_s3 + $0x80] sm:$0xff] }
 0x307   :  { %v1901_v51 = vpop.xlane.xlu1 %1900  ;;  %2180 = vperm.xlu1 %2877, %v2034_v62   ;;  %v2039_v30 = vmul.f32 %v2907_v57, %v2013_v14  ;;  %v2909_v7 = vpop.eup %2908 }
 0x308   :  { %v1939_v36 = vmul.f32 0.020408163, %v1901_v51  ;;  %v1964_v16 = vadd.f32 1e-05, %v1938_v19  ;;  %v2038_v17 = vmul.f32 %v2909_v7, %v2012_v43 }
 0x309   :  { %2205 = vperm.xlu0 %2876, %v2039_v30   ;;  %v2091_v6 = vmul.f32 %v2039_v30, %v4887_v42  ;;  %v2062_v42 = vld [vmem:[%s5259_s4 + $0x60] sm:$0xff] }
 0x30a   :  { %v1965_v26 = vadd.f32 1e-05, %v1939_v36  ;;  %v2114_v22 = vsub.f32 %v2062_v42, %v2088_v47  ;;  %v2090_v51 = vmul.f32 %v2038_v17, %v4882_v10 }
 0x30b   :  { %2336 = vperm.xlu1 %2877, %v2112_v44   ;;  %v2117_v27 = vsub.f32 %v2065_v2, %v2091_v6 }
 0x30c   :  { %2914 = vrsqrt.f32 %v1965_v26  ;;  %v2069_v26 = vld [vmem:[%s5259_s4 + $0x98] sm:$0xff] }
 0x30d   :  { %2361 = vperm.xlu0 %2876, %v2117_v27   ;;  %v1904_v9 = vpop.xlane.xlu0 %1903  ;;  %2916 = vrsqrt.f32 %v1964_v16 }
 0x30e   :  { %v2911_v29 = vpop.eup %2910  ;;  %v1940_v57 = vmul.f32 0.020408163, %v1904_v9 }
 0x30f   :  { %v1907_v55 = vpop.xlane.xlu1 %1906  ;;  %2190 = vperm.xlu1 %2877, %v2036_v61   ;;  %v2041_v62 = vmul.f32 %v2911_v29, %v2015_v31  ;;  %v2913_v54 = vpop.eup %2912  ;;  %v2019_v29 = vld [vmem:[%s5258_s3 + $0xa8] sm:$0xff] }
 0x310   :  { %v1941_v15 = vmul.f32 0.020408163, %v1907_v55  ;;  %v1966_v36 = vadd.f32 1e-05, %v1940_v57  ;;  %v2040_v27 = vmul.f32 %v2913_v54, %v2014_v39  ;;  %v2016_v55 = vld [vmem:[%s5258_s3 + $0x90] sm:$0xff]  ;;  %v2021_v54 = vld [vmem:[%s5258_s3 + $0xb8] sm:$0xff] }
 0x311   :  { %2215 = vperm.xlu0 %2876, %v2041_v62   ;;  %v2093_v14 = vmul.f32 %v2041_v62, %v4897_v38  ;;  %v2064_v38 = vld [vmem:[%s5259_s4 + $0x70] sm:$0xff]  ;;  %v2018_v39 = vld [vmem:[%s5258_s3 + $0xa0] sm:$0xff] }
 0x312   :  { %v1967_v23 = vadd.f32 1e-05, %v1941_v15  ;;  %v2116_v10 = vsub.f32 %v2064_v38, %v2090_v51  ;;  %v2092_v43 = vmul.f32 %v2040_v27, %v4892_v45 }
 0x313   :  { %2346 = vperm.xlu1 %2877, %v2114_v22   ;;  %v2119_v12 = vsub.f32 %v2067_v52, %v2093_v14  ;;  %v2071_v22 = vld [vmem:[%s5259_s4 + $0xa8] sm:$0xff] }
 0x314   :  { %2918 = vrsqrt.f32 %v1967_v23 }
 0x315   :  { %2371 = vperm.xlu0 %2876, %v2119_v12   ;;  %v1910_v6 = vpop.xlane.xlu0 %1909  ;;  %2920 = vrsqrt.f32 %v1966_v36 }
 0x316   :  { %v2915_v30 = vpop.eup %2914  ;;  %v1942_v7 = vmul.f32 0.020408163, %v1910_v6 }
 0x317   :  { %v1913_v2 = vpop.xlane.xlu1 %1912  ;;  %2200 = vperm.xlu1 %2877, %v2038_v17   ;;  %v2043_v44 = vmul.f32 %v2915_v30, %v2017_v58  ;;  %v2917_v42 = vpop.eup %2916 }
 0x318   :  { %v1943_v61 = vmul.f32 0.020408163, %v1913_v2  ;;  %v1968_v62 = vadd.f32 1e-05, %v1942_v7  ;;  %v2042_v23 = vmul.f32 %v2917_v42, %v2016_v55  ;;  %v2070_v7 = vld [vmem:[%s5259_s4 + $0xa0] sm:$0xff] }
 0x319   :  { %2225 = vperm.xlu0 %2876, %v2043_v44   ;;  %v2095_v19 = vmul.f32 %v2043_v44, %v4907_v11  ;;  %v2066_v11 = vld [vmem:[%s5259_s4 + $0x80] sm:$0xff]  ;;  %v2073_v44 = vld [vmem:[%s5259_s4 + $0xb8] sm:$0xff] }
 0x31a   :  { %v1969_v31 = vadd.f32 1e-05, %v1943_v61  ;;  %v2118_v45 = vsub.f32 %v2066_v11, %v2092_v43  ;;  %v2094_v30 = vmul.f32 %v2042_v23, %v4902_v3 }
 0x31b   :  { %2356 = vperm.xlu1 %2877, %v2116_v10   ;;  %v2121_v47 = vsub.f32 %v2069_v26, %v2095_v19  ;;  %v2023_v10 = vld [vmem:[%s5258_s3 + $0xc8] sm:$0xff] }
 0x31c   :  { %2922 = vrsqrt.f32 %v1969_v31 }
 0x31d   :  { %2381 = vperm.xlu0 %2876, %v2121_v47   ;;  %v1916_v14 = vpop.xlane.xlu0 %1915  ;;  %2924 = vrsqrt.f32 %v1968_v62  ;;  %v2072_v62 = vld [vmem:[%s5259_s4 + $0xb0] sm:$0xff] }
 0x31e   :  { %v2919_v16 = vpop.eup %2918  ;;  %v1944_v58 = vmul.f32 0.020408163, %v1916_v14 }
 0x31f   :  { %v1919_v9 = vpop.xlane.xlu1 %1918  ;;  %2210 = vperm.xlu1 %2877, %v2040_v27   ;;  %v2045_v15 = vmul.f32 %v2919_v16, %v2019_v29  ;;  %v2921_v51 = vpop.eup %2920  ;;  %v2075_v29 = vld [vmem:[%s5259_s4 + $0xc8] sm:$0xff] }
 0x320   :  { %v1945_v52 = vmul.f32 0.020408163, %v1919_v9  ;;  %v1970_v2 = vadd.f32 1e-05, %v1944_v58  ;;  %v2044_v61 = vmul.f32 %v2921_v51, %v2018_v39  ;;  %v2022_v9 = vld [vmem:[%s5258_s3 + $0xc0] sm:$0xff] }
 0x321   :  { %2235 = vperm.xlu0 %2876, %v2045_v15   ;;  %v2097_v17 = vmul.f32 %v2045_v15, %v4917_v20  ;;  %v2068_v20 = vld [vmem:[%s5259_s4 + $0x90] sm:$0xff] }
 0x322   :  { %v1971_v57 = vadd.f32 1e-05, %v1945_v52  ;;  %v2120_v6 = vsub.f32 %v2068_v20, %v2094_v30  ;;  %v2096_v27 = vmul.f32 %v2044_v61, %v4912_v49 }
 0x323   :  { %2366 = vperm.xlu1 %2877, %v2118_v45   ;;  %v2123_v12 = vsub.f32 %v2071_v22, %v2097_v17  ;;  %v2074_v22 = vld [vmem:[%s5259_s4 + $0xc0] sm:$0xff] }
 0x324   :  { %2926 = vrsqrt.f32 %v1971_v57  ;;  %v2122_v42 = vsub.f32 %v2070_v7, %v2096_v27 }
 0x325   :  { %2391 = vperm.xlu0 %2876, %v2123_v12   ;;  %2928 = vrsqrt.f32 %v1970_v2 }
 0x326   :  { %v2923_v38 = vpop.eup %2922 }
 0x327   :  { %2220 = vperm.xlu1 %2877, %v2042_v23   ;;  %v2047_v36 = vmul.f32 %v2923_v38, %v2021_v54  ;;  %v2925_v19 = vpop.eup %2924 }
 0x329   :  { %2245 = vperm.xlu0 %2876, %v2047_v36   ;;  %v2099_v3 = vmul.f32 %v2047_v36, %v4927_v35  ;;  %v2020_v35 = vld [vmem:[%s5258_s3 + $0xb0] sm:$0xff] }
 0x32a   :  { %v2046_v49 = vmul.f32 %v2925_v19, %v2020_v35 }
 0x32b   :  { %2376 = vperm.xlu1 %2877, %v2120_v6   ;;  %v2125_v26 = vsub.f32 %v2073_v44, %v2099_v3 }
 0x32c   :  { %v2098_v11 = vmul.f32 %v2046_v49, %v4922_v37 }
 0x32d   :  { %2401 = vperm.xlu0 %2876, %v2125_v26  }
 0x32e   :  { %v2927_v31 = vpop.eup %2926  ;;  %v2124_v15 = vsub.f32 %v2072_v62, %v2098_v11 }
 0x32f   :  { %2230 = vperm.xlu1 %2877, %v2044_v61   ;;  %v2049_v47 = vmul.f32 %v2927_v31, %v2023_v10  ;;  %v2929_v55 = vpop.eup %2928 }
 0x330   :  { %v2048_v52 = vmul.f32 %v2929_v55, %v2022_v9 }
 0x331   :  { %2255 = vperm.xlu0 %2876, %v2049_v47   ;;  %v2101_v43 = vmul.f32 %v2049_v47, %v4937_v25 }
 0x332   :  { %v2100_v25 = vmul.f32 %v2048_v52, %v4932_v8 }
 0x333   :  { %2386 = vperm.xlu1 %2877, %v2122_v42   ;;  %v2127_v16 = vsub.f32 %v2075_v29, %v2101_v43 }
 0x334   :  { %v2126_v37 = vsub.f32 %v2074_v22, %v2100_v25 }
 0x335   :  { %2411 = vperm.xlu0 %2876, %v2127_v16  }
 0x337   :  { %2240 = vperm.xlu1 %2877, %v2046_v49  }
 0x33b   :  { %2396 = vperm.xlu1 %2877, %v2124_v15  }
 0x33f   :  { %2250 = vperm.xlu1 %2877, %v2048_v52  }
 0x343   :  { %2406 = vperm.xlu1 %2877, %v2126_v37  }
 0x34e   :  { %v2131_v14 = vpop.permute.xlu0 %2130 }
 0x34f   :  { %v2258_v17 = vmul.f32 %v2131_v14, %v4685_v41 }
 0x352   :  { %v2136_v45 = vpop.permute.xlu1 %2135 }
 0x353   :  { %v2259_v23 = vmul.f32 %v2136_v45, %v4687_v46 }
 0x356   :  { %v2287_v57 = vpop.permute.xlu1 %2286  ;;  %v2292_v12 = vpop.permute.xlu0 %2291 }
 0x357   :  { %v2414_v58 = vadd.f32 %v2287_v57, %v2258_v17  ;;  %v2415_v54 = vadd.f32 %v2292_v12, %v2259_v23 }
 0x359   :  { %2440 = vst.msk [vmem:[%s5260_s5] sm:$0xff] %vm1684_vm1, %v2414_v58  ;;  %2441 = vst.msk [vmem:[%s5260_s5 + $0x8] sm:$0xff] %vm1684_vm1, %v2415_v54 }
 0x35a   :  { %v2141_v8 = vpop.permute.xlu1 %2140 }
 0x35b   :  { %v2260_v46 = vmul.f32 %v2141_v8, %v4695_v13 }
 0x35e   :  { %v2146_v51 = vpop.permute.xlu1 %2145  ;;  %v2302_v30 = vpop.permute.xlu0 %2301 }
 0x35f   :  { %v2261_v41 = vmul.f32 %v2146_v51, %v4697_v21 }
 0x361   :  { %v2417_v38 = vadd.f32 %v2302_v30, %v2261_v41 }
 0x362   :  { %v2297_v20 = vpop.permute.xlu1 %2296 }
 0x363   :  { %2443 = vst.msk [vmem:[%s5260_s5 + $0x18] sm:$0xff] %vm1684_vm1, %v2417_v38  ;;  %v2416_v39 = vadd.f32 %v2297_v20, %v2260_v46 }
 0x364   :  { %v2312_v2 = vpop.permute.xlu0 %2311 }
 0x365   :  { %2442 = vst.msk [vmem:[%s5260_s5 + $0x10] sm:$0xff] %vm1684_vm1, %v2416_v39 }
 0x366   :  { %v2151_v36 = vpop.permute.xlu1 %2150 }
 0x367   :  { %v2262_v13 = vmul.f32 %v2151_v36, %v4705_v48 }
 0x36a   :  { %v2156_v44 = vpop.permute.xlu1 %2155 }
 0x36b   :  { %v2263_v21 = vmul.f32 %v2156_v44, %v4707_v53 }
 0x36c   :  { %v2322_v6 = vpop.permute.xlu0 %2321 }
 0x36d   :  { %v2419_v3 = vadd.f32 %v2312_v2, %v2263_v21 }
 0x36e   :  { %v2307_v61 = vpop.permute.xlu1 %2306 }
 0x36f   :  { %2445 = vst.msk [vmem:[%s5260_s5 + $0x28] sm:$0xff] %vm1684_vm1, %v2419_v3  ;;  %v2418_v26 = vadd.f32 %v2307_v61, %v2262_v13 }
 0x370   :  { %v2176_v10 = vpop.permute.xlu0 %2175 }
 0x371   :  { %2444 = vst.msk [vmem:[%s5260_s5 + $0x20] sm:$0xff] %vm1684_vm1, %v2418_v26  ;;  %v2267_v53 = vmul.f32 %v2176_v10, %v4727_v28 }
 0x372   :  { %v2161_v19 = vpop.permute.xlu1 %2160 }
 0x373   :  { %v2264_v47 = vmul.f32 %v2161_v19, %v4715_v40 }
 0x374   :  { %v2332_v27 = vpop.permute.xlu0 %2331 }
 0x375   :  { %v2423_v31 = vadd.f32 %v2332_v27, %v2267_v53  ;;  %v5269_v27 = vld [vmem:[#allocation2_spill] sm:$0xff] }
 0x376   :  { %v2166_v48 = vpop.permute.xlu1 %2165 }
 0x377   :  { %2449 = vst.msk [vmem:[%s5260_s5 + $0x48] sm:$0xff] %vm1684_vm1, %v2423_v31  ;;  %v2265_v7 = vmul.f32 %v2166_v48, %v4717_v4  ;;  %v5270_v48 = vld [vmem:[#allocation5_spill] sm:$0xff] }
 0x378   :  { %v2186_v35 = vpop.permute.xlu0 %2185 }
 0x379   :  { %v2421_v29 = vadd.f32 %v2322_v6, %v2265_v7  ;;  %v2269_v28 = vmul.f32 %v2186_v35, %v4737_v32 }
 0x37a   :  { %v2317_v42 = vpop.permute.xlu1 %2316 }
 0x37b   :  { %2447 = vst.msk [vmem:[%s5260_s5 + $0x38] sm:$0xff] %vm1684_vm1, %v2421_v29  ;;  %v2420_v43 = vadd.f32 %v2317_v42, %v2264_v47  ;;  %v5271_v42 = vld [vmem:[#allocation3_spill] sm:$0xff] }
 0x37c   :  { %v2342_v49 = vpop.permute.xlu0 %2341 }
 0x37d   :  { %2446 = vst.msk [vmem:[%s5260_s5 + $0x30] sm:$0xff] %vm1684_vm1, %v2420_v43  ;;  %v2425_v4 = vadd.f32 %v2342_v49, %v2269_v28 }
 0x37e   :  { %v2171_v16 = vpop.permute.xlu1 %2170 }
 0x37f   :  { %2451 = vst.msk [vmem:[%s5260_s5 + $0x58] sm:$0xff] %vm1684_vm1, %v2425_v4  ;;  %v2266_v11 = vmul.f32 %v2171_v16, %v4725_v59  ;;  %v5272_v16 = vld [vmem:[#allocation4_spill] sm:$0xff] }
 0x380   :  { %v2196_v40 = vpop.permute.xlu0 %2195 }
 0x381   :  { %v2271_v32 = vmul.f32 %v2196_v40, %v4747_v56 }
 0x382   :  { %v2327_v55 = vpop.permute.xlu1 %2326 }
 0x383   :  { %v2422_v62 = vadd.f32 %v2327_v55, %v2266_v11 }
 0x384   :  { %v2352_v9 = vpop.permute.xlu0 %2351 }
 0x385   :  { %2448 = vst.msk [vmem:[%s5260_s5 + $0x40] sm:$0xff] %vm1684_vm1, %v2422_v62  ;;  %v2427_v15 = vadd.f32 %v2352_v9, %v2271_v32 }
 0x386   :  { %v2181_v52 = vpop.permute.xlu1 %2180 }
 0x387   :  { %2453 = vst.msk [vmem:[%s5260_s5 + $0x68] sm:$0xff] %vm1684_vm1, %v2427_v15  ;;  %v2268_v59 = vmul.f32 %v2181_v52, %v4735_v24 }
 0x388   :  { %v2206_v25 = vpop.permute.xlu0 %2205 }
 0x389   :  { %v2273_v56 = vmul.f32 %v2206_v25, %v4757_v63 }
 0x38a   :  { %v2337_v22 = vpop.permute.xlu1 %2336 }
 0x38b   :  { %v2424_v37 = vadd.f32 %v2337_v22, %v2268_v59 }
 0x38c   :  { %v2362_v14 = vpop.permute.xlu0 %2361 }
 0x38d   :  { %2450 = vst.msk [vmem:[%s5260_s5 + $0x50] sm:$0xff] %vm1684_vm1, %v2424_v37  ;;  %v2429_v45 = vadd.f32 %v2362_v14, %v2273_v56 }
 0x38e   :  { %v2191_v17 = vpop.permute.xlu1 %2190 }
 0x38f   :  { %2455 = vst.msk [vmem:[%s5260_s5 + $0x78] sm:$0xff] %vm1684_vm1, %v2429_v45  ;;  %v2270_v24 = vmul.f32 %v2191_v17, %v4745_v60 }
 0x390   :  { %v2216_v23 = vpop.permute.xlu0 %2215 }
 0x391   :  { %v2275_v63 = vmul.f32 %v2216_v23, %v4767_v33 }
 0x392   :  { %v2347_v57 = vpop.permute.xlu1 %2346 }
 0x393   :  { %v2426_v12 = vadd.f32 %v2347_v57, %v2270_v24 }
 0x394   :  { %v2372_v58 = vpop.permute.xlu0 %2371 }
 0x395   :  { %2452 = vst.msk [vmem:[%s5260_s5 + $0x60] sm:$0xff] %vm1684_vm1, %v2426_v12  ;;  %v2431_v54 = vadd.f32 %v2372_v58, %v2275_v63 }
 0x396   :  { %v2201_v8 = vpop.permute.xlu1 %2200 }
 0x397   :  { %2457 = vst.msk [vmem:[%s5260_s5 + $0x88] sm:$0xff] %vm1684_vm1, %v2431_v54  ;;  %v2272_v60 = vmul.f32 %v2201_v8, %v4755_v34 }
 0x398   :  { %v2226_v51 = vpop.permute.xlu0 %2225 }
 0x399   :  { %v2277_v33 = vmul.f32 %v2226_v51, %v4777_v1 }
 0x39a   :  { %v2357_v41 = vpop.permute.xlu1 %2356 }
 0x39b   :  { %v2428_v30 = vadd.f32 %v2357_v41, %v2272_v60 }
 0x39c   :  { %v2382_v46 = vpop.permute.xlu0 %2381 }
 0x39d   :  { %2454 = vst.msk [vmem:[%s5260_s5 + $0x70] sm:$0xff] %vm1684_vm1, %v2428_v30  ;;  %v2433_v38 = vadd.f32 %v2382_v46, %v2277_v33 }
 0x39e   :  { %v2211_v20 = vpop.permute.xlu1 %2210 }
 0x39f   :  { %2459 = vst.msk [vmem:[%s5260_s5 + $0x98] sm:$0xff] %vm1684_vm1, %v2433_v38  ;;  %v2274_v34 = vmul.f32 %v2211_v20, %v4765_v0 }
 0x3a0   :  { %v2236_v39 = vpop.permute.xlu0 %2235 }
 0x3a1   :  { %v2279_v1 = vmul.f32 %v2236_v39, %v4787_v18 }
 0x3a2   :  { %v2367_v36 = vpop.permute.xlu1 %2366 }
 0x3a3   :  { %v2430_v2 = vadd.f32 %v2367_v36, %v2274_v34 }
 0x3a4   :  { %v2392_v44 = vpop.permute.xlu0 %2391 }
 0x3a5   :  { %2456 = vst.msk [vmem:[%s5260_s5 + $0x80] sm:$0xff] %vm1684_vm1, %v2430_v2  ;;  %v2435_v21 = vadd.f32 %v2392_v44, %v2279_v1 }
 0x3a6   :  { %v2221_v6 = vpop.permute.xlu1 %2220 }
 0x3a7   :  { %2461 = vst.msk [vmem:[%s5260_s5 + $0xa8] sm:$0xff] %vm1684_vm1, %v2435_v21  ;;  %v2276_v0 = vmul.f32 %v2221_v6, %v4775_v5 }
 0x3a8   :  { %v2246_v13 = vpop.permute.xlu0 %2245 }
 0x3a9   :  { %v2281_v18 = vmul.f32 %v2246_v13, %v4797_v50 }
 0x3aa   :  { %v2377_v3 = vpop.permute.xlu1 %2376 }
 0x3ab   :  { %v2432_v61 = vadd.f32 %v2377_v3, %v2276_v0 }
 0x3ac   :  { %v2402_v26 = vpop.permute.xlu0 %2401 }
 0x3ad   :  { %2458 = vst.msk [vmem:[%s5260_s5 + $0x90] sm:$0xff] %vm1684_vm1, %v2432_v61  ;;  %v2437_v10 = vadd.f32 %v2402_v26, %v2281_v18 }
 0x3ae   :  { %v2231_v19 = vpop.permute.xlu1 %2230 }
 0x3af   :  { %2463 = vst.msk [vmem:[%s5260_s5 + $0xb8] sm:$0xff] %vm1684_vm1, %v2437_v10  ;;  %v2278_v5 = vmul.f32 %v2231_v19, %v5269_v27 }
 0x3b0   :  { %v2256_v53 = vpop.permute.xlu0 %2255 }
 0x3b1   :  { %v2283_v50 = vmul.f32 %v2256_v53, %v5270_v48 }
 0x3b2   :  { %v2387_v31 = vpop.permute.xlu1 %2386 }
 0x3b3   :  { %v2434_v7 = vadd.f32 %v2387_v31, %v2278_v5 }
 0x3b4   :  { %v2412_v35 = vpop.permute.xlu0 %2411 }
 0x3b5   :  { %2460 = vst.msk [vmem:[%s5260_s5 + $0xa0] sm:$0xff] %vm1684_vm1, %v2434_v7  ;;  %v2439_v47 = vadd.f32 %v2412_v35, %v2283_v50 }
 0x3b6   :  { %v2241_v29 = vpop.permute.xlu1 %2240 }
 0x3b7   :  { %2465 = vst.msk [vmem:[%s5260_s5 + $0xc8] sm:$0xff] %vm1684_vm1, %v2439_v47  ;;  %v2280_v28 = vmul.f32 %v2241_v29, %v5271_v42 }
 0x3ba   :  { %v2397_v43 = vpop.permute.xlu1 %2396 }
 0x3bb   :  { %v2436_v49 = vadd.f32 %v2397_v43, %v2280_v28 }
 0x3bd   :  { %2462 = vst.msk [vmem:[%s5260_s5 + $0xb0] sm:$0xff] %vm1684_vm1, %v2436_v49 }
 0x3be   :  { %v2251_v4 = vpop.permute.xlu1 %2250 }
 0x3bf   :  { %v2282_v40 = vmul.f32 %v2251_v4, %v5272_v16 }
 0x3c2   :  { %v2407_v11 = vpop.permute.xlu1 %2406 }
 0x3c3   :  { %v2438_v55 = vadd.f32 %v2407_v11, %v2282_v40 }
 0x3c5   :  { %2464 = vst.msk [vmem:[%s5260_s5 + $0xc0] sm:$0xff] %vm1684_vm1, %v2438_v55 }

</bundles_post_ra>
